<compile_context>
chip_gen: v5e
topology: v5e:2x2
jax: 0.10.0
libtpu: 0.0.40
codegen_flags: <defaults>
</compile_context>

<pallas_src>
import functools
import math

import jax
import jax.numpy as jnp
from jax.experimental import pallas as pl
from jax.experimental.pallas import tpu as pltpu

LN_EPS = 1e-12  # BERT LayerNorm eps


def _layernorm(x, gamma, beta):
    mu = jnp.mean(x, axis=-1, keepdims=True)
    var = jnp.mean((x - mu) ** 2, axis=-1, keepdims=True)
    return (x - mu) * jax.lax.rsqrt(var + LN_EPS) * gamma + beta


def bert_layer_kernel(
    x_ref, mask_ref,
    g0_ref, be0_ref,
    wq_ref, bq_ref, wk_ref, bk_ref, wv_ref, bv_ref,
    wo_ref, bo_ref, g1_ref, be1_ref,
    wi_ref, bi_ref, w2_ref, b2_ref, g2_ref, be2_ref,
    out_ref,
    ln_scratch, k_scratch, v_scratch,
    *, num_heads, head_dim, tq,
):
    nH, dH = num_heads, head_dim
    S = x_ref.shape[1]
    H = x_ref.shape[2]

    # ---- once per batch element: full-seq LN + K/V projection cached in VMEM ----
    @pl.when(pl.program_id(1) == 0)
    def _():
        x_all = x_ref[0]                                              # (S, H) f32
        ln_all = _layernorm(x_all, g0_ref[0], be0_ref[0]).astype(jnp.bfloat16)
        ln_scratch[...] = ln_all                                      # reused by every q-tile
        k = jnp.dot(ln_all, wk_ref[...],
                    preferred_element_type=jnp.float32) + bk_ref[0]
        v = jnp.dot(ln_all, wv_ref[...],
                    preferred_element_type=jnp.float32) + bv_ref[0]
        # TODO(synk): dH=64 last dim only half-fills bf16 (16,128) tiles; a
        # (nH, dH, S) K^T layout would make the big operand lane-dense.
        k_scratch[...] = jnp.transpose(k.reshape(S, nH, dH), (1, 0, 2)).astype(jnp.bfloat16)
        v_scratch[...] = jnp.transpose(v.reshape(S, nH, dH), (1, 0, 2)).astype(jnp.bfloat16)

    # ---- query tile (also the residual input) ----
    row0 = pl.multiple_of(pl.program_id(1) * tq, tq)
    x_t = x_ref[0, pl.ds(row0, tq), :]                                # (tq, H) f32, pre-LN residual
    ln_q = ln_scratch[pl.ds(row0, tq), :]                             # cached LN output, bf16

    q = jnp.dot(ln_q, wq_ref[...],
                preferred_element_type=jnp.float32) + bq_ref[0]
    q = q * (1.0 / math.sqrt(dH))                                     # fold softmax scale into Q
    q3 = jnp.transpose(q.reshape(tq, nH, dH), (1, 0, 2)).astype(jnp.bfloat16)  # (nH, tq, dH)

    # ---- attention: all heads batched ----
    scores = jnp.einsum("nqd,nkd->nqk", q3, k_scratch[...],
                        preferred_element_type=jnp.float32)           # (nH, tq, S)
    scores = scores + mask_ref[0]                                     # (1, S) broadcast
    scores = scores - jnp.max(scores, axis=-1, keepdims=True)
    p = jnp.exp(scores)
    denom = jnp.sum(p, axis=-1, keepdims=True)
    probs = (p * pl.reciprocal(denom, approx=True)).astype(jnp.bfloat16)
    ctx = jnp.einsum("nqk,nkd->nqd", probs, v_scratch[...],
                     preferred_element_type=jnp.float32)              # (nH, tq, dH)

    # ---- attention output dense: relayout heads -> hidden, ONE K=H matmul ----
    ctx2d = jnp.transpose(ctx, (1, 0, 2)).reshape(tq, nH * dH).astype(jnp.bfloat16)  # (tq, H)
    attn = jnp.dot(ctx2d, wo_ref[...],
                   preferred_element_type=jnp.float32) + bo_ref[0]    # (tq, H)
    attn_out = _layernorm(attn + x_t, g1_ref[0], be1_ref[0])

    # ---- FFN: intermediate dense + exact (erf) GELU, output dense + LN ----
    inter = jnp.dot(attn_out.astype(jnp.bfloat16), wi_ref[...],
                    preferred_element_type=jnp.float32) + bi_ref[0]
    inter = 0.5 * inter * (1.0 + jax.lax.erf(inter * (1.0 / math.sqrt(2.0))))

    out = jnp.dot(inter.astype(jnp.bfloat16), w2_ref[...],
                  preferred_element_type=jnp.float32) + b2_ref[0]
    out_ref[0] = _layernorm(out + attn_out, g2_ref[0], be2_ref[0])


def _default_vmem_limit():
    """Per-generation VMEM budget: physical minus headroom, capped at ~100 MiB."""
    try:
        cap = pltpu.get_tpu_info().vmem_capacity_bytes
    except Exception:
        cap = 64 * 1024 * 1024  # conservative (v7x-sized) fallback
    return max(32 * 1024 * 1024, min(cap - 12 * 1024 * 1024, 100 * 1024 * 1024))


def prepare_params(params):
    """One-time weight prep (call at model init, NOT per forward): bf16 weights."""
    prepped = dict(params)
    for name in ("wq", "wk", "wv", "wo", "wi", "w2"):
        prepped[name] = params[name].astype(jnp.bfloat16)
    return prepped


def quant_bert_layer_12(x, attention_mask, params, num_heads, tq=None,
                        vmem_limit_bytes=None):
    """x: (B, S, H) f32; attention_mask: (B, 1, S) additive f32 mask."""
    B, S, H = x.shape
    I = params["wi"].shape[1]
    assert H % num_heads == 0
    dH = H // num_heads
    if tq is None:
        tq = min(S, 256)
    assert S % tq == 0, "sequence length must be divisible by the query tile"
    nQ = S // tq
    if vmem_limit_bytes is None:
        vmem_limit_bytes = _default_vmem_limit()

    # Weights in bf16 (no-op if prepare_params() was already applied).
    def as_bf16(w):
        return w if w.dtype == jnp.bfloat16 else w.astype(jnp.bfloat16)

    wq, wk, wv, wo, wi, w2 = (as_bf16(params[n])
                              for n in ("wq", "wk", "wv", "wo", "wi", "w2"))

    kernel = functools.partial(bert_layer_kernel,
                               num_heads=num_heads, head_dim=dH, tq=tq)

    call_args = (
        x, attention_mask,
        params["g0"], params["be0"],
        wq, params["bq"], wk, params["bk"], wv, params["bv"],
        wo, params["bo"], params["g1"], params["be1"],
        wi, params["bi"], w2, params["b2"],
        params["g2"], params["be2"],
    )

    def build(single_buffer_weights):
        wkw = dict(pipeline_mode=pl.Buffered(1)) if single_buffer_weights else {}

        def rep2(shape):  # grid-invariant weight / bias / LN param
            return pl.BlockSpec(shape, lambda b, i: (0, 0), **wkw)

        in_specs = [
            pl.BlockSpec((1, S, H), lambda b, i: (b, 0, 0)),   # hidden states (full seq per batch)
            pl.BlockSpec((1, 1, S), lambda b, i: (b, 0, 0)),   # additive attention mask
            rep2((1, H)), rep2((1, H)),                        # former_final_layernorm
            rep2((H, H)), rep2((1, H)),                        # query
            rep2((H, H)), rep2((1, H)),                        # key
            rep2((H, H)), rep2((1, H)),                        # value
            rep2((H, H)), rep2((1, H)),                        # attention output dense
            rep2((1, H)), rep2((1, H)),                        # attention output LayerNorm
            rep2((H, I)), rep2((1, I)),                        # intermediate dense
            rep2((I, H)), rep2((1, H)),                        # output dense
            rep2((1, H)), rep2((1, H)),                        # output LayerNorm
        ]

        return pl.pallas_call(
            kernel,
            out_shape=jax.ShapeDtypeStruct((B, S, H), jnp.float32),
            grid=(B, nQ),
            in_specs=in_specs,
            out_specs=pl.BlockSpec((1, tq, H), lambda b, i: (b, i, 0)),
            scratch_shapes=[
                pltpu.VMEM((S, H), jnp.bfloat16),               # cached LN(x) for whole seq
                pltpu.VMEM((num_heads, S, dH), jnp.bfloat16),   # K cache (per batch element)
                pltpu.VMEM((num_heads, S, dH), jnp.bfloat16),   # V cache
            ],
            compiler_params=pltpu.CompilerParams(
                # q-tile axis MUST stay "arbitrary": later tiles read the
                # LN/K/V scratch written at q-tile 0.
                dimension_semantics=("parallel", "arbitrary"),
                vmem_limit_bytes=vmem_limit_bytes,
            ),
        )

    try:
        return build(True)(*call_args)
    except Exception:
        # TODO(synk): drop fallback once pl.Buffered(1) single-buffering of
        # grid-invariant operands is guaranteed on all deployed JAX versions.
        return build(False)(*call_args)


def reference_layer(x, attention_mask, params, num_heads):
    """Pure-JAX f32 reference for correctness checking."""
    B, S, H = x.shape
    dH = H // num_heads

    def ln(t, g, b):
        mu = jnp.mean(t, -1, keepdims=True)
        var = jnp.mean((t - mu) ** 2, -1, keepdims=True)
        return (t - mu) * jax.lax.rsqrt(var + LN_EPS) * g + b

    ln0 = ln(x, params["g0"][0], params["be0"][0])
    q = ln0 @ params["wq"] + params["bq"][0]
    k = ln0 @ params["wk"] + params["bk"][0]
    v = ln0 @ params["wv"] + params["bv"][0]

    def split(t):  # (B,S,H) -> (B,nH,S,dH)
        return t.reshape(B, S, num_heads, dH).transpose(0, 2, 1, 3)

    qh, kh, vh = split(q), split(k), split(v)
    scores = jnp.einsum("bhqd,bhkd->bhqk", qh, kh) / math.sqrt(dH)
    scores = scores + attention_mask[:, None, :, :]
    probs = jax.nn.softmax(scores, axis=-1)
    ctx = jnp.einsum("bhqk,bhkd->bhqd", probs, vh).transpose(0, 2, 1, 3).reshape(B, S, H)

    attn = ctx @ params["wo"] + params["bo"][0]
    attn_out = ln(attn + x, params["g1"][0], params["be1"][0])

    inter = attn_out @ params["wi"] + params["bi"][0]
    inter = 0.5 * inter * (1.0 + jax.lax.erf(inter / math.sqrt(2.0)))

    out = inter @ params["w2"] + params["b2"][0]
    return ln(out + attn_out, params["g2"][0], params["be2"][0])


def make_params(key, H, I):
    ks = jax.random.split(key, 18)

    def w(k, shape, scale=0.05):
        return (scale * jax.random.normal(k, shape)).astype(jnp.float32)

    return {
        "g0": 1.0 + w(ks[0], (1, H), 0.02), "be0": w(ks[1], (1, H), 0.02),
        "wq": w(ks[2], (H, H)), "bq": w(ks[3], (1, H)),
        "wk": w(ks[4], (H, H)), "bk": w(ks[5], (1, H)),
        "wv": w(ks[6], (H, H)), "bv": w(ks[7], (1, H)),
        "wo": w(ks[8], (H, H)), "bo": w(ks[9], (1, H)),
        "g1": 1.0 + w(ks[10], (1, H), 0.02), "be1": w(ks[11], (1, H), 0.02),
        "wi": w(ks[12], (H, I)), "bi": w(ks[13], (1, I)),
        "w2": w(ks[14], (I, H)), "b2": w(ks[15], (1, H)),
        "g2": 1.0 + w(ks[16], (1, H), 0.02), "be2": w(ks[17], (1, H), 0.02),
    }


if __name__ == "__main__":
    key = jax.random.PRNGKey(0)
    k1, k2, k3, k4, k5, k6 = jax.random.split(key, 6)

    # Case 1: single query tile per batch element.
    B, S, H, NH, I = 2, 8, 32, 4, 64
    params = make_params(k1, H, I)
    prepped = prepare_params(params)               # one-time bf16 weight prep (hoisted)
    x = jax.random.normal(k2, (B, S, H), jnp.float32)
    mask = jnp.zeros((B, 1, S), jnp.float32)
    out = jax.block_until_ready(quant_bert_layer_12(x, mask, prepped, NH))
    ref = reference_layer(x, mask, params, NH)
    assert out.shape == (B, S, H)
    err1 = float(jnp.max(jnp.abs(out - ref)))
    assert err1 < 5e-2, f"case1 mismatch vs reference: {err1}"

    # Case 2: multiple query tiles (exercises the cached-LN/K/V path) + real masking.
    B, S, H, NH, I = 2, 16, 32, 4, 64
    params = make_params(k3, H, I)
    prepped = prepare_params(params)
    x = jax.random.normal(k4, (B, S, H), jnp.float32)
    mask = jnp.zeros((B, 1, S), jnp.float32)
    mask = mask.at[1, 0, -4:].set(-1e9)            # mask last 4 keys for batch element 1
    out = jax.block_until_ready(quant_bert_layer_12(x, mask, prepped, NH, tq=8))
    ref = reference_layer(x, mask, params, NH)
    assert out.shape == (B, S, H)
    err2 = float(jnp.max(jnp.abs(out - ref)))
    assert err2 < 5e-2, f"case2 mismatch vs reference: {err2}"

    # Case 3: tile-aligned shapes (dH=64, tq=128, S=256) — exercises the real
    # (8,128)/(16,128) layout path and the multi-tile cached-K/V reuse.
    B, S, H, NH, I = 1, 256, 128, 2, 256
    params = make_params(k5, H, I)
    prepped = prepare_params(params)
    x = jax.random.normal(k6, (B, S, H), jnp.float32)
    mask = jnp.zeros((B, 1, S), jnp.float32)
    mask = mask.at[0, 0, -16:].set(-1e9)
    out = jax.block_until_ready(quant_bert_layer_12(x, mask, prepped, NH, tq=128))
    ref = reference_layer(x, mask, params, NH)
    assert out.shape == (B, S, H)
    err3 = float(jnp.max(jnp.abs(out - ref)))
    assert err3 < 5e-2, f"case3 mismatch vs reference: {err3}"

    print("KERNEL_OK")
</pallas_src>

<mosaic_0001>
module attributes {stable_mosaic.version = 11 : i64} {
  func.func @bert_layer_kernel(%arg0: i32, %arg1: i32, %arg2: memref<1x8x32xf32, #tpu.memory_space<vmem>>, %arg3: memref<1x1x8xf32, #tpu.memory_space<vmem>>, %arg4: memref<1x32xf32, #tpu.memory_space<vmem>>, %arg5: memref<1x32xf32, #tpu.memory_space<vmem>>, %arg6: memref<32x32xbf16, #tpu.memory_space<vmem>>, %arg7: memref<1x32xf32, #tpu.memory_space<vmem>>, %arg8: memref<32x32xbf16, #tpu.memory_space<vmem>>, %arg9: memref<1x32xf32, #tpu.memory_space<vmem>>, %arg10: memref<32x32xbf16, #tpu.memory_space<vmem>>, %arg11: memref<1x32xf32, #tpu.memory_space<vmem>>, %arg12: memref<32x32xbf16, #tpu.memory_space<vmem>>, %arg13: memref<1x32xf32, #tpu.memory_space<vmem>>, %arg14: memref<1x32xf32, #tpu.memory_space<vmem>>, %arg15: memref<1x32xf32, #tpu.memory_space<vmem>>, %arg16: memref<32x64xbf16, #tpu.memory_space<vmem>>, %arg17: memref<1x64xf32, #tpu.memory_space<vmem>>, %arg18: memref<64x32xbf16, #tpu.memory_space<vmem>>, %arg19: memref<1x32xf32, #tpu.memory_space<vmem>>, %arg20: memref<1x32xf32, #tpu.memory_space<vmem>>, %arg21: memref<1x32xf32, #tpu.memory_space<vmem>>, %arg22: memref<1x8x32xf32, #tpu.memory_space<vmem>>, %arg23: memref<8x32xbf16, #tpu.memory_space<vmem>>, %arg24: memref<4x8x8xbf16, #tpu.memory_space<vmem>>, %arg25: memref<4x8x8xbf16, #tpu.memory_space<vmem>>) attributes {dimension_semantics = [#tpu.dimension_semantics<parallel>, #tpu.dimension_semantics<arbitrary>], iteration_bounds = array<i64: 2, 1>, scalar_prefetch = 0 : i64, scratch_operands = 3 : i64, tpu.core_type = #tpu.core_type<tc>, window_params = [{transform_indices = @transform_0, window_bounds = array<i64: 1, 8, 32>}, {transform_indices = @transform_1, window_bounds = array<i64: 1, 1, 8>}, {pipeline_mode = #tpu.pipeline_mode<synchronous>, transform_indices = @transform_2, window_bounds = array<i64: 1, 32>}, {pipeline_mode = #tpu.pipeline_mode<synchronous>, transform_indices = @transform_3, window_bounds = array<i64: 1, 32>}, {pipeline_mode = #tpu.pipeline_mode<synchronous>, transform_indices = @transform_4, window_bounds = array<i64: 32, 32>}, {pipeline_mode = #tpu.pipeline_mode<synchronous>, transform_indices = @transform_5, window_bounds = array<i64: 1, 32>}, {pipeline_mode = #tpu.pipeline_mode<synchronous>, transform_indices = @transform_6, window_bounds = array<i64: 32, 32>}, {pipeline_mode = #tpu.pipeline_mode<synchronous>, transform_indices = @transform_7, window_bounds = array<i64: 1, 32>}, {pipeline_mode = #tpu.pipeline_mode<synchronous>, transform_indices = @transform_8, window_bounds = array<i64: 32, 32>}, {pipeline_mode = #tpu.pipeline_mode<synchronous>, transform_indices = @transform_9, window_bounds = array<i64: 1, 32>}, {pipeline_mode = #tpu.pipeline_mode<synchronous>, transform_indices = @transform_10, window_bounds = array<i64: 32, 32>}, {pipeline_mode = #tpu.pipeline_mode<synchronous>, transform_indices = @transform_11, window_bounds = array<i64: 1, 32>}, {pipeline_mode = #tpu.pipeline_mode<synchronous>, transform_indices = @transform_12, window_bounds = array<i64: 1, 32>}, {pipeline_mode = #tpu.pipeline_mode<synchronous>, transform_indices = @transform_13, window_bounds = array<i64: 1, 32>}, {pipeline_mode = #tpu.pipeline_mode<synchronous>, transform_indices = @transform_14, window_bounds = array<i64: 32, 64>}, {pipeline_mode = #tpu.pipeline_mode<synchronous>, transform_indices = @transform_15, window_bounds = array<i64: 1, 64>}, {pipeline_mode = #tpu.pipeline_mode<synchronous>, transform_indices = @transform_16, window_bounds = array<i64: 64, 32>}, {pipeline_mode = #tpu.pipeline_mode<synchronous>, transform_indices = @transform_17, window_bounds = array<i64: 1, 32>}, {pipeline_mode = #tpu.pipeline_mode<synchronous>, transform_indices = @transform_18, window_bounds = array<i64: 1, 32>}, {pipeline_mode = #tpu.pipeline_mode<synchronous>, transform_indices = @transform_19, window_bounds = array<i64: 1, 32>}, {transform_indices = @transform_20, window_bounds = array<i64: 1, 8, 32>}]} {
    %c0_i32 = arith.constant 0 : i32
    %0 = arith.cmpi eq, %arg1, %c0_i32 : i32
    %1 = arith.extui %0 : i1 to i32
    %c0_i32_0 = arith.constant 0 : i32
    %2 = arith.cmpi ne, %1, %c0_i32_0 : i32
    scf.if %2 {
      %c0_60 = arith.constant 0 : index
      %c0_61 = arith.constant 0 : index
      %c0_62 = arith.constant 0 : index
      %137 = vector.load %arg2[%c0_60, %c0_61, %c0_62] : memref<1x8x32xf32, #tpu.memory_space<vmem>>, vector<1x8x32xf32>
      %138 = vector.shape_cast %137 : vector<1x8x32xf32> to vector<8x32xf32>
      %c0_63 = arith.constant 0 : index
      %c0_64 = arith.constant 0 : index
      %139 = vector.load %arg4[%c0_63, %c0_64] : memref<1x32xf32, #tpu.memory_space<vmem>>, vector<1x32xf32>
      %140 = vector.shape_cast %139 : vector<1x32xf32> to vector<32xf32>
      %c0_65 = arith.constant 0 : index
      %c0_66 = arith.constant 0 : index
      %141 = vector.load %arg5[%c0_65, %c0_66] : memref<1x32xf32, #tpu.memory_space<vmem>>, vector<1x32xf32>
      %142 = vector.shape_cast %141 : vector<1x32xf32> to vector<32xf32>
      %cst_67 = arith.constant dense<0.000000e+00> : vector<8xf32>
      %143 = vector.multi_reduction <add>, %138, %cst_67 [1] : vector<8x32xf32> to vector<8xf32>
      %144 = vector.shape_cast %143 : vector<8xf32> to vector<8x1xf32>
      %cst_68 = arith.constant 3.200000e+01 : f32
      %145 = vector.broadcast %cst_68 : f32 to vector<8x1xf32>
      %146 = arith.divf %144, %145 : vector<8x1xf32>
      %147 = vector.broadcast %146 : vector<8x1xf32> to vector<8x32xf32>
      %148 = arith.subf %138, %147 : vector<8x32xf32>
      %149 = arith.mulf %148, %148 : vector<8x32xf32>
      %cst_69 = arith.constant dense<0.000000e+00> : vector<8xf32>
      %150 = vector.multi_reduction <add>, %149, %cst_69 [1] : vector<8x32xf32> to vector<8xf32>
      %151 = vector.shape_cast %150 : vector<8xf32> to vector<8x1xf32>
      %cst_70 = arith.constant 3.200000e+01 : f32
      %152 = vector.broadcast %cst_70 : f32 to vector<8x1xf32>
      %153 = arith.divf %151, %152 : vector<8x1xf32>
      %154 = vector.broadcast %146 : vector<8x1xf32> to vector<8x32xf32>
      %155 = arith.subf %138, %154 : vector<8x32xf32>
      %cst_71 = arith.constant 9.99999996E-13 : f32
      %156 = vector.broadcast %cst_71 : f32 to vector<8x1xf32>
      %157 = arith.addf %153, %156 : vector<8x1xf32>
      %158 = math.rsqrt %157 : vector<8x1xf32>
      %159 = vector.broadcast %158 : vector<8x1xf32> to vector<8x32xf32>
      %160 = arith.mulf %155, %159 : vector<8x32xf32>
      %161 = vector.shape_cast %140 : vector<32xf32> to vector<1x32xf32>
      %162 = vector.broadcast %161 : vector<1x32xf32> to vector<8x32xf32>
      %163 = arith.mulf %160, %162 : vector<8x32xf32>
      %164 = vector.shape_cast %142 : vector<32xf32> to vector<1x32xf32>
      %165 = vector.broadcast %164 : vector<1x32xf32> to vector<8x32xf32>
      %166 = arith.addf %163, %165 : vector<8x32xf32>
      %167 = arith.truncf %166 : vector<8x32xf32> to vector<8x32xbf16>
      %c0_72 = arith.constant 0 : index
      %c0_73 = arith.constant 0 : index
      %168 = vector.load %arg23[%c0_72, %c0_73] : memref<8x32xbf16, #tpu.memory_space<vmem>>, vector<8x32xbf16>
      tpu.vector_store %arg23[%c0_72, %c0_73], %167 {strides = array<i32>} : memref<8x32xbf16, #tpu.memory_space<vmem>>, vector<8x32xbf16>,
      %c0_74 = arith.constant 0 : index
      %c0_75 = arith.constant 0 : index
      %169 = vector.load %arg8[%c0_74, %c0_75] : memref<32x32xbf16, #tpu.memory_space<vmem>>, vector<32x32xbf16>
      %cst_76 = arith.constant dense<0.000000e+00> : vector<8x32xf32>
      %170 = tpu.matmul %167, %169, %cst_76 {dimension_numbers = #tpu.dot_dimension_numbers<[1], [0], [0], [1], [0, 0, 1, 1], [], []>} : vector<8x32xbf16>, vector<32x32xbf16>, vector<8x32xf32> -> vector<8x32xf32>
      %c0_77 = arith.constant 0 : index
      %c0_78 = arith.constant 0 : index
      %171 = vector.load %arg9[%c0_77, %c0_78] : memref<1x32xf32, #tpu.memory_space<vmem>>, vector<1x32xf32>
      %172 = vector.shape_cast %171 : vector<1x32xf32> to vector<32xf32>
      %173 = vector.shape_cast %172 : vector<32xf32> to vector<1x32xf32>
      %174 = vector.broadcast %173 : vector<1x32xf32> to vector<8x32xf32>
      %175 = arith.addf %170, %174 : vector<8x32xf32>
      %c0_79 = arith.constant 0 : index
      %c0_80 = arith.constant 0 : index
      %176 = vector.load %arg10[%c0_79, %c0_80] : memref<32x32xbf16, #tpu.memory_space<vmem>>, vector<32x32xbf16>
      %cst_81 = arith.constant dense<0.000000e+00> : vector<8x32xf32>
      %177 = tpu.matmul %167, %176, %cst_81 {dimension_numbers = #tpu.dot_dimension_numbers<[1], [0], [0], [1], [0, 0, 1, 1], [], []>} : vector<8x32xbf16>, vector<32x32xbf16>, vector<8x32xf32> -> vector<8x32xf32>
      %c0_82 = arith.constant 0 : index
      %c0_83 = arith.constant 0 : index
      %178 = vector.load %arg11[%c0_82, %c0_83] : memref<1x32xf32, #tpu.memory_space<vmem>>, vector<1x32xf32>
      %179 = vector.shape_cast %178 : vector<1x32xf32> to vector<32xf32>
      %180 = vector.shape_cast %179 : vector<32xf32> to vector<1x32xf32>
      %181 = vector.broadcast %180 : vector<1x32xf32> to vector<8x32xf32>
      %182 = arith.addf %177, %181 : vector<8x32xf32>
      %183 = vector.shape_cast %175 : vector<8x32xf32> to vector<8x4x8xf32>
      %184 = tpu.transpose %183, [1, 0, 2] : vector<8x4x8xf32> -> vector<4x8x8xf32>
      %185 = arith.truncf %184 : vector<4x8x8xf32> to vector<4x8x8xbf16>
      %c0_84 = arith.constant 0 : index
      %c0_85 = arith.constant 0 : index
      %c0_86 = arith.constant 0 : index
      %186 = vector.load %arg24[%c0_84, %c0_85, %c0_86] : memref<4x8x8xbf16, #tpu.memory_space<vmem>>, vector<4x8x8xbf16>
      tpu.vector_store %arg24[%c0_84, %c0_85, %c0_86], %185 {strides = array<i32>} : memref<4x8x8xbf16, #tpu.memory_space<vmem>>, vector<4x8x8xbf16>,
      %187 = vector.shape_cast %182 : vector<8x32xf32> to vector<8x4x8xf32>
      %188 = tpu.transpose %187, [1, 0, 2] : vector<8x4x8xf32> -> vector<4x8x8xf32>
      %189 = arith.truncf %188 : vector<4x8x8xf32> to vector<4x8x8xbf16>
      %c0_87 = arith.constant 0 : index
      %c0_88 = arith.constant 0 : index
      %c0_89 = arith.constant 0 : index
      %190 = vector.load %arg25[%c0_87, %c0_88, %c0_89] : memref<4x8x8xbf16, #tpu.memory_space<vmem>>, vector<4x8x8xbf16>
      tpu.vector_store %arg25[%c0_87, %c0_88, %c0_89], %189 {strides = array<i32>} : memref<4x8x8xbf16, #tpu.memory_space<vmem>>, vector<4x8x8xbf16>,
    } else {
    }
    %c8_i32 = arith.constant 8 : i32
    %3 = arith.muli %arg1, %c8_i32 : i32
    %4 = tpu.assume_multiple %3, 8 : i32
    %c0 = arith.constant 0 : index
    %5 = arith.index_cast %4 : i32 to index
    %c0_1 = arith.constant 0 : index
    %6 = vector.load %arg2[%c0, %5, %c0_1] : memref<1x8x32xf32, #tpu.memory_space<vmem>>, vector<1x8x32xf32>
    %7 = vector.shape_cast %6 : vector<1x8x32xf32> to vector<8x32xf32>
    %8 = arith.index_cast %4 : i32 to index
    %c0_2 = arith.constant 0 : index
    %9 = vector.load %arg23[%8, %c0_2] : memref<8x32xbf16, #tpu.memory_space<vmem>>, vector<8x32xbf16>
    %c0_3 = arith.constant 0 : index
    %c0_4 = arith.constant 0 : index
    %10 = vector.load %arg6[%c0_3, %c0_4] : memref<32x32xbf16, #tpu.memory_space<vmem>>, vector<32x32xbf16>
    %cst = arith.constant dense<0.000000e+00> : vector<8x32xf32>
    %11 = tpu.matmul %9, %10, %cst {dimension_numbers = #tpu.dot_dimension_numbers<[1], [0], [0], [1], [0, 0, 1, 1], [], []>} : vector<8x32xbf16>, vector<32x32xbf16>, vector<8x32xf32> -> vector<8x32xf32>
    %c0_5 = arith.constant 0 : index
    %c0_6 = arith.constant 0 : index
    %12 = vector.load %arg7[%c0_5, %c0_6] : memref<1x32xf32, #tpu.memory_space<vmem>>, vector<1x32xf32>
    %13 = vector.shape_cast %12 : vector<1x32xf32> to vector<32xf32>
    %14 = vector.shape_cast %13 : vector<32xf32> to vector<1x32xf32>
    %15 = vector.broadcast %14 : vector<1x32xf32> to vector<8x32xf32>
    %16 = arith.addf %11, %15 : vector<8x32xf32>
    %cst_7 = arith.constant 0.353553385 : f32
    %17 = vector.broadcast %cst_7 : f32 to vector<8x32xf32>
    %18 = arith.mulf %16, %17 : vector<8x32xf32>
    %19 = vector.shape_cast %18 : vector<8x32xf32> to vector<8x4x8xf32>
    %20 = tpu.transpose %19, [1, 0, 2] : vector<8x4x8xf32> -> vector<4x8x8xf32>
    %21 = arith.truncf %20 : vector<4x8x8xf32> to vector<4x8x8xbf16>
    %c0_8 = arith.constant 0 : index
    %c0_9 = arith.constant 0 : index
    %c0_10 = arith.constant 0 : index
    %22 = vector.load %arg24[%c0_8, %c0_9, %c0_10] : memref<4x8x8xbf16, #tpu.memory_space<vmem>>, vector<4x8x8xbf16>
    "tpu.trace_start"() <{level = 10 : i32, message = "nqd,nkd->nqk"}> : () -> ()
    %cst_11 = arith.constant dense<0.000000e+00> : vector<4x8x8xf32>
    %23 = tpu.matmul %21, %22, %cst_11 {dimension_numbers = #tpu.dot_dimension_numbers<[2], [2], [1], [1], [0, 0, 0, 1, 1, 1], [0], [0]>} : vector<4x8x8xbf16>, vector<4x8x8xbf16>, vector<4x8x8xf32> -> vector<4x8x8xf32>
    "tpu.trace_stop"() : () -> ()
    %c0_12 = arith.constant 0 : index
    %c0_13 = arith.constant 0 : index
    %c0_14 = arith.constant 0 : index
    %24 = vector.load %arg3[%c0_12, %c0_13, %c0_14] : memref<1x1x8xf32, #tpu.memory_space<vmem>>, vector<1x1x8xf32>
    %25 = vector.shape_cast %24 : vector<1x1x8xf32> to vector<1x8xf32>
    %26 = vector.shape_cast %25 : vector<1x8xf32> to vector<1x1x8xf32>
    %27 = vector.broadcast %26 : vector<1x1x8xf32> to vector<4x8x8xf32>
    %28 = arith.addf %23, %27 : vector<4x8x8xf32>
    %cst_15 = arith.constant dense<0xFF800000> : vector<4x8xf32>
    %29 = vector.multi_reduction <maximumf>, %28, %cst_15 [2] : vector<4x8x8xf32> to vector<4x8xf32>
    %30 = vector.shape_cast %29 : vector<4x8xf32> to vector<4x8x1xf32>
    %31 = vector.broadcast %30 : vector<4x8x1xf32> to vector<4x8x8xf32>
    %32 = arith.subf %28, %31 : vector<4x8x8xf32>
    %33 = math.exp %32 : vector<4x8x8xf32>
    %cst_16 = arith.constant dense<0.000000e+00> : vector<4x8xf32>
    %34 = vector.multi_reduction <add>, %33, %cst_16 [2] : vector<4x8x8xf32> to vector<4x8xf32>
    %35 = vector.shape_cast %34 : vector<4x8xf32> to vector<4x8x1xf32>
    %36 = tpu.reciprocal %35 {approx = true} : vector<4x8x1xf32> -> vector<4x8x1xf32>
    %37 = vector.broadcast %36 : vector<4x8x1xf32> to vector<4x8x8xf32>
    %38 = arith.mulf %33, %37 : vector<4x8x8xf32>
    %39 = arith.truncf %38 : vector<4x8x8xf32> to vector<4x8x8xbf16>
    %c0_17 = arith.constant 0 : index
    %c0_18 = arith.constant 0 : index
    %c0_19 = arith.constant 0 : index
    %40 = vector.load %arg25[%c0_17, %c0_18, %c0_19] : memref<4x8x8xbf16, #tpu.memory_space<vmem>>, vector<4x8x8xbf16>
    "tpu.trace_start"() <{level = 10 : i32, message = "nqk,nkd->nqd"}> : () -> ()
    %cst_20 = arith.constant dense<0.000000e+00> : vector<4x8x8xf32>
    %41 = tpu.matmul %39, %40, %cst_20 {dimension_numbers = #tpu.dot_dimension_numbers<[2], [1], [1], [2], [0, 0, 0, 1, 1, 2], [0], [0]>} : vector<4x8x8xbf16>, vector<4x8x8xbf16>, vector<4x8x8xf32> -> vector<4x8x8xf32>
    "tpu.trace_stop"() : () -> ()
    %42 = tpu.transpose %41, [1, 0, 2] : vector<4x8x8xf32> -> vector<8x4x8xf32>
    %43 = vector.shape_cast %42 : vector<8x4x8xf32> to vector<8x32xf32>
    %44 = arith.truncf %43 : vector<8x32xf32> to vector<8x32xbf16>
    %c0_21 = arith.constant 0 : index
    %c0_22 = arith.constant 0 : index
    %45 = vector.load %arg12[%c0_21, %c0_22] : memref<32x32xbf16, #tpu.memory_space<vmem>>, vector<32x32xbf16>
    %cst_23 = arith.constant dense<0.000000e+00> : vector<8x32xf32>
    %46 = tpu.matmul %44, %45, %cst_23 {dimension_numbers = #tpu.dot_dimension_numbers<[1], [0], [0], [1], [0, 0, 1, 1], [], []>} : vector<8x32xbf16>, vector<32x32xbf16>, vector<8x32xf32> -> vector<8x32xf32>
    %c0_24 = arith.constant 0 : index
    %c0_25 = arith.constant 0 : index
    %47 = vector.load %arg13[%c0_24, %c0_25] : memref<1x32xf32, #tpu.memory_space<vmem>>, vector<1x32xf32>
    %48 = vector.shape_cast %47 : vector<1x32xf32> to vector<32xf32>
    %49 = vector.shape_cast %48 : vector<32xf32> to vector<1x32xf32>
    %50 = vector.broadcast %49 : vector<1x32xf32> to vector<8x32xf32>
    %51 = arith.addf %46, %50 : vector<8x32xf32>
    %52 = arith.addf %51, %7 : vector<8x32xf32>
    %c0_26 = arith.constant 0 : index
    %c0_27 = arith.constant 0 : index
    %53 = vector.load %arg14[%c0_26, %c0_27] : memref<1x32xf32, #tpu.memory_space<vmem>>, vector<1x32xf32>
    %54 = vector.shape_cast %53 : vector<1x32xf32> to vector<32xf32>
    %c0_28 = arith.constant 0 : index
    %c0_29 = arith.constant 0 : index
    %55 = vector.load %arg15[%c0_28, %c0_29] : memref<1x32xf32, #tpu.memory_space<vmem>>, vector<1x32xf32>
    %56 = vector.shape_cast %55 : vector<1x32xf32> to vector<32xf32>
    %cst_30 = arith.constant dense<0.000000e+00> : vector<8xf32>
    %57 = vector.multi_reduction <add>, %52, %cst_30 [1] : vector<8x32xf32> to vector<8xf32>
    %58 = vector.shape_cast %57 : vector<8xf32> to vector<8x1xf32>
    %cst_31 = arith.constant 3.200000e+01 : f32
    %59 = vector.broadcast %cst_31 : f32 to vector<8x1xf32>
    %60 = arith.divf %58, %59 : vector<8x1xf32>
    %61 = vector.broadcast %60 : vector<8x1xf32> to vector<8x32xf32>
    %62 = arith.subf %52, %61 : vector<8x32xf32>
    %63 = arith.mulf %62, %62 : vector<8x32xf32>
    %cst_32 = arith.constant dense<0.000000e+00> : vector<8xf32>
    %64 = vector.multi_reduction <add>, %63, %cst_32 [1] : vector<8x32xf32> to vector<8xf32>
    %65 = vector.shape_cast %64 : vector<8xf32> to vector<8x1xf32>
    %cst_33 = arith.constant 3.200000e+01 : f32
    %66 = vector.broadcast %cst_33 : f32 to vector<8x1xf32>
    %67 = arith.divf %65, %66 : vector<8x1xf32>
    %68 = vector.broadcast %60 : vector<8x1xf32> to vector<8x32xf32>
    %69 = arith.subf %52, %68 : vector<8x32xf32>
    %cst_34 = arith.constant 9.99999996E-13 : f32
    %70 = vector.broadcast %cst_34 : f32 to vector<8x1xf32>
    %71 = arith.addf %67, %70 : vector<8x1xf32>
    %72 = math.rsqrt %71 : vector<8x1xf32>
    %73 = vector.broadcast %72 : vector<8x1xf32> to vector<8x32xf32>
    %74 = arith.mulf %69, %73 : vector<8x32xf32>
    %75 = vector.shape_cast %54 : vector<32xf32> to vector<1x32xf32>
    %76 = vector.broadcast %75 : vector<1x32xf32> to vector<8x32xf32>
    %77 = arith.mulf %74, %76 : vector<8x32xf32>
    %78 = vector.shape_cast %56 : vector<32xf32> to vector<1x32xf32>
    %79 = vector.broadcast %78 : vector<1x32xf32> to vector<8x32xf32>
    %80 = arith.addf %77, %79 : vector<8x32xf32>
    %81 = arith.truncf %80 : vector<8x32xf32> to vector<8x32xbf16>
    %c0_35 = arith.constant 0 : index
    %c0_36 = arith.constant 0 : index
    %82 = vector.load %arg16[%c0_35, %c0_36] : memref<32x64xbf16, #tpu.memory_space<vmem>>, vector<32x64xbf16>
    %cst_37 = arith.constant dense<0.000000e+00> : vector<8x64xf32>
    %83 = tpu.matmul %81, %82, %cst_37 {dimension_numbers = #tpu.dot_dimension_numbers<[1], [0], [0], [1], [0, 0, 1, 1], [], []>} : vector<8x32xbf16>, vector<32x64xbf16>, vector<8x64xf32> -> vector<8x64xf32>
    %c0_38 = arith.constant 0 : index
    %c0_39 = arith.constant 0 : index
    %84 = vector.load %arg17[%c0_38, %c0_39] : memref<1x64xf32, #tpu.memory_space<vmem>>, vector<1x64xf32>
    %85 = vector.shape_cast %84 : vector<1x64xf32> to vector<64xf32>
    %86 = vector.shape_cast %85 : vector<64xf32> to vector<1x64xf32>
    %87 = vector.broadcast %86 : vector<1x64xf32> to vector<8x64xf32>
    %88 = arith.addf %83, %87 : vector<8x64xf32>
    %cst_40 = arith.constant 5.000000e-01 : f32
    %89 = vector.broadcast %cst_40 : f32 to vector<8x64xf32>
    %90 = arith.mulf %89, %88 : vector<8x64xf32>
    %cst_41 = arith.constant 0.707106769 : f32
    %91 = vector.broadcast %cst_41 : f32 to vector<8x64xf32>
    %92 = arith.mulf %88, %91 : vector<8x64xf32>
    %93 = math.erf %92 : vector<8x64xf32>
    %cst_42 = arith.constant 1.000000e+00 : f32
    %94 = vector.broadcast %cst_42 : f32 to vector<8x64xf32>
    %95 = arith.addf %94, %93 : vector<8x64xf32>
    %96 = arith.mulf %90, %95 : vector<8x64xf32>
    %97 = arith.truncf %96 : vector<8x64xf32> to vector<8x64xbf16>
    %c0_43 = arith.constant 0 : index
    %c0_44 = arith.constant 0 : index
    %98 = vector.load %arg18[%c0_43, %c0_44] : memref<64x32xbf16, #tpu.memory_space<vmem>>, vector<64x32xbf16>
    %cst_45 = arith.constant dense<0.000000e+00> : vector<8x32xf32>
    %99 = tpu.matmul %97, %98, %cst_45 {dimension_numbers = #tpu.dot_dimension_numbers<[1], [0], [0], [1], [0, 0, 1, 1], [], []>} : vector<8x64xbf16>, vector<64x32xbf16>, vector<8x32xf32> -> vector<8x32xf32>
    %c0_46 = arith.constant 0 : index
    %c0_47 = arith.constant 0 : index
    %100 = vector.load %arg19[%c0_46, %c0_47] : memref<1x32xf32, #tpu.memory_space<vmem>>, vector<1x32xf32>
    %101 = vector.shape_cast %100 : vector<1x32xf32> to vector<32xf32>
    %102 = vector.shape_cast %101 : vector<32xf32> to vector<1x32xf32>
    %103 = vector.broadcast %102 : vector<1x32xf32> to vector<8x32xf32>
    %104 = arith.addf %99, %103 : vector<8x32xf32>
    %105 = arith.addf %104, %80 : vector<8x32xf32>
    %c0_48 = arith.constant 0 : index
    %c0_49 = arith.constant 0 : index
    %106 = vector.load %arg20[%c0_48, %c0_49] : memref<1x32xf32, #tpu.memory_space<vmem>>, vector<1x32xf32>
    %107 = vector.shape_cast %106 : vector<1x32xf32> to vector<32xf32>
    %c0_50 = arith.constant 0 : index
    %c0_51 = arith.constant 0 : index
    %108 = vector.load %arg21[%c0_50, %c0_51] : memref<1x32xf32, #tpu.memory_space<vmem>>, vector<1x32xf32>
    %109 = vector.shape_cast %108 : vector<1x32xf32> to vector<32xf32>
    %cst_52 = arith.constant dense<0.000000e+00> : vector<8xf32>
    %110 = vector.multi_reduction <add>, %105, %cst_52 [1] : vector<8x32xf32> to vector<8xf32>
    %111 = vector.shape_cast %110 : vector<8xf32> to vector<8x1xf32>
    %cst_53 = arith.constant 3.200000e+01 : f32
    %112 = vector.broadcast %cst_53 : f32 to vector<8x1xf32>
    %113 = arith.divf %111, %112 : vector<8x1xf32>
    %114 = vector.broadcast %113 : vector<8x1xf32> to vector<8x32xf32>
    %115 = arith.subf %105, %114 : vector<8x32xf32>
    %116 = arith.mulf %115, %115 : vector<8x32xf32>
    %cst_54 = arith.constant dense<0.000000e+00> : vector<8xf32>
    %117 = vector.multi_reduction <add>, %116, %cst_54 [1] : vector<8x32xf32> to vector<8xf32>
    %118 = vector.shape_cast %117 : vector<8xf32> to vector<8x1xf32>
    %cst_55 = arith.constant 3.200000e+01 : f32
    %119 = vector.broadcast %cst_55 : f32 to vector<8x1xf32>
    %120 = arith.divf %118, %119 : vector<8x1xf32>
    %121 = vector.broadcast %113 : vector<8x1xf32> to vector<8x32xf32>
    %122 = arith.subf %105, %121 : vector<8x32xf32>
    %cst_56 = arith.constant 9.99999996E-13 : f32
    %123 = vector.broadcast %cst_56 : f32 to vector<8x1xf32>
    %124 = arith.addf %120, %123 : vector<8x1xf32>
    %125 = math.rsqrt %124 : vector<8x1xf32>
    %126 = vector.broadcast %125 : vector<8x1xf32> to vector<8x32xf32>
    %127 = arith.mulf %122, %126 : vector<8x32xf32>
    %128 = vector.shape_cast %107 : vector<32xf32> to vector<1x32xf32>
    %129 = vector.broadcast %128 : vector<1x32xf32> to vector<8x32xf32>
    %130 = arith.mulf %127, %129 : vector<8x32xf32>
    %131 = vector.shape_cast %109 : vector<32xf32> to vector<1x32xf32>
    %132 = vector.broadcast %131 : vector<1x32xf32> to vector<8x32xf32>
    %133 = arith.addf %130, %132 : vector<8x32xf32>
    %c0_57 = arith.constant 0 : index
    %c0_58 = arith.constant 0 : index
    %c0_59 = arith.constant 0 : index
    %134 = vector.load %arg22[%c0_57, %c0_58, %c0_59] : memref<1x8x32xf32, #tpu.memory_space<vmem>>, vector<1x8x32xf32>
    %135 = vector.shape_cast %134 : vector<1x8x32xf32> to vector<8x32xf32>
    %136 = vector.shape_cast %133 : vector<8x32xf32> to vector<1x8x32xf32>
    tpu.vector_store %arg22[%c0_57, %c0_58, %c0_59], %136 {strides = array<i32>} : memref<1x8x32xf32, #tpu.memory_space<vmem>>, vector<1x8x32xf32>,
    return
  }
  func.func @transform_0(%arg0: i32, %arg1: i32) -> (i32, i32, i32) {
    %c0_i32 = arith.constant 0 : i32
    %c0_i32_0 = arith.constant 0 : i32
    %c0_i32_1 = arith.constant 0 : i32
    return %arg0, %c0_i32, %c0_i32_0 : i32, i32, i32
  }
  func.func @transform_1(%arg0: i32, %arg1: i32) -> (i32, i32, i32) {
    %c0_i32 = arith.constant 0 : i32
    %c0_i32_0 = arith.constant 0 : i32
    %c0_i32_1 = arith.constant 0 : i32
    return %arg0, %c0_i32, %c0_i32_0 : i32, i32, i32
  }
  func.func @transform_2(%arg0: i32, %arg1: i32) -> (i32, i32) {
    %c0_i32 = arith.constant 0 : i32
    %c0_i32_0 = arith.constant 0 : i32
    %c0_i32_1 = arith.constant 0 : i32
    return %c0_i32, %c0_i32_0 : i32, i32
  }
  func.func @transform_3(%arg0: i32, %arg1: i32) -> (i32, i32) {
    %c0_i32 = arith.constant 0 : i32
    %c0_i32_0 = arith.constant 0 : i32
    %c0_i32_1 = arith.constant 0 : i32
    return %c0_i32, %c0_i32_0 : i32, i32
  }
  func.func @transform_4(%arg0: i32, %arg1: i32) -> (i32, i32) {
    %c0_i32 = arith.constant 0 : i32
    %c0_i32_0 = arith.constant 0 : i32
    %c0_i32_1 = arith.constant 0 : i32
    return %c0_i32, %c0_i32_0 : i32, i32
  }
  func.func @transform_5(%arg0: i32, %arg1: i32) -> (i32, i32) {
    %c0_i32 = arith.constant 0 : i32
    %c0_i32_0 = arith.constant 0 : i32
    %c0_i32_1 = arith.constant 0 : i32
    return %c0_i32, %c0_i32_0 : i32, i32
  }
  func.func @transform_6(%arg0: i32, %arg1: i32) -> (i32, i32) {
    %c0_i32 = arith.constant 0 : i32
    %c0_i32_0 = arith.constant 0 : i32
    %c0_i32_1 = arith.constant 0 : i32
    return %c0_i32, %c0_i32_0 : i32, i32
  }
  func.func @transform_7(%arg0: i32, %arg1: i32) -> (i32, i32) {
    %c0_i32 = arith.constant 0 : i32
    %c0_i32_0 = arith.constant 0 : i32
    %c0_i32_1 = arith.constant 0 : i32
    return %c0_i32, %c0_i32_0 : i32, i32
  }
  func.func @transform_8(%arg0: i32, %arg1: i32) -> (i32, i32) {
    %c0_i32 = arith.constant 0 : i32
    %c0_i32_0 = arith.constant 0 : i32
    %c0_i32_1 = arith.constant 0 : i32
    return %c0_i32, %c0_i32_0 : i32, i32
  }
  func.func @transform_9(%arg0: i32, %arg1: i32) -> (i32, i32) {
    %c0_i32 = arith.constant 0 : i32
    %c0_i32_0 = arith.constant 0 : i32
    %c0_i32_1 = arith.constant 0 : i32
    return %c0_i32, %c0_i32_0 : i32, i32
  }
  func.func @transform_10(%arg0: i32, %arg1: i32) -> (i32, i32) {
    %c0_i32 = arith.constant 0 : i32
    %c0_i32_0 = arith.constant 0 : i32
    %c0_i32_1 = arith.constant 0 : i32
    return %c0_i32, %c0_i32_0 : i32, i32
  }
  func.func @transform_11(%arg0: i32, %arg1: i32) -> (i32, i32) {
    %c0_i32 = arith.constant 0 : i32
    %c0_i32_0 = arith.constant 0 : i32
    %c0_i32_1 = arith.constant 0 : i32
    return %c0_i32, %c0_i32_0 : i32, i32
  }
  func.func @transform_12(%arg0: i32, %arg1: i32) -> (i32, i32) {
    %c0_i32 = arith.constant 0 : i32
    %c0_i32_0 = arith.constant 0 : i32
    %c0_i32_1 = arith.constant 0 : i32
    return %c0_i32, %c0_i32_0 : i32, i32
  }
  func.func @transform_13(%arg0: i32, %arg1: i32) -> (i32, i32) {
    %c0_i32 = arith.constant 0 : i32
    %c0_i32_0 = arith.constant 0 : i32
    %c0_i32_1 = arith.constant 0 : i32
    return %c0_i32, %c0_i32_0 : i32, i32
  }
  func.func @transform_14(%arg0: i32, %arg1: i32) -> (i32, i32) {
    %c0_i32 = arith.constant 0 : i32
    %c0_i32_0 = arith.constant 0 : i32
    %c0_i32_1 = arith.constant 0 : i32
    return %c0_i32, %c0_i32_0 : i32, i32
  }
  func.func @transform_15(%arg0: i32, %arg1: i32) -> (i32, i32) {
    %c0_i32 = arith.constant 0 : i32
    %c0_i32_0 = arith.constant 0 : i32
    %c0_i32_1 = arith.constant 0 : i32
    return %c0_i32, %c0_i32_0 : i32, i32
  }
  func.func @transform_16(%arg0: i32, %arg1: i32) -> (i32, i32) {
    %c0_i32 = arith.constant 0 : i32
    %c0_i32_0 = arith.constant 0 : i32
    %c0_i32_1 = arith.constant 0 : i32
    return %c0_i32, %c0_i32_0 : i32, i32
  }
  func.func @transform_17(%arg0: i32, %arg1: i32) -> (i32, i32) {
    %c0_i32 = arith.constant 0 : i32
    %c0_i32_0 = arith.constant 0 : i32
    %c0_i32_1 = arith.constant 0 : i32
    return %c0_i32, %c0_i32_0 : i32, i32
  }
  func.func @transform_18(%arg0: i32, %arg1: i32) -> (i32, i32) {
    %c0_i32 = arith.constant 0 : i32
    %c0_i32_0 = arith.constant 0 : i32
    %c0_i32_1 = arith.constant 0 : i32
    return %c0_i32, %c0_i32_0 : i32, i32
  }
  func.func @transform_19(%arg0: i32, %arg1: i32) -> (i32, i32) {
    %c0_i32 = arith.constant 0 : i32
    %c0_i32_0 = arith.constant 0 : i32
    %c0_i32_1 = arith.constant 0 : i32
    return %c0_i32, %c0_i32_0 : i32, i32
  }
  func.func @transform_20(%arg0: i32, %arg1: i32) -> (i32, i32, i32) {
    %c0_i32 = arith.constant 0 : i32
    %c0_i32_0 = arith.constant 0 : i32
    return %arg0, %arg1, %c0_i32 : i32, i32, i32
  }
}

module attributes {stable_mosaic.version = 11 : i64} {
  func.func @bert_layer_kernel(%arg0: i32, %arg1: i32, %arg2: memref<1x8x32xf32, #tpu.memory_space<vmem>>, %arg3: memref<1x1x8xf32, #tpu.memory_space<vmem>>, %arg4: memref<1x32xf32, #tpu.memory_space<vmem>>, %arg5: memref<1x32xf32, #tpu.memory_space<vmem>>, %arg6: memref<32x32xbf16, #tpu.memory_space<vmem>>, %arg7: memref<1x32xf32, #tpu.memory_space<vmem>>, %arg8: memref<32x32xbf16, #tpu.memory_space<vmem>>, %arg9: memref<1x32xf32, #tpu.memory_space<vmem>>, %arg10: memref<32x32xbf16, #tpu.memory_space<vmem>>, %arg11: memref<1x32xf32, #tpu.memory_space<vmem>>, %arg12: memref<32x32xbf16, #tpu.memory_space<vmem>>, %arg13: memref<1x32xf32, #tpu.memory_space<vmem>>, %arg14: memref<1x32xf32, #tpu.memory_space<vmem>>, %arg15: memref<1x32xf32, #tpu.memory_space<vmem>>, %arg16: memref<32x64xbf16, #tpu.memory_space<vmem>>, %arg17: memref<1x64xf32, #tpu.memory_space<vmem>>, %arg18: memref<64x32xbf16, #tpu.memory_space<vmem>>, %arg19: memref<1x32xf32, #tpu.memory_space<vmem>>, %arg20: memref<1x32xf32, #tpu.memory_space<vmem>>, %arg21: memref<1x32xf32, #tpu.memory_space<vmem>>, %arg22: memref<1x8x32xf32, #tpu.memory_space<vmem>>, %arg23: memref<8x32xbf16, #tpu.memory_space<vmem>>, %arg24: memref<4x8x8xbf16, #tpu.memory_space<vmem>>, %arg25: memref<4x8x8xbf16, #tpu.memory_space<vmem>>) attributes {dimension_semantics = [#tpu.dimension_semantics<parallel>, #tpu.dimension_semantics<arbitrary>], iteration_bounds = array<i64: 2, 1>, scalar_prefetch = 0 : i64, scratch_operands = 3 : i64, tpu.core_type = #tpu.core_type<tc>, window_params = [{transform_indices = @transform_0, window_bounds = array<i64: 1, 8, 32>}, {transform_indices = @transform_1, window_bounds = array<i64: 1, 1, 8>}, {pipeline_mode = #tpu.pipeline_mode<synchronous>, transform_indices = @transform_2, window_bounds = array<i64: 1, 32>}, {pipeline_mode = #tpu.pipeline_mode<synchronous>, transform_indices = @transform_3, window_bounds = array<i64: 1, 32>}, {pipeline_mode = #tpu.pipeline_mode<synchronous>, transform_indices = @transform_4, window_bounds = array<i64: 32, 32>}, {pipeline_mode = #tpu.pipeline_mode<synchronous>, transform_indices = @transform_5, window_bounds = array<i64: 1, 32>}, {pipeline_mode = #tpu.pipeline_mode<synchronous>, transform_indices = @transform_6, window_bounds = array<i64: 32, 32>}, {pipeline_mode = #tpu.pipeline_mode<synchronous>, transform_indices = @transform_7, window_bounds = array<i64: 1, 32>}, {pipeline_mode = #tpu.pipeline_mode<synchronous>, transform_indices = @transform_8, window_bounds = array<i64: 32, 32>}, {pipeline_mode = #tpu.pipeline_mode<synchronous>, transform_indices = @transform_9, window_bounds = array<i64: 1, 32>}, {pipeline_mode = #tpu.pipeline_mode<synchronous>, transform_indices = @transform_10, window_bounds = array<i64: 32, 32>}, {pipeline_mode = #tpu.pipeline_mode<synchronous>, transform_indices = @transform_11, window_bounds = array<i64: 1, 32>}, {pipeline_mode = #tpu.pipeline_mode<synchronous>, transform_indices = @transform_12, window_bounds = array<i64: 1, 32>}, {pipeline_mode = #tpu.pipeline_mode<synchronous>, transform_indices = @transform_13, window_bounds = array<i64: 1, 32>}, {pipeline_mode = #tpu.pipeline_mode<synchronous>, transform_indices = @transform_14, window_bounds = array<i64: 32, 64>}, {pipeline_mode = #tpu.pipeline_mode<synchronous>, transform_indices = @transform_15, window_bounds = array<i64: 1, 64>}, {pipeline_mode = #tpu.pipeline_mode<synchronous>, transform_indices = @transform_16, window_bounds = array<i64: 64, 32>}, {pipeline_mode = #tpu.pipeline_mode<synchronous>, transform_indices = @transform_17, window_bounds = array<i64: 1, 32>}, {pipeline_mode = #tpu.pipeline_mode<synchronous>, transform_indices = @transform_18, window_bounds = array<i64: 1, 32>}, {pipeline_mode = #tpu.pipeline_mode<synchronous>, transform_indices = @transform_19, window_bounds = array<i64: 1, 32>}, {transform_indices = @transform_20, window_bounds = array<i64: 1, 8, 32>}]} {
    %c0_i32 = arith.constant 0 : i32
    %0 = arith.cmpi eq, %arg1, %c0_i32 : i32
    %1 = arith.extui %0 : i1 to i32
    %c0_i32_0 = arith.constant 0 : i32
    %2 = arith.cmpi ne, %1, %c0_i32_0 : i32
    scf.if %2 {
      %c0_60 = arith.constant 0 : index
      %c0_61 = arith.constant 0 : index
      %c0_62 = arith.constant 0 : index
      %137 = vector.load %arg2[%c0_60, %c0_61, %c0_62] : memref<1x8x32xf32, #tpu.memory_space<vmem>>, vector<1x8x32xf32>
      %138 = vector.shape_cast %137 : vector<1x8x32xf32> to vector<8x32xf32>
      %c0_63 = arith.constant 0 : index
      %c0_64 = arith.constant 0 : index
      %139 = vector.load %arg4[%c0_63, %c0_64] : memref<1x32xf32, #tpu.memory_space<vmem>>, vector<1x32xf32>
      %140 = vector.shape_cast %139 : vector<1x32xf32> to vector<32xf32>
      %c0_65 = arith.constant 0 : index
      %c0_66 = arith.constant 0 : index
      %141 = vector.load %arg5[%c0_65, %c0_66] : memref<1x32xf32, #tpu.memory_space<vmem>>, vector<1x32xf32>
      %142 = vector.shape_cast %141 : vector<1x32xf32> to vector<32xf32>
      %cst_67 = arith.constant dense<0.000000e+00> : vector<8xf32>
      %143 = vector.multi_reduction <add>, %138, %cst_67 [1] : vector<8x32xf32> to vector<8xf32>
      %144 = vector.shape_cast %143 : vector<8xf32> to vector<8x1xf32>
      %cst_68 = arith.constant 3.200000e+01 : f32
      %145 = vector.broadcast %cst_68 : f32 to vector<8x1xf32>
      %146 = arith.divf %144, %145 : vector<8x1xf32>
      %147 = vector.broadcast %146 : vector<8x1xf32> to vector<8x32xf32>
      %148 = arith.subf %138, %147 : vector<8x32xf32>
      %149 = arith.mulf %148, %148 : vector<8x32xf32>
      %cst_69 = arith.constant dense<0.000000e+00> : vector<8xf32>
      %150 = vector.multi_reduction <add>, %149, %cst_69 [1] : vector<8x32xf32> to vector<8xf32>
      %151 = vector.shape_cast %150 : vector<8xf32> to vector<8x1xf32>
      %cst_70 = arith.constant 3.200000e+01 : f32
      %152 = vector.broadcast %cst_70 : f32 to vector<8x1xf32>
      %153 = arith.divf %151, %152 : vector<8x1xf32>
      %154 = vector.broadcast %146 : vector<8x1xf32> to vector<8x32xf32>
      %155 = arith.subf %138, %154 : vector<8x32xf32>
      %cst_71 = arith.constant 9.99999996E-13 : f32
      %156 = vector.broadcast %cst_71 : f32 to vector<8x1xf32>
      %157 = arith.addf %153, %156 : vector<8x1xf32>
      %158 = math.rsqrt %157 : vector<8x1xf32>
      %159 = vector.broadcast %158 : vector<8x1xf32> to vector<8x32xf32>
      %160 = arith.mulf %155, %159 : vector<8x32xf32>
      %161 = vector.shape_cast %140 : vector<32xf32> to vector<1x32xf32>
      %162 = vector.broadcast %161 : vector<1x32xf32> to vector<8x32xf32>
      %163 = arith.mulf %160, %162 : vector<8x32xf32>
      %164 = vector.shape_cast %142 : vector<32xf32> to vector<1x32xf32>
      %165 = vector.broadcast %164 : vector<1x32xf32> to vector<8x32xf32>
      %166 = arith.addf %163, %165 : vector<8x32xf32>
      %167 = arith.truncf %166 : vector<8x32xf32> to vector<8x32xbf16>
      %c0_72 = arith.constant 0 : index
      %c0_73 = arith.constant 0 : index
      %168 = vector.load %arg23[%c0_72, %c0_73] : memref<8x32xbf16, #tpu.memory_space<vmem>>, vector<8x32xbf16>
      tpu.vector_store %arg23[%c0_72, %c0_73], %167 {strides = array<i32>} : memref<8x32xbf16, #tpu.memory_space<vmem>>, vector<8x32xbf16>,
      %c0_74 = arith.constant 0 : index
      %c0_75 = arith.constant 0 : index
      %169 = vector.load %arg8[%c0_74, %c0_75] : memref<32x32xbf16, #tpu.memory_space<vmem>>, vector<32x32xbf16>
      %cst_76 = arith.constant dense<0.000000e+00> : vector<8x32xf32>
      %170 = tpu.matmul %167, %169, %cst_76 {dimension_numbers = #tpu.dot_dimension_numbers<[1], [0], [0], [1], [0, 0, 1, 1], [], []>} : vector<8x32xbf16>, vector<32x32xbf16>, vector<8x32xf32> -> vector<8x32xf32>
      %c0_77 = arith.constant 0 : index
      %c0_78 = arith.constant 0 : index
      %171 = vector.load %arg9[%c0_77, %c0_78] : memref<1x32xf32, #tpu.memory_space<vmem>>, vector<1x32xf32>
      %172 = vector.shape_cast %171 : vector<1x32xf32> to vector<32xf32>
      %173 = vector.shape_cast %172 : vector<32xf32> to vector<1x32xf32>
      %174 = vector.broadcast %173 : vector<1x32xf32> to vector<8x32xf32>
      %175 = arith.addf %170, %174 : vector<8x32xf32>
      %c0_79 = arith.constant 0 : index
      %c0_80 = arith.constant 0 : index
      %176 = vector.load %arg10[%c0_79, %c0_80] : memref<32x32xbf16, #tpu.memory_space<vmem>>, vector<32x32xbf16>
      %cst_81 = arith.constant dense<0.000000e+00> : vector<8x32xf32>
      %177 = tpu.matmul %167, %176, %cst_81 {dimension_numbers = #tpu.dot_dimension_numbers<[1], [0], [0], [1], [0, 0, 1, 1], [], []>} : vector<8x32xbf16>, vector<32x32xbf16>, vector<8x32xf32> -> vector<8x32xf32>
      %c0_82 = arith.constant 0 : index
      %c0_83 = arith.constant 0 : index
      %178 = vector.load %arg11[%c0_82, %c0_83] : memref<1x32xf32, #tpu.memory_space<vmem>>, vector<1x32xf32>
      %179 = vector.shape_cast %178 : vector<1x32xf32> to vector<32xf32>
      %180 = vector.shape_cast %179 : vector<32xf32> to vector<1x32xf32>
      %181 = vector.broadcast %180 : vector<1x32xf32> to vector<8x32xf32>
      %182 = arith.addf %177, %181 : vector<8x32xf32>
      %183 = vector.shape_cast %175 : vector<8x32xf32> to vector<8x4x8xf32>
      %184 = tpu.transpose %183, [1, 0, 2] : vector<8x4x8xf32> -> vector<4x8x8xf32>
      %185 = arith.truncf %184 : vector<4x8x8xf32> to vector<4x8x8xbf16>
      %c0_84 = arith.constant 0 : index
      %c0_85 = arith.constant 0 : index
      %c0_86 = arith.constant 0 : index
      %186 = vector.load %arg24[%c0_84, %c0_85, %c0_86] : memref<4x8x8xbf16, #tpu.memory_space<vmem>>, vector<4x8x8xbf16>
      tpu.vector_store %arg24[%c0_84, %c0_85, %c0_86], %185 {strides = array<i32>} : memref<4x8x8xbf16, #tpu.memory_space<vmem>>, vector<4x8x8xbf16>,
      %187 = vector.shape_cast %182 : vector<8x32xf32> to vector<8x4x8xf32>
      %188 = tpu.transpose %187, [1, 0, 2] : vector<8x4x8xf32> -> vector<4x8x8xf32>
      %189 = arith.truncf %188 : vector<4x8x8xf32> to vector<4x8x8xbf16>
      %c0_87 = arith.constant 0 : index
      %c0_88 = arith.constant 0 : index
      %c0_89 = arith.constant 0 : index
      %190 = vector.load %arg25[%c0_87, %c0_88, %c0_89] : memref<4x8x8xbf16, #tpu.memory_space<vmem>>, vector<4x8x8xbf16>
      tpu.vector_store %arg25[%c0_87, %c0_88, %c0_89], %189 {strides = array<i32>} : memref<4x8x8xbf16, #tpu.memory_space<vmem>>, vector<4x8x8xbf16>,
    } else {
    }
    %c8_i32 = arith.constant 8 : i32
    %3 = arith.muli %arg1, %c8_i32 : i32
    %4 = tpu.assume_multiple %3, 8 : i32
    %c0 = arith.constant 0 : index
    %5 = arith.index_cast %4 : i32 to index
    %c0_1 = arith.constant 0 : index
    %6 = vector.load %arg2[%c0, %5, %c0_1] : memref<1x8x32xf32, #tpu.memory_space<vmem>>, vector<1x8x32xf32>
    %7 = vector.shape_cast %6 : vector<1x8x32xf32> to vector<8x32xf32>
    %8 = arith.index_cast %4 : i32 to index
    %c0_2 = arith.constant 0 : index
    %9 = vector.load %arg23[%8, %c0_2] : memref<8x32xbf16, #tpu.memory_space<vmem>>, vector<8x32xbf16>
    %c0_3 = arith.constant 0 : index
    %c0_4 = arith.constant 0 : index
    %10 = vector.load %arg6[%c0_3, %c0_4] : memref<32x32xbf16, #tpu.memory_space<vmem>>, vector<32x32xbf16>
    %cst = arith.constant dense<0.000000e+00> : vector<8x32xf32>
    %11 = tpu.matmul %9, %10, %cst {dimension_numbers = #tpu.dot_dimension_numbers<[1], [0], [0], [1], [0, 0, 1, 1], [], []>} : vector<8x32xbf16>, vector<32x32xbf16>, vector<8x32xf32> -> vector<8x32xf32>
    %c0_5 = arith.constant 0 : index
    %c0_6 = arith.constant 0 : index
    %12 = vector.load %arg7[%c0_5, %c0_6] : memref<1x32xf32, #tpu.memory_space<vmem>>, vector<1x32xf32>
    %13 = vector.shape_cast %12 : vector<1x32xf32> to vector<32xf32>
    %14 = vector.shape_cast %13 : vector<32xf32> to vector<1x32xf32>
    %15 = vector.broadcast %14 : vector<1x32xf32> to vector<8x32xf32>
    %16 = arith.addf %11, %15 : vector<8x32xf32>
    %cst_7 = arith.constant 0.353553385 : f32
    %17 = vector.broadcast %cst_7 : f32 to vector<8x32xf32>
    %18 = arith.mulf %16, %17 : vector<8x32xf32>
    %19 = vector.shape_cast %18 : vector<8x32xf32> to vector<8x4x8xf32>
    %20 = tpu.transpose %19, [1, 0, 2] : vector<8x4x8xf32> -> vector<4x8x8xf32>
    %21 = arith.truncf %20 : vector<4x8x8xf32> to vector<4x8x8xbf16>
    %c0_8 = arith.constant 0 : index
    %c0_9 = arith.constant 0 : index
    %c0_10 = arith.constant 0 : index
    %22 = vector.load %arg24[%c0_8, %c0_9, %c0_10] : memref<4x8x8xbf16, #tpu.memory_space<vmem>>, vector<4x8x8xbf16>
    "tpu.trace_start"() <{level = 10 : i32, message = "nqd,nkd->nqk"}> : () -> ()
    %cst_11 = arith.constant dense<0.000000e+00> : vector<4x8x8xf32>
    %23 = tpu.matmul %21, %22, %cst_11 {dimension_numbers = #tpu.dot_dimension_numbers<[2], [2], [1], [1], [0, 0, 0, 1, 1, 1], [0], [0]>} : vector<4x8x8xbf16>, vector<4x8x8xbf16>, vector<4x8x8xf32> -> vector<4x8x8xf32>
    "tpu.trace_stop"() : () -> ()
    %c0_12 = arith.constant 0 : index
    %c0_13 = arith.constant 0 : index
    %c0_14 = arith.constant 0 : index
    %24 = vector.load %arg3[%c0_12, %c0_13, %c0_14] : memref<1x1x8xf32, #tpu.memory_space<vmem>>, vector<1x1x8xf32>
    %25 = vector.shape_cast %24 : vector<1x1x8xf32> to vector<1x8xf32>
    %26 = vector.shape_cast %25 : vector<1x8xf32> to vector<1x1x8xf32>
    %27 = vector.broadcast %26 : vector<1x1x8xf32> to vector<4x8x8xf32>
    %28 = arith.addf %23, %27 : vector<4x8x8xf32>
    %cst_15 = arith.constant dense<0xFF800000> : vector<4x8xf32>
    %29 = vector.multi_reduction <maximumf>, %28, %cst_15 [2] : vector<4x8x8xf32> to vector<4x8xf32>
    %30 = vector.shape_cast %29 : vector<4x8xf32> to vector<4x8x1xf32>
    %31 = vector.broadcast %30 : vector<4x8x1xf32> to vector<4x8x8xf32>
    %32 = arith.subf %28, %31 : vector<4x8x8xf32>
    %33 = math.exp %32 : vector<4x8x8xf32>
    %cst_16 = arith.constant dense<0.000000e+00> : vector<4x8xf32>
    %34 = vector.multi_reduction <add>, %33, %cst_16 [2] : vector<4x8x8xf32> to vector<4x8xf32>
    %35 = vector.shape_cast %34 : vector<4x8xf32> to vector<4x8x1xf32>
    %36 = tpu.reciprocal %35 {approx = true} : vector<4x8x1xf32> -> vector<4x8x1xf32>
    %37 = vector.broadcast %36 : vector<4x8x1xf32> to vector<4x8x8xf32>
    %38 = arith.mulf %33, %37 : vector<4x8x8xf32>
    %39 = arith.truncf %38 : vector<4x8x8xf32> to vector<4x8x8xbf16>
    %c0_17 = arith.constant 0 : index
    %c0_18 = arith.constant 0 : index
    %c0_19 = arith.constant 0 : index
    %40 = vector.load %arg25[%c0_17, %c0_18, %c0_19] : memref<4x8x8xbf16, #tpu.memory_space<vmem>>, vector<4x8x8xbf16>
    "tpu.trace_start"() <{level = 10 : i32, message = "nqk,nkd->nqd"}> : () -> ()
    %cst_20 = arith.constant dense<0.000000e+00> : vector<4x8x8xf32>
    %41 = tpu.matmul %39, %40, %cst_20 {dimension_numbers = #tpu.dot_dimension_numbers<[2], [1], [1], [2], [0, 0, 0, 1, 1, 2], [0], [0]>} : vector<4x8x8xbf16>, vector<4x8x8xbf16>, vector<4x8x8xf32> -> vector<4x8x8xf32>
    "tpu.trace_stop"() : () -> ()
    %42 = tpu.transpose %41, [1, 0, 2] : vector<4x8x8xf32> -> vector<8x4x8xf32>
    %43 = vector.shape_cast %42 : vector<8x4x8xf32> to vector<8x32xf32>
    %44 = arith.truncf %43 : vector<8x32xf32> to vector<8x32xbf16>
    %c0_21 = arith.constant 0 : index
    %c0_22 = arith.constant 0 : index
    %45 = vector.load %arg12[%c0_21, %c0_22] : memref<32x32xbf16, #tpu.memory_space<vmem>>, vector<32x32xbf16>
    %cst_23 = arith.constant dense<0.000000e+00> : vector<8x32xf32>
    %46 = tpu.matmul %44, %45, %cst_23 {dimension_numbers = #tpu.dot_dimension_numbers<[1], [0], [0], [1], [0, 0, 1, 1], [], []>} : vector<8x32xbf16>, vector<32x32xbf16>, vector<8x32xf32> -> vector<8x32xf32>
    %c0_24 = arith.constant 0 : index
    %c0_25 = arith.constant 0 : index
    %47 = vector.load %arg13[%c0_24, %c0_25] : memref<1x32xf32, #tpu.memory_space<vmem>>, vector<1x32xf32>
    %48 = vector.shape_cast %47 : vector<1x32xf32> to vector<32xf32>
    %49 = vector.shape_cast %48 : vector<32xf32> to vector<1x32xf32>
    %50 = vector.broadcast %49 : vector<1x32xf32> to vector<8x32xf32>
    %51 = arith.addf %46, %50 : vector<8x32xf32>
    %52 = arith.addf %51, %7 : vector<8x32xf32>
    %c0_26 = arith.constant 0 : index
    %c0_27 = arith.constant 0 : index
    %53 = vector.load %arg14[%c0_26, %c0_27] : memref<1x32xf32, #tpu.memory_space<vmem>>, vector<1x32xf32>
    %54 = vector.shape_cast %53 : vector<1x32xf32> to vector<32xf32>
    %c0_28 = arith.constant 0 : index
    %c0_29 = arith.constant 0 : index
    %55 = vector.load %arg15[%c0_28, %c0_29] : memref<1x32xf32, #tpu.memory_space<vmem>>, vector<1x32xf32>
    %56 = vector.shape_cast %55 : vector<1x32xf32> to vector<32xf32>
    %cst_30 = arith.constant dense<0.000000e+00> : vector<8xf32>
    %57 = vector.multi_reduction <add>, %52, %cst_30 [1] : vector<8x32xf32> to vector<8xf32>
    %58 = vector.shape_cast %57 : vector<8xf32> to vector<8x1xf32>
    %cst_31 = arith.constant 3.200000e+01 : f32
    %59 = vector.broadcast %cst_31 : f32 to vector<8x1xf32>
    %60 = arith.divf %58, %59 : vector<8x1xf32>
    %61 = vector.broadcast %60 : vector<8x1xf32> to vector<8x32xf32>
    %62 = arith.subf %52, %61 : vector<8x32xf32>
    %63 = arith.mulf %62, %62 : vector<8x32xf32>
    %cst_32 = arith.constant dense<0.000000e+00> : vector<8xf32>
    %64 = vector.multi_reduction <add>, %63, %cst_32 [1] : vector<8x32xf32> to vector<8xf32>
    %65 = vector.shape_cast %64 : vector<8xf32> to vector<8x1xf32>
    %cst_33 = arith.constant 3.200000e+01 : f32
    %66 = vector.broadcast %cst_33 : f32 to vector<8x1xf32>
    %67 = arith.divf %65, %66 : vector<8x1xf32>
    %68 = vector.broadcast %60 : vector<8x1xf32> to vector<8x32xf32>
    %69 = arith.subf %52, %68 : vector<8x32xf32>
    %cst_34 = arith.constant 9.99999996E-13 : f32
    %70 = vector.broadcast %cst_34 : f32 to vector<8x1xf32>
    %71 = arith.addf %67, %70 : vector<8x1xf32>
    %72 = math.rsqrt %71 : vector<8x1xf32>
    %73 = vector.broadcast %72 : vector<8x1xf32> to vector<8x32xf32>
    %74 = arith.mulf %69, %73 : vector<8x32xf32>
    %75 = vector.shape_cast %54 : vector<32xf32> to vector<1x32xf32>
    %76 = vector.broadcast %75 : vector<1x32xf32> to vector<8x32xf32>
    %77 = arith.mulf %74, %76 : vector<8x32xf32>
    %78 = vector.shape_cast %56 : vector<32xf32> to vector<1x32xf32>
    %79 = vector.broadcast %78 : vector<1x32xf32> to vector<8x32xf32>
    %80 = arith.addf %77, %79 : vector<8x32xf32>
    %81 = arith.truncf %80 : vector<8x32xf32> to vector<8x32xbf16>
    %c0_35 = arith.constant 0 : index
    %c0_36 = arith.constant 0 : index
    %82 = vector.load %arg16[%c0_35, %c0_36] : memref<32x64xbf16, #tpu.memory_space<vmem>>, vector<32x64xbf16>
    %cst_37 = arith.constant dense<0.000000e+00> : vector<8x64xf32>
    %83 = tpu.matmul %81, %82, %cst_37 {dimension_numbers = #tpu.dot_dimension_numbers<[1], [0], [0], [1], [0, 0, 1, 1], [], []>} : vector<8x32xbf16>, vector<32x64xbf16>, vector<8x64xf32> -> vector<8x64xf32>
    %c0_38 = arith.constant 0 : index
    %c0_39 = arith.constant 0 : index
    %84 = vector.load %arg17[%c0_38, %c0_39] : memref<1x64xf32, #tpu.memory_space<vmem>>, vector<1x64xf32>
    %85 = vector.shape_cast %84 : vector<1x64xf32> to vector<64xf32>
    %86 = vector.shape_cast %85 : vector<64xf32> to vector<1x64xf32>
    %87 = vector.broadcast %86 : vector<1x64xf32> to vector<8x64xf32>
    %88 = arith.addf %83, %87 : vector<8x64xf32>
    %cst_40 = arith.constant 5.000000e-01 : f32
    %89 = vector.broadcast %cst_40 : f32 to vector<8x64xf32>
    %90 = arith.mulf %89, %88 : vector<8x64xf32>
    %cst_41 = arith.constant 0.707106769 : f32
    %91 = vector.broadcast %cst_41 : f32 to vector<8x64xf32>
    %92 = arith.mulf %88, %91 : vector<8x64xf32>
    %93 = math.erf %92 : vector<8x64xf32>
    %cst_42 = arith.constant 1.000000e+00 : f32
    %94 = vector.broadcast %cst_42 : f32 to vector<8x64xf32>
    %95 = arith.addf %94, %93 : vector<8x64xf32>
    %96 = arith.mulf %90, %95 : vector<8x64xf32>
    %97 = arith.truncf %96 : vector<8x64xf32> to vector<8x64xbf16>
    %c0_43 = arith.constant 0 : index
    %c0_44 = arith.constant 0 : index
    %98 = vector.load %arg18[%c0_43, %c0_44] : memref<64x32xbf16, #tpu.memory_space<vmem>>, vector<64x32xbf16>
    %cst_45 = arith.constant dense<0.000000e+00> : vector<8x32xf32>
    %99 = tpu.matmul %97, %98, %cst_45 {dimension_numbers = #tpu.dot_dimension_numbers<[1], [0], [0], [1], [0, 0, 1, 1], [], []>} : vector<8x64xbf16>, vector<64x32xbf16>, vector<8x32xf32> -> vector<8x32xf32>
    %c0_46 = arith.constant 0 : index
    %c0_47 = arith.constant 0 : index
    %100 = vector.load %arg19[%c0_46, %c0_47] : memref<1x32xf32, #tpu.memory_space<vmem>>, vector<1x32xf32>
    %101 = vector.shape_cast %100 : vector<1x32xf32> to vector<32xf32>
    %102 = vector.shape_cast %101 : vector<32xf32> to vector<1x32xf32>
    %103 = vector.broadcast %102 : vector<1x32xf32> to vector<8x32xf32>
    %104 = arith.addf %99, %103 : vector<8x32xf32>
    %105 = arith.addf %104, %80 : vector<8x32xf32>
    %c0_48 = arith.constant 0 : index
    %c0_49 = arith.constant 0 : index
    %106 = vector.load %arg20[%c0_48, %c0_49] : memref<1x32xf32, #tpu.memory_space<vmem>>, vector<1x32xf32>
    %107 = vector.shape_cast %106 : vector<1x32xf32> to vector<32xf32>
    %c0_50 = arith.constant 0 : index
    %c0_51 = arith.constant 0 : index
    %108 = vector.load %arg21[%c0_50, %c0_51] : memref<1x32xf32, #tpu.memory_space<vmem>>, vector<1x32xf32>
    %109 = vector.shape_cast %108 : vector<1x32xf32> to vector<32xf32>
    %cst_52 = arith.constant dense<0.000000e+00> : vector<8xf32>
    %110 = vector.multi_reduction <add>, %105, %cst_52 [1] : vector<8x32xf32> to vector<8xf32>
    %111 = vector.shape_cast %110 : vector<8xf32> to vector<8x1xf32>
    %cst_53 = arith.constant 3.200000e+01 : f32
    %112 = vector.broadcast %cst_53 : f32 to vector<8x1xf32>
    %113 = arith.divf %111, %112 : vector<8x1xf32>
    %114 = vector.broadcast %113 : vector<8x1xf32> to vector<8x32xf32>
    %115 = arith.subf %105, %114 : vector<8x32xf32>
    %116 = arith.mulf %115, %115 : vector<8x32xf32>
    %cst_54 = arith.constant dense<0.000000e+00> : vector<8xf32>
    %117 = vector.multi_reduction <add>, %116, %cst_54 [1] : vector<8x32xf32> to vector<8xf32>
    %118 = vector.shape_cast %117 : vector<8xf32> to vector<8x1xf32>
    %cst_55 = arith.constant 3.200000e+01 : f32
    %119 = vector.broadcast %cst_55 : f32 to vector<8x1xf32>
    %120 = arith.divf %118, %119 : vector<8x1xf32>
    %121 = vector.broadcast %113 : vector<8x1xf32> to vector<8x32xf32>
    %122 = arith.subf %105, %121 : vector<8x32xf32>
    %cst_56 = arith.constant 9.99999996E-13 : f32
    %123 = vector.broadcast %cst_56 : f32 to vector<8x1xf32>
    %124 = arith.addf %120, %123 : vector<8x1xf32>
    %125 = math.rsqrt %124 : vector<8x1xf32>
    %126 = vector.broadcast %125 : vector<8x1xf32> to vector<8x32xf32>
    %127 = arith.mulf %122, %126 : vector<8x32xf32>
    %128 = vector.shape_cast %107 : vector<32xf32> to vector<1x32xf32>
    %129 = vector.broadcast %128 : vector<1x32xf32> to vector<8x32xf32>
    %130 = arith.mulf %127, %129 : vector<8x32xf32>
    %131 = vector.shape_cast %109 : vector<32xf32> to vector<1x32xf32>
    %132 = vector.broadcast %131 : vector<1x32xf32> to vector<8x32xf32>
    %133 = arith.addf %130, %132 : vector<8x32xf32>
    %c0_57 = arith.constant 0 : index
    %c0_58 = arith.constant 0 : index
    %c0_59 = arith.constant 0 : index
    %134 = vector.load %arg22[%c0_57, %c0_58, %c0_59] : memref<1x8x32xf32, #tpu.memory_space<vmem>>, vector<1x8x32xf32>
    %135 = vector.shape_cast %134 : vector<1x8x32xf32> to vector<8x32xf32>
    %136 = vector.shape_cast %133 : vector<8x32xf32> to vector<1x8x32xf32>
    tpu.vector_store %arg22[%c0_57, %c0_58, %c0_59], %136 {strides = array<i32>} : memref<1x8x32xf32, #tpu.memory_space<vmem>>, vector<1x8x32xf32>,
    return
  }
  func.func @transform_0(%arg0: i32, %arg1: i32) -> (i32, i32, i32) {
    %c0_i32 = arith.constant 0 : i32
    %c0_i32_0 = arith.constant 0 : i32
    %c0_i32_1 = arith.constant 0 : i32
    return %arg0, %c0_i32, %c0_i32_0 : i32, i32, i32
  }
  func.func @transform_1(%arg0: i32, %arg1: i32) -> (i32, i32, i32) {
    %c0_i32 = arith.constant 0 : i32
    %c0_i32_0 = arith.constant 0 : i32
    %c0_i32_1 = arith.constant 0 : i32
    return %arg0, %c0_i32, %c0_i32_0 : i32, i32, i32
  }
  func.func @transform_2(%arg0: i32, %arg1: i32) -> (i32, i32) {
    %c0_i32 = arith.constant 0 : i32
    %c0_i32_0 = arith.constant 0 : i32
    %c0_i32_1 = arith.constant 0 : i32
    return %c0_i32, %c0_i32_0 : i32, i32
  }
  func.func @transform_3(%arg0: i32, %arg1: i32) -> (i32, i32) {
    %c0_i32 = arith.constant 0 : i32
    %c0_i32_0 = arith.constant 0 : i32
    %c0_i32_1 = arith.constant 0 : i32
    return %c0_i32, %c0_i32_0 : i32, i32
  }
  func.func @transform_4(%arg0: i32, %arg1: i32) -> (i32, i32) {
    %c0_i32 = arith.constant 0 : i32
    %c0_i32_0 = arith.constant 0 : i32
    %c0_i32_1 = arith.constant 0 : i32
    return %c0_i32, %c0_i32_0 : i32, i32
  }
  func.func @transform_5(%arg0: i32, %arg1: i32) -> (i32, i32) {
    %c0_i32 = arith.constant 0 : i32
    %c0_i32_0 = arith.constant 0 : i32
    %c0_i32_1 = arith.constant 0 : i32
    return %c0_i32, %c0_i32_0 : i32, i32
  }
  func.func @transform_6(%arg0: i32, %arg1: i32) -> (i32, i32) {
    %c0_i32 = arith.constant 0 : i32
    %c0_i32_0 = arith.constant 0 : i32
    %c0_i32_1 = arith.constant 0 : i32
    return %c0_i32, %c0_i32_0 : i32, i32
  }
  func.func @transform_7(%arg0: i32, %arg1: i32) -> (i32, i32) {
    %c0_i32 = arith.constant 0 : i32
    %c0_i32_0 = arith.constant 0 : i32
    %c0_i32_1 = arith.constant 0 : i32
    return %c0_i32, %c0_i32_0 : i32, i32
  }
  func.func @transform_8(%arg0: i32, %arg1: i32) -> (i32, i32) {
    %c0_i32 = arith.constant 0 : i32
    %c0_i32_0 = arith.constant 0 : i32
    %c0_i32_1 = arith.constant 0 : i32
    return %c0_i32, %c0_i32_0 : i32, i32
  }
  func.func @transform_9(%arg0: i32, %arg1: i32) -> (i32, i32) {
    %c0_i32 = arith.constant 0 : i32
    %c0_i32_0 = arith.constant 0 : i32
    %c0_i32_1 = arith.constant 0 : i32
    return %c0_i32, %c0_i32_0 : i32, i32
  }
  func.func @transform_10(%arg0: i32, %arg1: i32) -> (i32, i32) {
    %c0_i32 = arith.constant 0 : i32
    %c0_i32_0 = arith.constant 0 : i32
    %c0_i32_1 = arith.constant 0 : i32
    return %c0_i32, %c0_i32_0 : i32, i32
  }
  func.func @transform_11(%arg0: i32, %arg1: i32) -> (i32, i32) {
    %c0_i32 = arith.constant 0 : i32
    %c0_i32_0 = arith.constant 0 : i32
    %c0_i32_1 = arith.constant 0 : i32
    return %c0_i32, %c0_i32_0 : i32, i32
  }
  func.func @transform_12(%arg0: i32, %arg1: i32) -> (i32, i32) {
    %c0_i32 = arith.constant 0 : i32
    %c0_i32_0 = arith.constant 0 : i32
    %c0_i32_1 = arith.constant 0 : i32
    return %c0_i32, %c0_i32_0 : i32, i32
  }
  func.func @transform_13(%arg0: i32, %arg1: i32) -> (i32, i32) {
    %c0_i32 = arith.constant 0 : i32
    %c0_i32_0 = arith.constant 0 : i32
    %c0_i32_1 = arith.constant 0 : i32
    return %c0_i32, %c0_i32_0 : i32, i32
  }
  func.func @transform_14(%arg0: i32, %arg1: i32) -> (i32, i32) {
    %c0_i32 = arith.constant 0 : i32
    %c0_i32_0 = arith.constant 0 : i32
    %c0_i32_1 = arith.constant 0 : i32
    return %c0_i32, %c0_i32_0 : i32, i32
  }
  func.func @transform_15(%arg0: i32, %arg1: i32) -> (i32, i32) {
    %c0_i32 = arith.constant 0 : i32
    %c0_i32_0 = arith.constant 0 : i32
    %c0_i32_1 = arith.constant 0 : i32
    return %c0_i32, %c0_i32_0 : i32, i32
  }
  func.func @transform_16(%arg0: i32, %arg1: i32) -> (i32, i32) {
    %c0_i32 = arith.constant 0 : i32
    %c0_i32_0 = arith.constant 0 : i32
    %c0_i32_1 = arith.constant 0 : i32
    return %c0_i32, %c0_i32_0 : i32, i32
  }
  func.func @transform_17(%arg0: i32, %arg1: i32) -> (i32, i32) {
    %c0_i32 = arith.constant 0 : i32
    %c0_i32_0 = arith.constant 0 : i32
    %c0_i32_1 = arith.constant 0 : i32
    return %c0_i32, %c0_i32_0 : i32, i32
  }
  func.func @transform_18(%arg0: i32, %arg1: i32) -> (i32, i32) {
    %c0_i32 = arith.constant 0 : i32
    %c0_i32_0 = arith.constant 0 : i32
    %c0_i32_1 = arith.constant 0 : i32
    return %c0_i32, %c0_i32_0 : i32, i32
  }
  func.func @transform_19(%arg0: i32, %arg1: i32) -> (i32, i32) {
    %c0_i32 = arith.constant 0 : i32
    %c0_i32_0 = arith.constant 0 : i32
    %c0_i32_1 = arith.constant 0 : i32
    return %c0_i32, %c0_i32_0 : i32, i32
  }
  func.func @transform_20(%arg0: i32, %arg1: i32) -> (i32, i32, i32) {
    %c0_i32 = arith.constant 0 : i32
    %c0_i32_0 = arith.constant 0 : i32
    return %arg0, %arg1, %c0_i32 : i32, i32, i32
  }
}

</mosaic_0001>

<bundles_post_ra>
// kernel: tpu_custom_call.1
= control target key start
LH: loop header
LB: loop body
LE: loop exit
PB: predicated region body
PF: predicated region fallthrough
CT: control target
= control target key end

     0   :  { %s3064_s0 = inlined_call_operand.vmem [shape: f32[2,8,32], index: 0, kind: input, shape index: {}]   ;;  %s3065_s1 = inlined_call_operand.hbm [shape: f32[2,1,8], index: 1, kind: input, shape index: {}]   ;;  %s3066_s2 = inlined_call_operand.vmem [shape: f32[1,32], index: 2, kind: input, shape index: {}]   ;;  %s3067_s3 = inlined_call_operand.vmem [shape: f32[1,32], index: 3, kind: input, shape index: {}]   ;;  %s3068_s4 = inlined_call_operand.vmem [shape: bf16[32,32], index: 4, kind: input, shape index: {}]   ;;  %s3069_s5 = inlined_call_operand.vmem [shape: f32[1,32], index: 5, kind: input, shape index: {}]   ;;  %s3070_s6 = inlined_call_operand.vmem [shape: bf16[32,32], index: 6, kind: input, shape index: {}]   ;;  %s3071_s7 = inlined_call_operand.vmem [shape: f32[1,32], index: 7, kind: input, shape index: {}]   ;;  %s3072_s8 = inlined_call_operand.hbm [shape: bf16[32,32], index: 8, kind: input, shape index: {}]   ;;  %s3073_s9 = inlined_call_operand.vmem [shape: f32[1,32], index: 9, kind: input, shape index: {}]   ;;  %s3074_s10 = inlined_call_operand.hbm [shape: bf16[32,32], index: 10, kind: input, shape index: {}]   ;;  %s3075_s11 = inlined_call_operand.vmem [shape: f32[1,32], index: 11, kind: input, shape index: {}]   ;;  %s3076_s12 = inlined_call_operand.vmem [shape: f32[1,32], index: 12, kind: input, shape index: {}]   ;;  %s3077_s13 = inlined_call_operand.vmem [shape: f32[1,32], index: 13, kind: input, shape index: {}]   ;;  %s3078_s14 = inlined_call_operand.hbm [shape: bf16[32,64], index: 14, kind: input, shape index: {}]   ;;  %s3079_s15 = inlined_call_operand.vmem [shape: f32[1,64], index: 15, kind: input, shape index: {}]   ;;  %s3080_s16 = inlined_call_operand.vmem [shape: bf16[64,32], index: 16, kind: input, shape index: {}]   ;;  %s3081_s17 = inlined_call_operand.vmem [shape: f32[1,32], index: 17, kind: input, shape index: {}]   ;;  %s3082_s18 = inlined_call_operand.vmem [shape: f32[1,32], index: 18, kind: input, shape index: {}]   ;;  %s3083_s19 = inlined_call_operand.vmem [shape: f32[1,32], index: 19, kind: input, shape index: {}]   ;;  %s3084_s20 = inlined_call_operand.hbm [shape: f32[2,8,32], index: 20, kind: output, shape index: {}]  }
   0x1   :  { %3090 = sst [smem:[#allocation20_spill]] %s3064_s0 }
   0x2   :  { %3091 = sst [smem:[#allocation21_spill]] %s3065_s1 }
   0x3   :  { %3092 = sst [smem:[#allocation22_spill]] %s3066_s2 }
   0x4   :  { %3093 = sst [smem:[#allocation23_spill]] %s3067_s3 }
   0x5   :  { %3094 = sst [smem:[#allocation24_spill]] %s3068_s4 }
   0x6   :  { %3095 = sst [smem:[#allocation25_spill]] %s3069_s5 }
   0x7   :  { %3096 = sst [smem:[#allocation26_spill]] %s3070_s6 }
   0x8   :  { %3097 = sst [smem:[#allocation27_spill]] %s3072_s8 }
   0x9   :  { %3098 = sst [smem:[#allocation28_spill]] %s3074_s10 }
   0xa   :  { %3099 = sst [smem:[#allocation29_spill]] %s3078_s14 }
   0xb   :  { %3100 = sst [smem:[#allocation30_spill]] %s3081_s17 }
   0xc   :  { %3101 = sst [smem:[#allocation31_spill]] %s3082_s18 }
   0xd   :  { %3102 = sst [smem:[#allocation32_spill]] %s3083_s19 }
   0xe   :  { %3103 = sst [smem:[#allocation33_spill]] %s3084_s20 }
   0xf   :  { %25 = vsyncpa [#allocation6], 0 }
  0x10   :  { %27 = vsyncpa [#allocation6 + $0x1], 0 }
  0x11   :  { %28 = vsyncpa [#allocation9], 0 }
  0x12   :  { %29 = vsyncpa [#allocation12], 0 }
  0x13   :  { %30 = vsyncpa [#allocation7], 0 }
  0x14   :  { %32 = vsyncpa [#allocation7 + $0x1], 0  ;;  %s2572_s1 = smov 0   ;;  %s2574_s22 = smov 0  }
  0x15   :  { %s2576_s23 = smov 0   ;;  %s2578_s24 = smov 0  }
  0x16   :  { %s2580_s2 = smov 0   ;;  %s2582_s25 = smov 0  }
  0x17 LB: > { %3104 = sst [smem:[#allocation18_spill]] %s2431_s1  ;;  %s3086_s3 = sadd.s32 4294967295, %s2451_s25   ;;  %s2451_s25 = sphi %s2582_s25, %s38_s25   ;;  %s2447_s2 = sphi %s2580_s2, %s3135_s2   ;;  %s2443_s24 = sphi %s2578_s24, %s3134_s24   ;;  %s2439_s23 = sphi %s2576_s23, %s3133_s23   ;;  %s2435_s22 = sphi %s2574_s22, %s3132_s22   ;;  %s2431_s1 = sphi %s2572_s1, %s3131_s1  }
  0x18   : > { %p1997_p0 = scmp.ge.s32.totalorder %s2451_s25, 1  ;;  %p2606_p1 = scmp.eq.s32.totalorder %s3086_s3, 0 }
  0x19   : > { %p513_p2 = scmp.lt.s32.totalorder %s2451_s25, 3  ;;  %s3106_s8 = sld [smem:[#allocation27_spill]] }
  0x1a   : > { %s2453_s30 = smov [#allocation8]   ;;  %p2001_p6 = scmp.ge.s32.totalorder %s2451_s25, 2 }
  0x1b   : > { %p2614_p3 = pnand %p1997_p0, %p513_p2  ;;  %s544_s0 = sshll.u32 %s2453_s30, 4  ;;  %s545_s0 = int_to_ptr.vmem [resolvable:$true] %s544_s0 }
  0x1c   : > { %s3109_s10 = sld [smem:[#allocation28_spill]]  ;;  %s2455_s30 = smov 4  }
  0x1d   : > { %p2113_p4 = pneg %p2614_p3  ;;  %s2456_s19 = smov [#allocation10]  }
  0x1e   : > { %s561_s20 = sshll.u32 %s2456_s19, 4  ;;  %s3110_s14 = sld [smem:[#allocation29_spill]]  ;;  %s562_s20 = int_to_ptr.vmem [resolvable:$true] %s561_s20 }
  0x1f   : > { %s542_s4 = sshll.u32 %s3106_s8, 4  ;;  %p2622_p5 = pnand %p2113_p4, %p2606_p1  ;;  %s543_s4 = int_to_ptr.hbm [resolvable:$true] %s542_s4 }
  0x20   : > { %s2454_s8 = smov 64   ;;  %s2457_s28 = smov [#allocation11]  }
  0x21   : > { %2116 = dma.hbm_to_vmem [thread:$0]  (!%p2622_p5), %s543_s4, 256, %s545_s0, [#allocation9], %s2454_s8, %s2454_s8, %s2455_s30  }
  0x22   : > { %s559_s3 = sshll.u32 %s3109_s10, 4  ;;  %s584_s10 = sshll.u32 %s2457_s28, 4  ;;  %s560_s3 = int_to_ptr.hbm [resolvable:$true] %s559_s3  ;;  %s585_s10 = int_to_ptr.vmem [resolvable:$true] %s584_s10 }
  0x23   : > { %2119 = dma.hbm_to_vmem [thread:$0]  (!%p2622_p5), %s560_s3, 256, %s562_s20, [#allocation9], %s2454_s8, %s2454_s8, %s2455_s30  }
  0x24   : > { %s582_s27 = sshll.u32 %s3110_s14, 4  ;;  %s1996_s4 = sadd.s32 4294967294, %s2451_s25   ;;  %s583_s27 = int_to_ptr.hbm [resolvable:$true] %s582_s27 }
  0x25   : > { %2122 = dma.hbm_to_vmem [thread:$0]  (!%p2622_p5), %s583_s27, 256, %s585_s10, [#allocation12], %s2454_s8, %s2454_s8, %s2455_s30  }
  0x26   : > { %s50_s19 = sadd.s32 1, %s2447_s2  ;;  %s83_s0 = sadd.s32 1, %s2439_s23 }
  0x27   : > { %p52_p7 = scmp.ge.s32.totalorder %s50_s19, 2  ;;  %p90_p8 = scmp.ne.s32.totalorder %s2439_s23, %s2435_s22 }
  0x28   : > { %p91_p9 = scmp.eq.s32.totalorder %s2451_s25, 0  ;;  %p96_p10 = scmp.ne.s32.totalorder %s2435_s22, %s2431_s1 }
  0x29   : > { %s3137_s19 = smov (%p52_p7, %s50_s19), 0  ;;  %s3114_s18 = sadd.s32 4294967295, %s2451_s25  }
  0x2a   : > { %3111 = sst [smem:[#allocation19_spill]] %s3137_s19  ;;  %p2649_p11 = por %p91_p9, %p90_p8 }
  0x2b   : > { %p2655_p12 = por %p2606_p1, %p96_p10  ;;  %s80_s10 = ssub.s32 %s2447_s2, %s3137_s19 }
  0x2c   : > { %p500_p13 = scmp.eq.s32.totalorder %s3114_s18, 1  ;;  %p81_p0 = scmp.eq.s32.totalorder %s80_s10, 0 }
  0x2d   : > { %p506_p2 = scmp.eq.s32.totalorder %s1996_s4, 1  ;;  %p2134_p5 = scmp.lt.s32.totalorder %s2451_s25, 2 }
  0x2e   : > { %p2663_p4 = por %p500_p13, %p90_p8  ;;  %s620_s30 = sand.u32 1, %s2439_s23  }
  0x2f   : > { %s2669_s3 = scalar_select %p81_p0, %s2439_s23, %s83_s0  }
  0x30   : > { %p2671_p7 = por %p506_p2, %p96_p10  ;;  %s3117_s14 = sld [smem:[#allocation21_spill]] }
  0x31   : > { %s623_s1 = scalar_lea.vmem [#allocation5], %s620_s30  ;;  %p2124_p8 = pnand %p2134_p5, %p2649_p11 }
  0x32   : > { %s630_s18 = sshll.u32 %s623_s1, 4  ;;  %s621_s4 = scalar_lea.sflag [#allocation6], %s620_s30  ;;  %s631_s18 = int_to_ptr.vmem [resolvable:$true] %s630_s18 }
  0x33   : > { %s2685_s0 = sand.u32 (!%p2614_p3), 1, %s2435_s22  }
  0x34   : > { %639 = sbr.rel (%p2614_p3) target bundleno = 2291 (0x8f3), region = 100  ;;  %s642_s27 = scalar_lea.sflag (!%p2614_p3), [#allocation6], %s2685_s0 }
  0x36   : > { %s626_s19 = scalar_lea.hbm %s3117_s14, %s2447_s2  ;;  %s644_s14 = scalar_lea.vmem (!%p2614_p3), [#allocation5], %s2685_s0 }
  0x37   : > { %s628_s10 = sshll.u32 %s626_s19, 4  ;;  %s629_s10 = int_to_ptr.hbm [resolvable:$true] %s628_s10 }
  0x38   : > { %2126 = dma.hbm_to_vmem [thread:$0]  (!%p2124_p8), %s629_s10, 16, %s631_s18, %s621_s4  }
  0x39   : > { %2414 = dma.done.wait (%p2655_p12), %s642_s27, 16  }
  0x3a   : > { %2416 = vsyncadd (%p2655_p12), %s642_s27, 4294967280 }
  0x3b   : > { %2418 = dma.done.wait (%p2606_p1), [#allocation9], 512  }
  0x3c   : > { %2420 = vsyncadd (%p2606_p1), [#allocation9], 4294966784 }
  0x3d   : > { %2422 = dma.done.wait (%p2606_p1), [#allocation12], 256  }
  0x3e   : > { %2424 = vsyncadd (%p2606_p1), [#allocation12], 4294967040  ;;  %p720_p3 = scmp.lt.s32.totalorder %s2443_s24, 1  ;;  %s3118_s8 = sld [smem:[#allocation20_spill]]  ;;  %vm732_vm0 = vcmask 261120   ;;  %v2458_v2 = vmov 32.0  }
  0x3f   : > { %2214 = vrcp.f32 %v2458_v2  ;;  %s3119_s6 = sld [smem:[#allocation26_spill]]  ;;  %v2086_v15 = vld [vmem:[#allocation8 + $0x8] sm:$0xff]  ;;  %v2085_v17 = vld [vmem:[#allocation8] sm:$0xff]  ;;  %vm771_vm5 = vcmask 257024   ;;  %v2203_v37 = vld [vmem:[%s3071_s7] ss:$0 sm:$0xff] }
  0x40   : > { %s721_s1 = scalar_select %p720_p3, %s2443_s24, 1  ;;  %835 = vmatpush.bf16.msra.mxu1 %v2086_v15  ;;  %v2462_v49 = vmov 1983009808   ;;  %vm853_vm6 = vcmask 1047556   ;;  %v2463_v57 = vmov 1934713408  }
  0x41   : > { %s3122_s28 = sld [smem:[#allocation22_spill]]  ;;  %s2459_s19 = smov 104   ;;  %v858_v50 = vunpack.c.l.s4 %v2462_v49  ;;  %v882_v58 = vunpack.c.l.s4 %v2463_v57  ;;  %vm967_vm7 = vcmask 60416   ;;  %vm1279_vm8 = vcmask 64512  }
  0x42   : > { %s2007_s29 = sshll.u32 %s721_s1, 3  ;;  %s3120_s1 = sld [smem:[#allocation24_spill]]  ;;  %vm1411_vm9 = vcmask 1043456   ;;  %vm1608_vm10 = vcmask 130048   ;;  %vm1610_vm11 = vcmask 195584  }
  0x43   : > { %s3123_s4 = sld [smem:[#allocation23_spill]]  ;;  %s2460_s17 = smov 120   ;;  %v2756_v55 = vunpack.c.0.s8 %v858_v50  ;;  %v2761_v63 = vunpack.c.0.s8 %v882_v58 }
  0x44   : > { %s2706_s30 = scalar_lea.vmem %s3118_s8, %s2007_s29  ;;  %836 = vmatpush.bf16.msra.mxu1 %v2085_v17  ;;  %s2461_s8 = smov 112  }
  0x45   : > { %v729_v0 = vld [vmem:[%s2706_s30] sm:$0xff]  ;;  %v2215_v3 = vpop.eup %2214  ;;  %v2084_v14 = vld [vmem:[%s3119_s6 + $0x8] sm:$0xff]  ;;  %s3124_s5 = sld [smem:[#allocation25_spill]]  ;;  %s2464_s10 = smov 24  }
  0x46   : > { %v733_v1 = vsel %vm732_vm0, %v729_v0, 0.0  ;;  %v737_v4 = vmul.f32 32.0, %v2215_v3  ;;  %vm741_vm1 = vweird.f32 %v2215_v3  ;;  %802 = vmatpush.bf16.msra.mxu0 %v2084_v14  ;;  %v2083_v16 = vld [vmem:[%s3119_s6] sm:$0xff]  ;;  %s2466_s27 = smov 8   ;;  %s2080_s18 = sshll.u32 %s2443_s24, 3 }
  0x47   : > { %734 = vadd.xlane.f32.xlu0 %v733_v1  ;;  %v2201_v29 = vld [vmem:[%s3122_s28] ss:$0 sm:$0xff]  ;;  %s3125_s28 = sld [smem:[#allocation30_spill]] }
  0x48   : > { %v738_v5 = vsub.f32 1.0, %v737_v4  ;;  %s3121_s29 = smov %s3120_s1  ;;  %v2088_v18 = vld [vmem:[%s3120_s1 + $0x8] sm:$0xff] }
  0x49   : > { %1138 = vmatpush.bf16.msra.mxu2 %v2088_v18  ;;  %v2087_v20 = vld [vmem:[%s3121_s29] sm:$0xff] }
  0x4a   : > { %v739_v6 = vmul.f32 %v2215_v3, %v738_v5  ;;  %803 = vmatpush.bf16.msra.mxu0 %v2083_v16  ;;  %v2202_v32 = vld [vmem:[%s3123_s4] ss:$0 sm:$0xff]  ;;  %s2465_s4 = smov 16  }
  0x4b   : > { %v2205_v43 = vld [vmem:[%s3124_s5] ss:$0 sm:$0xff] }
  0x4c   : > { %v740_v7 = vadd.f32 %v2215_v3, %v739_v6 }
  0x4d   : > { %1139 = vmatpush.bf16.msra.mxu2 %v2087_v20 }
  0x4e   : > { %v2710_v8 = vsel %vm741_vm1, %v2215_v3, %v740_v7 }
  0xba   : > { %v735_v9 = vpop.xlane.xlu0 %734 }
  0xbb   : > { %v743_v10 = vmul.f32 %v2710_v8, %v735_v9 }
  0xbd   : > { %v744_v11 = vsub.f32 %v729_v0, %v743_v10 }
  0xbf   : > { %v745_v12 = vmul.f32 %v744_v11, %v744_v11 }
  0xc1   : > { %v746_v13 = vsel %vm732_vm0, %v745_v12, 0.0 }
  0xc2   : > { %747 = vadd.xlane.f32.xlu0 %v746_v13 }
 0x135   : > { %v748_v19 = vpop.xlane.xlu0 %747 }
 0x136   : > { %v749_v21 = vmul.f32 %v748_v19, %v2710_v8 }
 0x138   : > { %v750_v22 = vadd.f32 1e-12, %v749_v21 }
 0x13a   : > { %2216 = vrsqrt.f32 %v750_v22  ;;  %vm757_vm3 = vweird.f32 %v750_v22 }
 0x140   : > { %v2217_v23 = vpop.eup %2216 }
 0x141   : > { %v752_v24 = vmul.f32 %v2217_v23, %v750_v22  ;;  %vm758_vm2 = vweird.f32 %v2217_v23 }
 0x142   : > { %vm759_vm4 = vmor %vm757_vm3, %vm758_vm2 }
 0x143   : > { %v753_v25 = vmul.f32 %v2217_v23, %v752_v24 }
 0x145   : > { %v754_v26 = vmul.f32 0.5, %v753_v25 }
 0x147   : > { %v755_v27 = vsub.f32 1.5, %v754_v26 }
 0x149   : > { %v756_v28 = vmul.f32 %v2217_v23, %v755_v27 }
 0x14b   : > { %v760_v30 = vsel %vm759_vm4, %v2217_v23, %v756_v28  ;;  %vm1807_vm4 = vcmask 523264  }
 0x14c   : > { %v761_v31 = vmul.f32 %v760_v30, %v744_v11 }
 0x14e   : > { %v765_v33 = vmul.f32 %v2201_v29, %v761_v31 }
 0x150   : > { %v769_v34 = vadd.f32 %v2202_v32, %v765_v33 }
 0x152   : > { %v770_v35 = vpack.c.bf16 %v769_v34, %v769_v34 }
 0x154   : > { %772 = vst.msk [vmem:[#allocation2] sm:$0xf] %vm771_vm5, %v770_v35  ;;  %2016 = vmatmul.msk.bf16.vlgmr.msra.gmra.mxu0 %vm732_vm0, %v770_v35  ;;  %2025 = vmatmul.msk.bf16.vlgmr.msra.gmra.mxu1 %vm732_vm0, %v770_v35 }
 0x15b   : > { %v1107_v36 = vld [vmem:[#allocation2] sm:$0xf] }
 0x15c   : > { %2034 = vmatmul.msk.bf16.vlgmr.msra.gmra.mxu2 %vm732_vm0, %v1107_v36 }
 0x1d1   : > { %v805_v38 = vpop.f32.mrf.mxu0  ;;  %v2739_v39 = vpop.f32.mrf.mxu1 }
 0x1d2   : > { %v806_v40 = vadd.f32 %v2203_v37, %v805_v38 }
 0x1d4   : > { %849 = vrot.lane.b32.xlu2 %v806_v40, %s2459_s19  ;;  %843 = vrot.lane.b32.xlu1 %v806_v40, %s2460_s17  ;;  %v855_v60 = vrot.slane %v806_v40, 4 }
 0x1d9   : > { %v807_v41 = vpop.f32.mrf.mxu0  ;;  %v840_v42 = vpop.f32.mrf.mxu1 }
 0x1dc   : > { %846 = vrot.lane.b32.xlu1 %v806_v40, %s2461_s8 }
 0x1df   : > { %v1141_v44 = vpop.f32.mrf.mxu2 }
 0x1e0   : > { %v1142_v45 = vadd.f32 %v2205_v43, %v1141_v44 }
 0x1e2   : > { %v2747_v46 = vmul.f32 0.35355338, %v1142_v45 }
 0x1e4   : > { %1153 = vrot.lane.b32.xlu1 %v2747_v46, %s2459_s19  ;;  %1150 = vrot.lane.b32.xlu0 %v2747_v46, %s2461_s8  ;;  %v1159_v22 = vrot.slane %v2747_v46, 4 }
 0x1e5   : > { %1147 = vrot.lane.b32.xlu2 %v2747_v46, %s2460_s17 }
 0x1e7   : > { %v1143_v47 = vpop.f32.mrf.mxu2 }
 0x22e   : > { %v850_v48 = vpop.permute.xlu2 %849 }
 0x22f   : > { %v865_v53 = vrot.slane %v850_v48, 4 }
 0x23f   : > { %v1148_v10 = vpop.permute.xlu2 %1147 }
 0x240   : > { %v1171_v18 = vrot.slane %v1148_v10, 4 }
 0x246   : > { %v844_v51 = vpop.permute.xlu1 %843 }
 0x247   : > { %v867_v52 = vrot.slane %v844_v51, 4  ;;  %v866_v56 = vsel %vm853_vm6, %v865_v53, %v844_v51 }
 0x248   : > { %v872_v61 = vperm.slane %v866_v56, %v2756_v55 }
 0x249   : > { %v868_v54 = vsel %vm853_vm6, %v850_v48, %v867_v52 }
 0x24a   : > { %v876_v59 = vperm.slane %v868_v54, %v2756_v55  ;;  %v877_v5 = vrot.slane %v872_v61, 4 }
 0x24c   : > { %v889_v2 = vrot.slane %v876_v59, 4 }
 0x24e   : > { %v847_v62 = vpop.permute.xlu1 %846 }
 0x24f   : > { %v852_v0 = vrot.slane %v847_v62, 4  ;;  %v856_v1 = vsel %vm853_vm6, %v847_v62, %v855_v60 }
 0x250   : > { %v864_v3 = vperm.slane %v856_v1, %v2756_v55 }
 0x251   : > { %v854_v4 = vsel %vm853_vm6, %v852_v0, %v806_v40 }
 0x252   : > { %v860_v6 = vperm.slane %v854_v4, %v2756_v55  ;;  %v890_v7 = vsel %vm853_vm6, %v889_v2, %v864_v3  ;;  %v891_v9 = vrot.slane %v864_v3, 4 }
 0x253   : > { %v896_v11 = vperm.slane %v890_v7, %v2761_v63 }
 0x254   : > { %v878_v12 = vsel %vm853_vm6, %v877_v5, %v860_v6  ;;  %v879_v13 = vrot.slane %v860_v6, 4  ;;  %v892_v14 = vsel %vm853_vm6, %v876_v59, %v891_v9 }
 0x255   : > { %v884_v15 = vperm.slane %v878_v12, %v2761_v63  ;;  %v900_v16 = vperm.slane %v892_v14, %v2761_v63  ;;  %v905_v17 = vrot.slane %v896_v11, 4 }
 0x256   : > { %v880_v19 = vsel %vm853_vm6, %v872_v61, %v879_v13  ;;  %v1154_v20 = vpop.permute.xlu1 %1153  ;;  %v1151_v21 = vpop.permute.xlu0 %1150 }
 0x257   : > { %v888_v23 = vperm.slane %v880_v19, %v2761_v63  ;;  %v901_v24 = vrot.slane %v884_v15, 4  ;;  %v906_v25 = vsel %vm853_vm6, 0.0, %v905_v17  ;;  %v907_v26 = vrot.slane %v900_v16, 4 }
 0x258   : > { %v1169_v27 = vrot.slane %v1154_v20, 4  ;;  %v1172_v28 = vsel %vm853_vm6, %v1154_v20, %v1171_v18  ;;  %v1156_v29 = vrot.slane %v1151_v21, 4  ;;  %v1160_v30 = vsel %vm853_vm6, %v1151_v21, %v1159_v22 }
 0x259   : > { %v902_v31 = vsel %vm853_vm6, 0.0, %v901_v24  ;;  %v903_v32 = vrot.slane %v888_v23, 4  ;;  %v908_v33 = vsel %vm853_vm6, 0.0, %v907_v26  ;;  %v920_v34 = vsel %vm853_vm6, %v907_v26, %v896_v11 }
 0x25a   : > { %v924_v35 = vperm.slane %v920_v34, %v2756_v55  ;;  %v925_v36 = vrot.slane %v908_v33, 4  ;;  %v1170_v37 = vsel %vm853_vm6, %v1169_v27, %v1148_v10  ;;  %v1180_v38 = vperm.slane %v1172_v28, %v2756_v55 }
 0x25b   : > { %v904_v40 = vsel %vm853_vm6, 0.0, %v903_v32  ;;  %v909_v41 = vsel %vm853_vm6, %v903_v32, %v884_v15  ;;  %v1176_v42 = vperm.slane %v1170_v37, %v2756_v55  ;;  %v1158_v43 = vsel %vm853_vm6, %v1156_v29, %v2747_v46 }
 0x25c   : > { %v913_v44 = vperm.slane %v909_v41, %v2756_v55  ;;  %v914_v45 = vrot.slane %v904_v40, 4  ;;  %v926_v47 = vsel %vm853_vm6, %v925_v36, %v906_v25  ;;  %v945_v48 = vrot.slane %v924_v35, 4 }
 0x25d   : > { %v930_v49 = vperm.slane %v926_v47, %v2756_v55  ;;  %v1181_v50 = vrot.slane %v1176_v42, 4  ;;  %v1193_v51 = vrot.slane %v1180_v38, 4  ;;  %v1164_v52 = vperm.slane %v1158_v43, %v2756_v55 }
 0x25e   : > { %v915_v53 = vsel %vm853_vm6, %v914_v45, %v902_v31  ;;  %v933_v54 = vrot.slane %v913_v44, 4  ;;  %v1168_v56 = vperm.slane %v1160_v30, %v2756_v55 }
 0x25f   : > { %v919_v46 = vperm.slane %v915_v53, %v2756_v55  ;;  %v943_v57 = vrot.slane %v930_v49, 4  ;;  %v946_v58 = vsel %vm853_vm6, %v930_v49, %v945_v48  ;;  %v1182_v59 = vsel %vm853_vm6, %v1181_v50, %v1164_v52 }
 0x260   : > { %v954_v60 = vperm.slane %v946_v58, %v2761_v63  ;;  %v1183_v61 = vrot.slane %v1164_v52, 4  ;;  %v1188_v62 = vperm.slane %v1182_v59, %v2761_v63  ;;  %v1194_v0 = vsel %vm853_vm6, %v1193_v51, %v1168_v56 }
 0x261   : > { %v931_v1 = vrot.slane %v919_v46, 4  ;;  %v934_v2 = vsel %vm853_vm6, %v919_v46, %v933_v54  ;;  %v944_v3 = vsel %vm853_vm6, %v943_v57, %v924_v35  ;;  %v1195_v4 = vrot.slane %v1168_v56, 4 }
 0x262   : > { %v942_v5 = vperm.slane %v934_v2, %v2761_v63  ;;  %v950_v6 = vperm.slane %v944_v3, %v2761_v63  ;;  %v959_v7 = vrot.slane %v954_v60, 4  ;;  %v1184_v9 = vsel %vm853_vm6, %v1176_v42, %v1183_v61 }
 0x263   : > { %v932_v10 = vsel %vm853_vm6, %v931_v1, %v913_v44  ;;  %v1192_v11 = vperm.slane %v1184_v9, %v2761_v63  ;;  %v1196_v12 = vsel %vm853_vm6, %v1180_v38, %v1195_v4  ;;  %v1200_v13 = vperm.slane %v1194_v0, %v2761_v63 }
 0x264   : > { %v938_v14 = vperm.slane %v932_v10, %v2761_v63  ;;  %v955_v15 = vrot.slane %v950_v6, 4  ;;  %v960_v16 = vsel %vm853_vm6, %v959_v7, %v942_v5  ;;  %v961_v17 = vrot.slane %v942_v5, 4 }
 0x265   : > { %v965_v18 = vpack.c.bf16 %v960_v16, %v960_v16  ;;  %v1204_v19 = vperm.slane %v1196_v12, %v2761_v63  ;;  %v1207_v20 = vrot.slane %v1192_v11, 4  ;;  %v1205_v24 = vrot.slane %v1188_v62, 4 }
 0x266   : > { %v956_v21 = vsel %vm853_vm6, %v955_v15, %v938_v14  ;;  %v957_v22 = vrot.slane %v938_v14, 4  ;;  %v962_v23 = vsel %vm853_vm6, %v954_v60, %v961_v17  ;;  %v1209_v29 = vrot.slane %v1200_v13, 4  ;;  %v2206_v17 = vld [vmem:[%s644_s14] ss:$0 sm:$0xff]  ;;  %s2006_s14 = sshll.u32 %s2685_s0, 3 }
 0x267   : > { %v963_v25 = vpack.c.bf16 %v956_v21, %v956_v21  ;;  %v966_v26 = vpack.c.bf16 %v962_v23, %v962_v23  ;;  %970 = vst.msk [vmem:[#allocation3 + $0x8] sm:$0xf] %vm967_vm7, %v965_v18  ;;  %v1208_v27 = vsel %vm853_vm6, 0.0, %v1207_v20  ;;  %v1211_v30 = vrot.slane %v1204_v19, 4  ;;  %s719_s24 = scalar_lea.vmem [#allocation13], %s2006_s14 }
 0x268   : > { %v958_v28 = vsel %vm853_vm6, %v950_v6, %v957_v22  ;;  %v1213_v31 = vsel %vm853_vm6, %v1207_v20, %v1188_v62  ;;  %v1218_v34 = vrot.slane %v1208_v27, 4  ;;  %v1206_v35 = vsel %vm853_vm6, 0.0, %v1205_v24  ;;  %s1872_s5 = sshll.u32 %s719_s24, 4  ;;  %s1873_s5 = int_to_ptr.vmem [resolvable:$true] %s1872_s5 }
 0x269   : > { %v964_v32 = vpack.c.bf16 %v958_v28, %v958_v28  ;;  %968 = vst.msk [vmem:[#allocation3] sm:$0xf] %vm967_vm7, %v963_v25  ;;  %v1217_v33 = vperm.slane %v1213_v31, %v2756_v55  ;;  %v1212_v36 = vsel %vm853_vm6, 0.0, %v1211_v30  ;;  %v1224_v37 = vsel %vm853_vm6, %v1211_v30, %v1200_v13 }
 0x26a   : > { %971 = vst.msk [vmem:[#allocation3 + $0xc] sm:$0xf] %vm967_vm7, %v966_v26  ;;  %v1228_v38 = vperm.slane %v1224_v37, %v2756_v55  ;;  %v1229_v40 = vrot.slane %v1212_v36, 4  ;;  %v1219_v41 = vsel %vm853_vm6, %v1218_v34, %v1206_v35  ;;  %v1210_v43 = vsel %vm853_vm6, 0.0, %v1209_v29  ;;  %v2204_v34 = vld [vmem:[%s3073_s9] ss:$0 sm:$0xff] }
 0x26b   : > { %969 = vst.msk [vmem:[#allocation3 + $0x4] sm:$0xf] %vm967_vm7, %v964_v32  ;;  %v1237_v42 = vrot.slane %v1217_v33, 4  ;;  %v1223_v44 = vperm.slane %v1219_v41, %v2756_v55  ;;  %v839_v35 = vadd.f32 %v2204_v34, %v2739_v39 }
 0x26c   : > { %v1230_v45 = vsel %vm853_vm6, %v1229_v40, %v1210_v43  ;;  %v1249_v47 = vrot.slane %v1228_v38, 4 }
 0x26d   : > { %v1234_v48 = vperm.slane %v1230_v45, %v2756_v55  ;;  %v1238_v50 = vsel %vm853_vm6, %v1223_v44, %v1237_v42  ;;  %v1235_v51 = vrot.slane %v1223_v44, 4 }
 0x26e   : > { %v1273_v49 = vld [vmem:[#allocation3 + $0x8] sm:$0xf]  ;;  %v1246_v53 = vperm.slane %v1238_v50, %v2761_v63 }
 0x26f   : > { %v1322_v52 = vsel %vm1279_vm8, %v1273_v49, 0  ;;  %v1250_v56 = vsel %vm853_vm6, %v1234_v48, %v1249_v47  ;;  %v1236_v46 = vsel %vm853_vm6, %v1235_v51, %v1217_v33  ;;  %v1247_v57 = vrot.slane %v1234_v48, 4 }
 0x270   : > { %1331 = vmatpush.bf16.xpose.msrb.mxu1 %v1322_v52  ;;  %v1271_v54 = vld [vmem:[#allocation3] sm:$0xf]  ;;  %v1258_v60 = vperm.slane %v1250_v56, %v2761_v63  ;;  %v1242_v61 = vperm.slane %v1236_v46, %v2761_v63  ;;  %v1265_v62 = vrot.slane %v1246_v53, 4 }
 0x271   : > { %v1284_v58 = vsel %vm1279_vm8, %v1271_v54, 0  ;;  %v1274_v59 = vld [vmem:[#allocation3 + $0xc] sm:$0xf]  ;;  %v1248_v2 = vsel %vm853_vm6, %v1247_v57, %v1228_v38 }
 0x272   : > { %1293 = vmatpush.bf16.xpose.msra.mxu3 %v1284_v58  ;;  %v1341_v0 = vsel %vm1279_vm8, %v1274_v59, 0  ;;  %v1272_v1 = vld [vmem:[#allocation3 + $0x4] sm:$0xf]  ;;  %v1263_v4 = vrot.slane %v1258_v60, 4  ;;  %v1254_v5 = vperm.slane %v1248_v2, %v2761_v63  ;;  %v1261_v6 = vrot.slane %v1242_v61, 4 }
 0x273   : > { %1350 = vmatpush.bf16.xpose.msrb.mxu2 %v1341_v0  ;;  %v1303_v3 = vsel %vm1279_vm8, %v1272_v1, 0  ;;  %v1266_v10 = vsel %vm853_vm6, %v1258_v60, %v1265_v62  ;;  %v984_v0 = vrot.slane %v839_v35, 4 }
 0x274   : > { %1312 = vmatpush.bf16.xpose.msrb.mxu0 %v1303_v3  ;;  %v1264_v7 = vsel %vm853_vm6, %v1263_v4, %v1246_v53  ;;  %v1259_v9 = vrot.slane %v1254_v5, 4  ;;  %v1262_v12 = vsel %vm853_vm6, %v1254_v5, %v1261_v6  ;;  %v1270_v15 = vpack.c.bf16 %v1266_v10, %v1266_v10 }
 0x275   : > { %v1269_v11 = vpack.c.bf16 %v1264_v7, %v1264_v7  ;;  %v1268_v16 = vpack.c.bf16 %v1262_v12, %v1262_v12 }
 0x276   : > { %v1260_v13 = vsel %vm853_vm6, %v1259_v9, %v1242_v61 }
 0x277   : > { %2037 = vmatmul.msk.bf16.vlgmr.msrb.gmra.mxu1 %vm1279_vm8, %v1269_v11  ;;  %v1267_v14 = vpack.c.bf16 %v1260_v13, %v1260_v13 }
 0x279   : > { %2035 = vmatmul.msk.bf16.vlgmr.msra.gmra.mxu3 %vm1279_vm8, %v1267_v14 }
 0x27a   : > { %2038 = vmatmul.msk.bf16.vlgmr.msrb.gmra.mxu2 %vm1279_vm8, %v1270_v15 }
 0x27b   : > { %2036 = vmatmul.msk.bf16.vlgmr.msrb.gmra.mxu0 %vm1279_vm8, %v1268_v16 }
 0x2f4   : > { %v1333_v18 = vpop.f32.mrf.mxu1 }
 0x2f5   : > { %v1334_v19 = vadd.f32 %v2206_v17, %v1333_v18 }
 0x2f7   : > { %v1362_v20 = vsel %vm1279_vm8, %v1334_v19, -inf }
 0x2f8   : > { %v1314_v21 = vpop.f32.mrf.mxu0  ;;  %1363 = vmax.xlane.f32.xlu0 %v1362_v20 }
 0x2f9   : > { %v1315_v22 = vadd.f32 %v2206_v17, %v1314_v21 }
 0x2fb   : > { %v1359_v23 = vsel %vm1279_vm8, %v1315_v22, -inf }
 0x2fc   : > { %1360 = vmax.xlane.f32.xlu2 %v1359_v23  ;;  %v1335_v24 = vpop.f32.mrf.mxu1  ;;  %v1295_v27 = vpop.f32.mrf.mxu3 }
 0x2fd   : > { %v1352_v25 = vpop.f32.mrf.mxu2  ;;  %v1296_v28 = vadd.f32 %v2206_v17, %v1295_v27 }
 0x2fe   : > { %v1353_v26 = vadd.f32 %v2206_v17, %v1352_v25 }
 0x2ff   : > { %v1356_v31 = vsel %vm1279_vm8, %v1296_v28, -inf }
 0x300   : > { %v1365_v29 = vsel %vm1279_vm8, %v1353_v26, -inf  ;;  %v1316_v30 = vpop.f32.mrf.mxu0 }
 0x301   : > { %1366 = vmax.xlane.f32.xlu1 %v1365_v29 }
 0x304   : > { %1357 = vmax.xlane.f32.xlu2 %v1356_v31  ;;  %v1297_v33 = vpop.f32.mrf.mxu3 }
 0x305   : > { %v1354_v32 = vpop.f32.mrf.mxu2 }
 0x30c   : > { %979 = vrot.lane.b32.xlu0 %v839_v35, %s2459_s19 }
 0x31a   : > { %976 = vrot.lane.b32.xlu1 %v839_v35, %s2461_s8 }
 0x31c   : > { %973 = vrot.lane.b32.xlu2 %v839_v35, %s2460_s17 }
 0x36b   : > { %v1364_v36 = vpop.xlane.xlu0 %1363 }
 0x36c   : > { %v1370_v37 = vsub.f32 %v1334_v19, %v1364_v36 }
 0x36e   : > { %v1376_v38 = vmul.f32 1.442695, %v1370_v37 }
 0x36f   : > { %v1361_v40 = vpop.xlane.xlu2 %1360 }
 0x370   : > { %2218 = vpow2.f32 %v1376_v38  ;;  %v1369_v48 = vsub.f32 %v1315_v22, %v1361_v40 }
 0x372   : > { %v1374_v50 = vmul.f32 1.442695, %v1369_v48 }
 0x374   : > { %v1367_v41 = vpop.xlane.xlu1 %1366 }
 0x375   : > { %v1371_v42 = vsub.f32 %v1353_v26, %v1367_v41 }
 0x376   : > { %v2866_v43 = vpop.eup %2218 }
 0x377   : > { %v1378_v44 = vmul.f32 1.442695, %v1371_v42  ;;  %v1358_v45 = vpop.xlane.xlu2 %1357  ;;  %v1386_v39 = vsel %vm1279_vm8, %v2866_v43, 0.0 }
 0x378   : > { %v1368_v47 = vsub.f32 %v1296_v28, %v1358_v45  ;;  %1387 = vadd.xlane.f32.xlu0 %v1386_v39 }
 0x379   : > { %2220 = vpow2.f32 %v1378_v44 }
 0x37a   : > { %v1372_v49 = vmul.f32 1.442695, %v1368_v47 }
 0x37c   : > { %2222 = vpow2.f32 %v1372_v49 }
 0x37d   : > { %2224 = vpow2.f32 %v1374_v50 }
 0x37e   : > { %v980_v56 = vpop.permute.xlu0 %979 }
 0x37f   : > { %v2870_v51 = vpop.eup %2220  ;;  %v974_v52 = vpop.permute.xlu2 %973  ;;  %v994_v58 = vrot.slane %v980_v56, 4 }
 0x380   : > { %v1389_v53 = vsel %vm1279_vm8, %v2870_v51, 0.0  ;;  %v996_v46 = vrot.slane %v974_v52, 4 }
 0x381   : > { %1390 = vadd.xlane.f32.xlu1 %v1389_v53  ;;  %v995_v61 = vsel %vm853_vm6, %v994_v58, %v974_v52 }
 0x382   : > { %v2874_v54 = vpop.eup %2222  ;;  %v997_v59 = vsel %vm853_vm6, %v980_v56, %v996_v46  ;;  %v1001_v2 = vperm.slane %v995_v61, %v2756_v55 }
 0x383   : > { %v1380_v57 = vsel %vm1279_vm8, %v2874_v54, 0.0  ;;  %v2879_v60 = vpop.eup %2224  ;;  %v1005_v62 = vperm.slane %v997_v59, %v2756_v55 }
 0x384   : > { %1381 = vadd.xlane.f32.xlu2 %v1380_v57  ;;  %v1383_v1 = vsel %vm1279_vm8, %v2879_v60, 0.0  ;;  %v1006_v10 = vrot.slane %v1001_v2, 4 }
 0x385   : > { %v1018_v6 = vrot.slane %v1005_v62, 4 }
 0x38c   : > { %v977_v3 = vpop.permute.xlu1 %976  ;;  %1384 = vadd.xlane.f32.xlu2 %v1383_v1 }
 0x38d   : > { %v982_v4 = vrot.slane %v977_v3, 4  ;;  %v985_v5 = vsel %vm853_vm6, %v977_v3, %v984_v0 }
 0x38e   : > { %v993_v7 = vperm.slane %v985_v5, %v2756_v55 }
 0x38f   : > { %v983_v9 = vsel %vm853_vm6, %v982_v4, %v839_v35 }
 0x390   : > { %v989_v11 = vperm.slane %v983_v9, %v2756_v55  ;;  %v1019_v12 = vsel %vm853_vm6, %v1018_v6, %v993_v7  ;;  %v1020_v13 = vrot.slane %v993_v7, 4 }
 0x391   : > { %v1025_v14 = vperm.slane %v1019_v12, %v2761_v63 }
 0x392   : > { %v1007_v15 = vsel %vm853_vm6, %v1006_v10, %v989_v11  ;;  %v1008_v16 = vrot.slane %v989_v11, 4  ;;  %v1021_v17 = vsel %vm853_vm6, %v1005_v62, %v1020_v13 }
 0x393   : > { %v1013_v18 = vperm.slane %v1007_v15, %v2761_v63  ;;  %v1029_v19 = vperm.slane %v1021_v17, %v2761_v63  ;;  %v1034_v22 = vrot.slane %v1025_v14, 4 }
 0x394   : > { %v1009_v20 = vsel %vm853_vm6, %v1001_v2, %v1008_v16 }
 0x395   : > { %v1017_v21 = vperm.slane %v1009_v20, %v2761_v63  ;;  %v1036_v23 = vrot.slane %v1029_v19, 4  ;;  %v1030_v24 = vrot.slane %v1013_v18, 4  ;;  %v1035_v31 = vsel %vm853_vm6, 0.0, %v1034_v22 }
 0x397   : > { %v1032_v25 = vrot.slane %v1017_v21, 4  ;;  %v1037_v26 = vsel %vm853_vm6, 0.0, %v1036_v23  ;;  %v1049_v27 = vsel %vm853_vm6, %v1036_v23, %v1025_v14  ;;  %v1031_v37 = vsel %vm853_vm6, 0.0, %v1030_v24 }
 0x398   : > { %v1053_v28 = vperm.slane %v1049_v27, %v2756_v55  ;;  %v1054_v29 = vrot.slane %v1037_v26, 4 }
 0x399   : > { %v1033_v30 = vsel %vm853_vm6, 0.0, %v1032_v25  ;;  %v1038_v32 = vsel %vm853_vm6, %v1032_v25, %v1013_v18 }
 0x39a   : > { %v1042_v33 = vperm.slane %v1038_v32, %v2756_v55  ;;  %v1043_v34 = vrot.slane %v1033_v30, 4  ;;  %v1055_v35 = vsel %vm853_vm6, %v1054_v29, %v1035_v31  ;;  %v1074_v36 = vrot.slane %v1053_v28, 4 }
 0x39b   : > { %v1059_v38 = vperm.slane %v1055_v35, %v2756_v55 }
 0x39c   : > { %v1044_v40 = vsel %vm853_vm6, %v1043_v34, %v1031_v37  ;;  %v1062_v41 = vrot.slane %v1042_v33, 4 }
 0x39d   : > { %v1048_v42 = vperm.slane %v1044_v40, %v2756_v55  ;;  %v1072_v44 = vrot.slane %v1059_v38, 4  ;;  %v1075_v45 = vsel %vm853_vm6, %v1059_v38, %v1074_v36 }
 0x39e   : > { %v1083_v47 = vperm.slane %v1075_v45, %v2761_v63 }
 0x39f   : > { %v1060_v39 = vrot.slane %v1048_v42, 4  ;;  %v1063_v48 = vsel %vm853_vm6, %v1048_v42, %v1062_v41  ;;  %v1073_v49 = vsel %vm853_vm6, %v1072_v44, %v1053_v28 }
 0x3a0   : > { %v1071_v50 = vperm.slane %v1063_v48, %v2761_v63  ;;  %v1079_v52 = vperm.slane %v1073_v49, %v2761_v63  ;;  %v1088_v53 = vrot.slane %v1083_v47, 4 }
 0x3a1   : > { %v1061_v56 = vsel %vm853_vm6, %v1060_v39, %v1042_v33 }
 0x3a2   : > { %v1067_v46 = vperm.slane %v1061_v56, %v2761_v63  ;;  %v1084_v57 = vrot.slane %v1079_v52, 4  ;;  %v1089_v58 = vsel %vm853_vm6, %v1088_v53, %v1071_v50  ;;  %v1090_v59 = vrot.slane %v1071_v50, 4 }
 0x3a3   : > { %v1094_v61 = vpack.c.bf16 %v1089_v58, %v1089_v58 }
 0x3a4   : > { %v1085_v62 = vsel %vm853_vm6, %v1084_v57, %v1067_v46  ;;  %v1086_v0 = vrot.slane %v1067_v46, 4  ;;  %v1091_v1 = vsel %vm853_vm6, %v1083_v47, %v1090_v59 }
 0x3a5   : > { %v1092_v2 = vpack.c.bf16 %v1085_v62, %v1085_v62  ;;  %v1095_v3 = vpack.c.bf16 %v1091_v1, %v1091_v1  ;;  %1098 = vst.msk [vmem:[#allocation4 + $0x8] sm:$0xf] %vm967_vm7, %v1094_v61 }
 0x3a6   : > { %v1087_v4 = vsel %vm853_vm6, %v1079_v52, %v1086_v0 }
 0x3a7   : > { %v1093_v5 = vpack.c.bf16 %v1087_v4, %v1087_v4  ;;  %1096 = vst.msk [vmem:[#allocation4] sm:$0xf] %vm967_vm7, %v1092_v2 }
 0x3a8   : > { %1099 = vst.msk [vmem:[#allocation4 + $0xc] sm:$0xf] %vm967_vm7, %v1095_v3 }
 0x3a9   : > { %1097 = vst.msk [vmem:[#allocation4 + $0x4] sm:$0xf] %vm967_vm7, %v1093_v5 }
 0x3ac   : > { %v1406_v6 = vld [vmem:[#allocation4 + $0x8] sm:$0xf] }
 0x3ad   : > { %v1451_v7 = vsel %vm1411_vm9, %v1406_v6, 0 }
 0x3ae   : > { %1460 = vmatpush.bf16.msra.mxu1 %v1451_v7  ;;  %v1404_v9 = vld [vmem:[#allocation4] sm:$0xf] }
 0x3af   : > { %v1413_v10 = vsel %vm1411_vm9, %v1404_v9, 0  ;;  %v1407_v11 = vld [vmem:[#allocation4 + $0xc] sm:$0xf] }
 0x3b0   : > { %1422 = vmatpush.bf16.msrb.mxu3 %v1413_v10  ;;  %v1470_v12 = vsel %vm1411_vm9, %v1407_v11, 0  ;;  %v1405_v13 = vld [vmem:[#allocation4 + $0x4] sm:$0xf] }
 0x3b1   : > { %1479 = vmatpush.bf16.msra.mxu2 %v1470_v12  ;;  %v1432_v14 = vsel %vm1411_vm9, %v1405_v13, 0 }
 0x3b2   : > { %1441 = vmatpush.bf16.msra.mxu0 %v1432_v14 }
 0x3eb   : > { %v1388_v15 = vpop.xlane.xlu0 %1387 }
 0x3ec   : > { %2226 = vrcp.f32 %v1388_v15 }
 0x3f2   : > { %v2227_v16 = vpop.eup %2226 }
 0x3f3   : > { %v1398_v17 = vmul.f32 %v2227_v16, %v2866_v43 }
 0x3f4   : > { %v1391_v18 = vpop.xlane.xlu1 %1390 }
 0x3f5   : > { %2228 = vrcp.f32 %v1391_v18  ;;  %v1402_v19 = vpack.c.bf16 %v1398_v17, %v1398_v17 }
 0x3f7   : > { %v1382_v20 = vpop.xlane.xlu2 %1381  ;;  %2041 = vmatmul.msk.bf16.vlgmr.msra.gmra.mxu1 %vm1279_vm8, %v1402_v19 }
 0x3f8   : > { %2230 = vrcp.f32 %v1382_v20 }
 0x3fb   : > { %v2229_v21 = vpop.eup %2228 }
 0x3fc   : > { %v1399_v22 = vmul.f32 %v2229_v21, %v2870_v51 }
 0x3fe   : > { %v2231_v23 = vpop.eup %2230  ;;  %v1403_v24 = vpack.c.bf16 %v1399_v22, %v1399_v22 }
 0x3ff   : > { %v1396_v25 = vmul.f32 %v2231_v23, %v2874_v54  ;;  %v1385_v26 = vpop.xlane.xlu2 %1384 }
 0x400   : > { %2042 = vmatmul.msk.bf16.vlgmr.msra.gmra.mxu2 %vm1279_vm8, %v1403_v24  ;;  %2232 = vrcp.f32 %v1385_v26 }
 0x401   : > { %v1400_v27 = vpack.c.bf16 %v1396_v25, %v1396_v25 }
 0x403   : > { %2039 = vmatmul.msk.bf16.vlgmr.msrb.gmra.mxu3 %vm1279_vm8, %v1400_v27 }
 0x406   : > { %v2233_v43 = vpop.eup %2232 }
 0x407   : > { %v1397_v28 = vmul.f32 %v2233_v43, %v2879_v60 }
 0x409   : > { %v1401_v29 = vpack.c.bf16 %v1397_v28, %v1397_v28 }
 0x40b   : > { %2040 = vmatmul.msk.bf16.vlgmr.msra.gmra.mxu0 %vm1279_vm8, %v1401_v29 }
 0x474   : > { %v1462_v30 = vpop.f32.mrf.mxu1 }
 0x475   : > { %v1485_v32 = vrot.slane %v1462_v30, 4 }
 0x47c   : > { %v1464_v31 = vpop.f32.mrf.mxu1 }
 0x483   : > { %v1481_v51 = vpop.f32.mrf.mxu2 }
 0x484   : > { %v1497_v34 = vrot.slane %v1481_v51, 4 }
 0x486   : > { %v1424_v33 = vpop.f32.mrf.mxu3 }
 0x487   : > { %v1486_v54 = vsel %vm853_vm6, %v1485_v32, %v1424_v33  ;;  %v1487_v35 = vrot.slane %v1424_v33, 4 }
 0x488   : > { %v1492_v36 = vperm.slane %v1486_v54, %v2756_v55  ;;  %v1443_v37 = vpop.f32.mrf.mxu0 }
 0x489   : > { %v1488_v38 = vsel %vm853_vm6, %v1462_v30, %v1487_v35  ;;  %v1498_v40 = vsel %vm853_vm6, %v1497_v34, %v1443_v37  ;;  %v1499_v60 = vrot.slane %v1443_v37, 4  ;;  %v2089_v37 = vld [vmem:[#allocation10] sm:$0xff] }
 0x48a   : > { %v1496_v41 = vperm.slane %v1488_v38, %v2756_v55  ;;  %v1511_v42 = vrot.slane %v1492_v36, 4  ;;  %v1504_v44 = vperm.slane %v1498_v40, %v2756_v55 }
 0x48b   : > { %v1500_v45 = vsel %vm853_vm6, %v1481_v51, %v1499_v60  ;;  %v1483_v47 = vpop.f32.mrf.mxu2 }
 0x48c   : > { %v1523_v39 = vrot.slane %v1496_v41, 4  ;;  %v1508_v48 = vperm.slane %v1500_v45, %v2756_v55  ;;  %v1509_v49 = vrot.slane %v1504_v44, 4  ;;  %v1512_v50 = vsel %vm853_vm6, %v1504_v44, %v1511_v42  ;;  %v2207_v45 = vld [vmem:[%s3075_s11] ss:$0 sm:$0xff] }
 0x48d   : > { %v1520_v52 = vperm.slane %v1512_v50, %v2761_v63 }
 0x48e   : > { %v1510_v53 = vsel %vm853_vm6, %v1509_v49, %v1492_v36  ;;  %v1521_v56 = vrot.slane %v1508_v48, 4  ;;  %v1524_v46 = vsel %vm853_vm6, %v1508_v48, %v1523_v39  ;;  %v1426_v57 = vpop.f32.mrf.mxu3  ;;  %v2090_v36 = vld [vmem:[#allocation10 + $0x8] sm:$0xff] }
 0x48f   : > { %v1516_v58 = vperm.slane %v1510_v53, %v2761_v63  ;;  %v1532_v59 = vperm.slane %v1524_v46, %v2761_v63  ;;  %v1535_v61 = vrot.slane %v1520_v52, 4  ;;  %1642 = vmatpush.bf16.msra.mxu3 %v2090_v36  ;;  %v2240_v48 = vld [vmem:[%s2706_s30] sm:$0xff]  ;;  %s3127_s30 = sld [smem:[#allocation33_spill]] }
 0x490   : > { %v1522_v62 = vsel %vm853_vm6, %v1521_v56, %v1496_v41  ;;  %v1445_v0 = vpop.f32.mrf.mxu0 }
 0x491   : > { %v1528_v1 = vperm.slane %v1522_v62, %v2761_v63  ;;  %v1533_v2 = vrot.slane %v1516_v58, 4  ;;  %v1536_v3 = vsel %vm853_vm6, 0.0, %v1535_v61  ;;  %v1539_v4 = vrot.slane %v1532_v59, 4  ;;  %v2092_v59 = vld [vmem:[#allocation11 + $0x8] sm:$0xff] }
 0x492   : > { %v1541_v5 = vsel %vm853_vm6, %v1535_v61, %v1516_v58  ;;  %v1546_v6 = vrot.slane %v1536_v3, 4  ;;  %1719 = vmatpush.bf16.msrb.mxu0 %v2092_v59  ;;  %v2091_v61 = vld [vmem:[#allocation11] sm:$0xff] }
 0x493   : > { %v1534_v7 = vsel %vm853_vm6, 0.0, %v1533_v2  ;;  %v1537_v9 = vrot.slane %v1528_v1, 4  ;;  %v1540_v10 = vsel %vm853_vm6, 0.0, %v1539_v4  ;;  %v1545_v11 = vperm.slane %v1541_v5, %v2756_v55  ;;  %1643 = vmatpush.bf16.msra.mxu3 %v2089_v37  ;;  %v2093_v37 = vld [vmem:[%s3080_s16] sm:$0xff] }
 0x494   : > { %v1557_v12 = vrot.slane %v1540_v10, 4  ;;  %v1547_v13 = vsel %vm853_vm6, %v1546_v6, %v1534_v7  ;;  %v1552_v14 = vsel %vm853_vm6, %v1539_v4, %v1528_v1 }
 0x495   : > { %v1538_v15 = vsel %vm853_vm6, 0.0, %v1537_v9  ;;  %v1551_v16 = vperm.slane %v1547_v13, %v2756_v55  ;;  %v1556_v17 = vperm.slane %v1552_v14, %v2756_v55  ;;  %v1565_v18 = vrot.slane %v1545_v11, 4  ;;  %v2208_v9 = vld [vmem:[%s3076_s12] ss:$0 sm:$0xff]  ;;  %s1870_s17 = scalar_lea.hbm %s3127_s30, %s2080_s18  ;;  %s2381_s14 = scalar_lea.hbm %s3127_s30, 16 }
 0x496   : > { %v1558_v19 = vsel %vm853_vm6, %v1557_v12, %v1538_v15  ;;  %1720 = vmatpush.bf16.msrb.mxu0 %v2091_v61  ;;  %s1874_s6 = sshll.u32 %s1870_s17, 4  ;;  %s1875_s6 = int_to_ptr.hbm [resolvable:$true] %s1874_s6 }
 0x497   : > { %v1562_v20 = vperm.slane %v1558_v19, %v2756_v55  ;;  %v1566_v21 = vsel %vm853_vm6, %v1551_v16, %v1565_v18  ;;  %v1577_v22 = vrot.slane %v1556_v17, 4  ;;  %v1563_v23 = vrot.slane %v1551_v16, 4  ;;  %v2210_v16 = vld [vmem:[%s3079_s15] ss:$0 sm:$0xff] }
 0x498   : > { %v1574_v24 = vperm.slane %v1566_v21, %v2761_v63 }
 0x499   : > { %v1578_v25 = vsel %vm853_vm6, %v1562_v20, %v1577_v22  ;;  %v1564_v26 = vsel %vm853_vm6, %v1563_v23, %v1545_v11  ;;  %v1575_v27 = vrot.slane %v1562_v20, 4  ;;  %v2209_v11 = vld [vmem:[%s3077_s13] ss:$0 sm:$0xff] }
 0x49a   : > { %v1586_v43 = vperm.slane %v1578_v25, %v2761_v63  ;;  %v1593_v28 = vrot.slane %v1574_v24, 4  ;;  %v1570_v29 = vperm.slane %v1564_v26, %v2761_v63 }
 0x49b   : > { %v1576_v30 = vsel %vm853_vm6, %v1575_v27, %v1556_v17 }
 0x49c   : > { %v1594_v55 = vsel %vm853_vm6, %v1586_v43, %v1593_v28  ;;  %v1591_v31 = vrot.slane %v1586_v43, 4  ;;  %v1582_v51 = vperm.slane %v1576_v30, %v2761_v63  ;;  %v1589_v32 = vrot.slane %v1570_v29, 4  ;;  %v2096_v30 = vld [vmem:[%s3080_s16 + $0x18] sm:$0xff] }
 0x49d   : > { %1604 = vrot.lane.b32.xlu0 %v1594_v55, %s2464_s10  ;;  %1815 = vmatpush.bf16.msrb.mxu1 %v2096_v30  ;;  %s1859_s10 = scalar_lea.sflag [#allocation7], %s2685_s0 }
 0x49e   : > { %v1592_v33 = vsel %vm853_vm6, %v1591_v31, %v1574_v24  ;;  %v1587_v34 = vrot.slane %v1582_v51, 4  ;;  %v1590_v54 = vsel %vm853_vm6, %v1582_v51, %v1589_v32  ;;  %v2095_v32 = vld [vmem:[%s3080_s16 + $0x10] sm:$0xff] }
 0x49f   : > { %1600 = vrot.lane.b32.xlu2 %v1592_v33, %s2465_s4  ;;  %1596 = vrot.lane.b32.xlu1 %v1590_v54, %s2466_s27  ;;  %s3126_s27 = sld [smem:[#allocation31_spill]]  ;;  %s2375_s4 = sshra.s32 %s1875_s6, 4  ;;  %s2376_s4 = int_to_ptr.hbm [resolvable:$true] %s2375_s4 }
 0x4a0   : > { %v1588_v35 = vsel %vm853_vm6, %v1587_v34, %v1570_v29  ;;  %v2094_v34 = vld [vmem:[%s3080_s16 + $0x8] sm:$0xff]  ;;  %s2377_s18 = scalar_lea.hbm %s2376_s4, 8  ;;  %p2382_p11 = scmp.lt.s32.totalorder %s2376_s4, %s3127_s30 }
 0x4a1   : > { %1816 = vmatpush.bf16.msrb.mxu1 %v2095_v32  ;;  %p2378_p1 = scmp.ne.s32.totalorder %s2376_s4, %s2377_s18  ;;  %p2383_p12 = scmp.lt.s32.totalorder %s2381_s14, %s2377_s18 }
 0x4a3   : > { %p2379_p9 = pnand %p2378_p1, %p2663_p4  ;;  %p2384_p13 = por %p2383_p12, %p2382_p11 }
 0x4a5   : > { %1817 = vmatpush.bf16.msrb.mxu1 %v2094_v34  ;;  %p2380_p10 = pneg %p2379_p9 }
 0x4a7   : > { %p2385_p0 = pnand %p2384_p13, %p2380_p10 }
 0x4a9   : > { %1818 = vmatpush.bf16.msrb.mxu1 %v2093_v37 }
 0x4f9   : > { %v1601_v38 = vpop.permute.xlu2 %1600 }
 0x50f   : > { %v1605_v60 = vpop.permute.xlu0 %1604 }
 0x511   : > { %v1597_v63 = vpop.permute.xlu1 %1596 }
 0x512   : > { %v1607_v40 = vsel %vm1279_vm8, %v1588_v35, %v1597_v63 }
 0x513   : > { %v1609_v41 = vsel %vm1608_vm10, %v1607_v40, %v1601_v38 }
 0x514   : > { %v1611_v42 = vsel %vm1610_vm11, %v1609_v41, %v1605_v60 }
 0x515   : > { %v1612_v44 = vpack.c.bf16 %v1611_v42, %v1611_v42 }
 0x517   : > { %2051 = vmatmul.msk.bf16.vlgmr.msra.gmra.mxu3 %vm732_vm0, %v1612_v44 }
 0x59a   : > { %v1645_v47 = vpop.f32.mrf.mxu3 }
 0x59b   : > { %v1646_v39 = vadd.f32 %v2207_v45, %v1645_v47 }
 0x59d   : > { %v1649_v49 = vadd.f32 %v2240_v48, %v1646_v39 }
 0x59f   : > { %v1652_v50 = vsel %vm732_vm0, %v1649_v49, 0.0 }
 0x5a0   : > { %1653 = vadd.xlane.f32.xlu1 %v1652_v50 }
 0x5a2   : > { %v1647_v52 = vpop.f32.mrf.mxu3 }
 0x613   : > { %v1654_v53 = vpop.xlane.xlu1 %1653 }
 0x614   : > { %v1662_v56 = vmul.f32 %v1654_v53, %v2710_v8 }
 0x616   : > { %v1663_v46 = vsub.f32 %v1649_v49, %v1662_v56 }
 0x618   : > { %v1664_v57 = vmul.f32 %v1663_v46, %v1663_v46 }
 0x61a   : > { %v1665_v58 = vsel %vm732_vm0, %v1664_v57, 0.0 }
 0x61b   : > { %1666 = vadd.xlane.f32.xlu0 %v1665_v58 }
 0x68e   : > { %v1667_v62 = vpop.xlane.xlu0 %1666 }
 0x68f   : > { %v1668_v0 = vmul.f32 %v1667_v62, %v2710_v8 }
 0x691   : > { %v1669_v1 = vadd.f32 1e-12, %v1668_v0  ;;  %v2211_v0 = vld [vmem:[%s3125_s28] ss:$0 sm:$0xff]  ;;  %s3128_s28 = sld [smem:[#allocation32_spill]] }
 0x693   : > { %2234 = vrsqrt.f32 %v1669_v1  ;;  %vm1676_vm13 = vweird.f32 %v1669_v1 }
 0x699   : > { %v2235_v2 = vpop.eup %2234 }
 0x69a   : > { %v1671_v3 = vmul.f32 %v2235_v2, %v1669_v1  ;;  %vm1677_vm12 = vweird.f32 %v2235_v2 }
 0x69b   : > { %vm1678_vm14 = vmor %vm1676_vm13, %vm1677_vm12 }
 0x69c   : > { %v1672_v4 = vmul.f32 %v2235_v2, %v1671_v3 }
 0x69e   : > { %v1673_v5 = vmul.f32 0.5, %v1672_v4 }
 0x6a0   : > { %v1674_v6 = vsub.f32 1.5, %v1673_v5 }
 0x6a2   : > { %v1675_v7 = vmul.f32 %v2235_v2, %v1674_v6 }
 0x6a4   : > { %v1679_v10 = vsel %vm1678_vm14, %v2235_v2, %v1675_v7 }
 0x6a5   : > { %v1680_v12 = vmul.f32 %v1679_v10, %v1663_v46 }
 0x6a7   : > { %v1684_v13 = vmul.f32 %v2208_v9, %v1680_v12 }
 0x6a9   : > { %v2990_v14 = vadd.f32 %v2209_v11, %v1684_v13 }
 0x6ab   : > { %v1689_v15 = vpack.c.bf16 %v2990_v14, %v2990_v14 }
 0x6ad   : > { %2060 = vmatmul.msk.bf16.vlgmr.msrb.gmra.mxu0 %vm732_vm0, %v1689_v15 }
 0x72a   : > { %v1722_v17 = vpop.f32.mrf.mxu0 }
 0x72b   : > { %v1723_v18 = vadd.f32 %v2210_v16, %v1722_v17 }
 0x72d   : > { %v1727_v19 = vmul.f32 0.70710677, %v1723_v18  ;;  %v1726_v58 = vmul.f32 0.5, %v1723_v18 }
 0x72f   : > { %v1728_v20 = vmul.f32 %v1727_v19, %v1727_v19 }
 0x731   : > { %v1729_v21 = vmin.f32 %v1728_v20, 16.0 }
 0x732   : > { %v1724_v22 = vpop.f32.mrf.mxu0 }
 0x733   : > { %v1730_v23 = vmul.f32 2.1237322e-06, %v1729_v21  ;;  %v1741_v24 = vmul.f32 3.8918573e-05, %v1729_v21 }
 0x735   : > { %v1731_v25 = vadd.f32 0.00028619796, %v1730_v23  ;;  %v1742_v26 = vadd.f32 0.001143296, %v1741_v24  ;;  %v2213_v23 = vld [vmem:[%s3128_s28] ss:$0 sm:$0xff] }
 0x737   : > { %v1732_v27 = vmul.f32 %v1731_v25, %v1729_v21  ;;  %v1743_v43 = vmul.f32 %v1742_v26, %v1729_v21 }
 0x739   : > { %v1744_v28 = vadd.f32 0.014752088, %v1743_v43  ;;  %v1733_v29 = vadd.f32 0.0036580483, %v1732_v27 }
 0x73b   : > { %v1745_v55 = vmul.f32 %v1744_v28, %v1729_v21  ;;  %v1734_v51 = vmul.f32 %v1733_v29, %v1729_v21 }
 0x73d   : > { %v1746_v31 = vadd.f32 0.112945676, %v1745_v55  ;;  %v1735_v35 = vadd.f32 0.05243302, %v1734_v51 }
 0x73f   : > { %v1747_v33 = vmul.f32 %v1746_v31, %v1729_v21  ;;  %v1736_v38 = vmul.f32 %v1735_v35, %v1729_v21 }
 0x741   : > { %v1748_v54 = vadd.f32 0.4994258, %v1747_v33  ;;  %v1737_v40 = vadd.f32 0.18741608, %v1736_v38 }
 0x743   : > { %v1749_v36 = vmul.f32 %v1748_v54, %v1729_v21  ;;  %v1738_v41 = vmul.f32 %v1737_v40, %v1729_v21  ;;  %v2212_v21 = vld [vmem:[%s3126_s27] ss:$0 sm:$0xff] }
 0x745   : > { %v1750_v63 = vadd.f32 1.0, %v1749_v36  ;;  %v1739_v47 = vadd.f32 1.1283791, %v1738_v41 }
 0x747   : > { %2236 = vrcp.f32 %v1750_v63  ;;  %v1762_v45 = vand.u32 2147483648, %v1750_v63  ;;  %v1760_v48 = vand.u32 2147483647, %v1750_v63  ;;  %vm1756_vm1 = vweird.f32 %v1750_v63 }
 0x748   : > { %v1740_v52 = vmul.f32 %v1739_v47, %v1727_v19 }
 0x749   : > { %v1763_v50 = vor.u32 1.1754944e-38, %v1762_v45  ;;  %vm1761_vm3 = vcmp.eq.f32.partialorder %v1760_v48, 8.507059e+37 }
 0x74d   : > { %v2237_v60 = vpop.eup %2236 }
 0x74e   : > { %v1752_v42 = vmul.f32 %v2237_v60, %v1750_v63  ;;  %vm1757_vm15 = vweird.f32 %v2237_v60 }
 0x74f   : > { %vm1758_vm2 = vmor %vm1756_vm1, %vm1757_vm15 }
 0x750   : > { %v1753_v44 = vsub.f32 1.0, %v1752_v42 }
 0x752   : > { %v1754_v39 = vmul.f32 %v2237_v60, %v1753_v44 }
 0x754   : > { %v1755_v49 = vadd.f32 %v2237_v60, %v1754_v39 }
 0x756   : > { %v1759_v53 = vsel %vm1758_vm2, %v2237_v60, %v1755_v49 }
 0x757   : > { %v1764_v56 = vsel %vm1761_vm3, %v1763_v50, %v1759_v53 }
 0x758   : > { %v1765_v46 = vmul.f32 %v1764_v56, %v1740_v52 }
 0x75a   : > { %v2061_v57 = vclamps-f32 %v1765_v46, 1.0 }
 0x75c   : > { %v1768_v59 = vadd.f32 1.0, %v2061_v57 }
 0x75e   : > { %v1769_v61 = vmul.f32 %v1768_v59, %v1726_v58 }
 0x760   : > { %v1770_v62 = vpack.c.bf16 %v1769_v61, %v1769_v61 }
 0x762   : > { %2078 = vmatmul.msk.bf16.vlgmr.msrb.gmra.mxu1 %vm1807_vm4, %v1770_v62 }
 0x7df   : > { %v1820_v1 = vpop.f32.mrf.mxu1 }
 0x7e0   : > { %v1821_v2 = vadd.f32 %v2211_v0, %v1820_v1 }
 0x7e2   : > { %v1824_v3 = vadd.f32 %v1821_v2, %v2990_v14 }
 0x7e4   : > { %v1827_v4 = vsel %vm732_vm0, %v1824_v3, 0.0 }
 0x7e5   : > { %1828 = vadd.xlane.f32.xlu2 %v1827_v4 }
 0x7e7   : > { %v1822_v5 = vpop.f32.mrf.mxu1 }
 0x858   : > { %v1829_v6 = vpop.xlane.xlu2 %1828 }
 0x859   : > { %v1830_v7 = vmul.f32 %v1829_v6, %v2710_v8 }
 0x85b   : > { %v1831_v9 = vsub.f32 %v1824_v3, %v1830_v7 }
 0x85d   : > { %v1832_v10 = vmul.f32 %v1831_v9, %v1831_v9 }
 0x85f   : > { %v1833_v11 = vsel %vm732_vm0, %v1832_v10, 0.0 }
 0x860   : > { %1834 = vadd.xlane.f32.xlu1 %v1833_v11 }
 0x8d3   : > { %v1835_v12 = vpop.xlane.xlu1 %1834 }
 0x8d4   : > { %v1836_v13 = vmul.f32 %v1835_v12, %v2710_v8 }
 0x8d6   : > { %v1837_v15 = vadd.f32 1e-12, %v1836_v13 }
 0x8d8   : > { %2238 = vrsqrt.f32 %v1837_v15  ;;  %vm1844_vm6 = vweird.f32 %v1837_v15 }
 0x8de   : > { %v2239_v14 = vpop.eup %2238 }
 0x8df   : > { %v1839_v16 = vmul.f32 %v2239_v14, %v1837_v15  ;;  %vm1845_vm5 = vweird.f32 %v2239_v14 }
 0x8e0   : > { %vm1846_vm7 = vmor %vm1844_vm6, %vm1845_vm5 }
 0x8e1   : > { %v1840_v17 = vmul.f32 %v2239_v14, %v1839_v16 }
 0x8e3   : > { %v1841_v18 = vmul.f32 0.5, %v1840_v17 }
 0x8e5   : > { %v1842_v19 = vsub.f32 1.5, %v1841_v18 }
 0x8e7   : > { %v1843_v20 = vmul.f32 %v2239_v14, %v1842_v19 }
 0x8e9   : > { %v1847_v8 = vsel %vm1846_vm7, %v2239_v14, %v1843_v20 }
 0x8ea   : > { %v1848_v22 = vmul.f32 %v1847_v8, %v1831_v9 }
 0x8ec   : > { %v1852_v24 = vmul.f32 %v2212_v21, %v1848_v22 }
 0x8ee   : > { %v1856_v25 = vadd.f32 %v2213_v23, %v1852_v24 }
 0x8f0   : > { %1857 = vst.msk [vmem:[%s719_s24] sm:$0xff] %vm732_vm0, %v1856_v25 }
 0x8f1   : > { %2388 = shalt.err (!%p2385_p0)
}
 0x8f2   : > { %2111 = dma.vmem_to_hbm [thread:$0]  (%p2663_p4), %s1873_s5, 128, %s1875_s6, %s1859_s10  }
 0x8f3 PF: > { %s3129_s0 = sld [smem:[#allocation18_spill]]  ;;  %p2128_p2 = pnand %p2001_p6, %p2671_p7 }
 0x8f5   : > { %p2129_p5 = pneg %p2128_p2 }
 0x8f9   : > { %s1886_s8 = sand.u32 1, %s3129_s0  }
 0x8fa   : > { %s1887_s26 = scalar_lea.sflag [#allocation7], %s1886_s8 }
 0x8fb   : > { %2426 = dma.done.wait (%p2129_p5), %s1887_s26, 128  }
 0x8fc   : > { %2428 = vsyncadd (%p2129_p5), %s1887_s26, 4294967168  ;;  %s38_s25 = sadd.s32 1, %s2451_s25   ;;  %s3130_s5 = sld [smem:[#allocation19_spill]] }
 0x8fd   : > { %p35_p8 = scmp.ge.s32.totalorder %s38_s25, 4   ;;  %s3131_s1 = smov %s2435_s22 }
 0x8fe   : > { %s3132_s22 = smov %s2439_s23  ;;  %s3133_s23 = smov %s2669_s3 }
 0x8ff   : > { %s3134_s24 = smov %s2447_s2  ;;  %37 = sbr.rel (!%p35_p8) target bundleno = 23 (0x17), region = 166 }
 0x902   : > { %s3135_s2 = smov %s3130_s5 }
 0x904   :  { %1893 = vsyncpa [#allocation6], 1 }
 0x905   :  { %1895 = vsyncpa [#allocation6 + $0x1], 1 }
 0x906   :  { %1896 = vsyncpa [#allocation9], 1 }
 0x907   :  { %1897 = vsyncpa [#allocation12], 1 }
 0x908   :  { %1898 = vsyncpa [#allocation7], 1 }
 0x909   :  { %1900 = vsyncpa [#allocation7 + $0x1], 1 }

// kernel: tpu_custom_call.1
= control target key start
LH: loop header
LB: loop body
LE: loop exit
PB: predicated region body
PF: predicated region fallthrough
CT: control target
= control target key end

     0   :  { %s3064_s0 = inlined_call_operand.vmem [shape: f32[2,8,32], index: 0, kind: input, shape index: {}]   ;;  %s3065_s1 = inlined_call_operand.hbm [shape: f32[2,1,8], index: 1, kind: input, shape index: {}]   ;;  %s3066_s2 = inlined_call_operand.vmem [shape: f32[1,32], index: 2, kind: input, shape index: {}]   ;;  %s3067_s3 = inlined_call_operand.vmem [shape: f32[1,32], index: 3, kind: input, shape index: {}]   ;;  %s3068_s4 = inlined_call_operand.vmem [shape: bf16[32,32], index: 4, kind: input, shape index: {}]   ;;  %s3069_s5 = inlined_call_operand.vmem [shape: f32[1,32], index: 5, kind: input, shape index: {}]   ;;  %s3070_s6 = inlined_call_operand.vmem [shape: bf16[32,32], index: 6, kind: input, shape index: {}]   ;;  %s3071_s7 = inlined_call_operand.vmem [shape: f32[1,32], index: 7, kind: input, shape index: {}]   ;;  %s3072_s8 = inlined_call_operand.hbm [shape: bf16[32,32], index: 8, kind: input, shape index: {}]   ;;  %s3073_s9 = inlined_call_operand.vmem [shape: f32[1,32], index: 9, kind: input, shape index: {}]   ;;  %s3074_s10 = inlined_call_operand.hbm [shape: bf16[32,32], index: 10, kind: input, shape index: {}]   ;;  %s3075_s11 = inlined_call_operand.vmem [shape: f32[1,32], index: 11, kind: input, shape index: {}]   ;;  %s3076_s12 = inlined_call_operand.vmem [shape: f32[1,32], index: 12, kind: input, shape index: {}]   ;;  %s3077_s13 = inlined_call_operand.vmem [shape: f32[1,32], index: 13, kind: input, shape index: {}]   ;;  %s3078_s14 = inlined_call_operand.hbm [shape: bf16[32,64], index: 14, kind: input, shape index: {}]   ;;  %s3079_s15 = inlined_call_operand.vmem [shape: f32[1,64], index: 15, kind: input, shape index: {}]   ;;  %s3080_s16 = inlined_call_operand.vmem [shape: bf16[64,32], index: 16, kind: input, shape index: {}]   ;;  %s3081_s17 = inlined_call_operand.vmem [shape: f32[1,32], index: 17, kind: input, shape index: {}]   ;;  %s3082_s18 = inlined_call_operand.vmem [shape: f32[1,32], index: 18, kind: input, shape index: {}]   ;;  %s3083_s19 = inlined_call_operand.vmem [shape: f32[1,32], index: 19, kind: input, shape index: {}]   ;;  %s3084_s20 = inlined_call_operand.hbm [shape: f32[2,8,32], index: 20, kind: output, shape index: {}]  }
   0x1   :  { %3090 = sst [smem:[#allocation20_spill]] %s3064_s0 }
   0x2   :  { %3091 = sst [smem:[#allocation21_spill]] %s3065_s1 }
   0x3   :  { %3092 = sst [smem:[#allocation22_spill]] %s3066_s2 }
   0x4   :  { %3093 = sst [smem:[#allocation23_spill]] %s3067_s3 }
   0x5   :  { %3094 = sst [smem:[#allocation24_spill]] %s3068_s4 }
   0x6   :  { %3095 = sst [smem:[#allocation25_spill]] %s3069_s5 }
   0x7   :  { %3096 = sst [smem:[#allocation26_spill]] %s3070_s6 }
   0x8   :  { %3097 = sst [smem:[#allocation27_spill]] %s3072_s8 }
   0x9   :  { %3098 = sst [smem:[#allocation28_spill]] %s3074_s10 }
   0xa   :  { %3099 = sst [smem:[#allocation29_spill]] %s3078_s14 }
   0xb   :  { %3100 = sst [smem:[#allocation30_spill]] %s3081_s17 }
   0xc   :  { %3101 = sst [smem:[#allocation31_spill]] %s3082_s18 }
   0xd   :  { %3102 = sst [smem:[#allocation32_spill]] %s3083_s19 }
   0xe   :  { %3103 = sst [smem:[#allocation33_spill]] %s3084_s20 }
   0xf   :  { %25 = vsyncpa [#allocation6], 0 }
  0x10   :  { %27 = vsyncpa [#allocation6 + $0x1], 0 }
  0x11   :  { %28 = vsyncpa [#allocation9], 0 }
  0x12   :  { %29 = vsyncpa [#allocation12], 0 }
  0x13   :  { %30 = vsyncpa [#allocation7], 0 }
  0x14   :  { %32 = vsyncpa [#allocation7 + $0x1], 0  ;;  %s2572_s1 = smov 0   ;;  %s2574_s22 = smov 0  }
  0x15   :  { %s2576_s23 = smov 0   ;;  %s2578_s24 = smov 0  }
  0x16   :  { %s2580_s2 = smov 0   ;;  %s2582_s25 = smov 0  }
  0x17 LB: > { %3104 = sst [smem:[#allocation18_spill]] %s2431_s1  ;;  %s3086_s3 = sadd.s32 4294967295, %s2451_s25   ;;  %s2451_s25 = sphi %s2582_s25, %s38_s25   ;;  %s2447_s2 = sphi %s2580_s2, %s3135_s2   ;;  %s2443_s24 = sphi %s2578_s24, %s3134_s24   ;;  %s2439_s23 = sphi %s2576_s23, %s3133_s23   ;;  %s2435_s22 = sphi %s2574_s22, %s3132_s22   ;;  %s2431_s1 = sphi %s2572_s1, %s3131_s1  }
  0x18   : > { %p1997_p0 = scmp.ge.s32.totalorder %s2451_s25, 1  ;;  %p2606_p1 = scmp.eq.s32.totalorder %s3086_s3, 0 }
  0x19   : > { %p513_p2 = scmp.lt.s32.totalorder %s2451_s25, 3  ;;  %s3106_s8 = sld [smem:[#allocation27_spill]] }
  0x1a   : > { %s2453_s30 = smov [#allocation8]   ;;  %p2001_p6 = scmp.ge.s32.totalorder %s2451_s25, 2 }
  0x1b   : > { %p2614_p3 = pnand %p1997_p0, %p513_p2  ;;  %s544_s0 = sshll.u32 %s2453_s30, 4  ;;  %s545_s0 = int_to_ptr.vmem [resolvable:$true] %s544_s0 }
  0x1c   : > { %s3109_s10 = sld [smem:[#allocation28_spill]]  ;;  %s2455_s30 = smov 4  }
  0x1d   : > { %p2113_p4 = pneg %p2614_p3  ;;  %s2456_s19 = smov [#allocation10]  }
  0x1e   : > { %s561_s20 = sshll.u32 %s2456_s19, 4  ;;  %s3110_s14 = sld [smem:[#allocation29_spill]]  ;;  %s562_s20 = int_to_ptr.vmem [resolvable:$true] %s561_s20 }
  0x1f   : > { %s542_s4 = sshll.u32 %s3106_s8, 4  ;;  %p2622_p5 = pnand %p2113_p4, %p2606_p1  ;;  %s543_s4 = int_to_ptr.hbm [resolvable:$true] %s542_s4 }
  0x20   : > { %s2454_s8 = smov 64   ;;  %s2457_s28 = smov [#allocation11]  }
  0x21   : > { %2116 = dma.hbm_to_vmem [thread:$0]  (!%p2622_p5), %s543_s4, 256, %s545_s0, [#allocation9], %s2454_s8, %s2454_s8, %s2455_s30  }
  0x22   : > { %s559_s3 = sshll.u32 %s3109_s10, 4  ;;  %s584_s10 = sshll.u32 %s2457_s28, 4  ;;  %s560_s3 = int_to_ptr.hbm [resolvable:$true] %s559_s3  ;;  %s585_s10 = int_to_ptr.vmem [resolvable:$true] %s584_s10 }
  0x23   : > { %2119 = dma.hbm_to_vmem [thread:$0]  (!%p2622_p5), %s560_s3, 256, %s562_s20, [#allocation9], %s2454_s8, %s2454_s8, %s2455_s30  }
  0x24   : > { %s582_s27 = sshll.u32 %s3110_s14, 4  ;;  %s1996_s4 = sadd.s32 4294967294, %s2451_s25   ;;  %s583_s27 = int_to_ptr.hbm [resolvable:$true] %s582_s27 }
  0x25   : > { %2122 = dma.hbm_to_vmem [thread:$0]  (!%p2622_p5), %s583_s27, 256, %s585_s10, [#allocation12], %s2454_s8, %s2454_s8, %s2455_s30  }
  0x26   : > { %s50_s19 = sadd.s32 1, %s2447_s2  ;;  %s83_s0 = sadd.s32 1, %s2439_s23 }
  0x27   : > { %p52_p7 = scmp.ge.s32.totalorder %s50_s19, 2  ;;  %p90_p8 = scmp.ne.s32.totalorder %s2439_s23, %s2435_s22 }
  0x28   : > { %p91_p9 = scmp.eq.s32.totalorder %s2451_s25, 0  ;;  %p96_p10 = scmp.ne.s32.totalorder %s2435_s22, %s2431_s1 }
  0x29   : > { %s3137_s19 = smov (%p52_p7, %s50_s19), 0  ;;  %s3114_s18 = sadd.s32 4294967295, %s2451_s25  }
  0x2a   : > { %3111 = sst [smem:[#allocation19_spill]] %s3137_s19  ;;  %p2649_p11 = por %p91_p9, %p90_p8 }
  0x2b   : > { %p2655_p12 = por %p2606_p1, %p96_p10  ;;  %s80_s10 = ssub.s32 %s2447_s2, %s3137_s19 }
  0x2c   : > { %p500_p13 = scmp.eq.s32.totalorder %s3114_s18, 1  ;;  %p81_p0 = scmp.eq.s32.totalorder %s80_s10, 0 }
  0x2d   : > { %p506_p2 = scmp.eq.s32.totalorder %s1996_s4, 1  ;;  %p2134_p5 = scmp.lt.s32.totalorder %s2451_s25, 2 }
  0x2e   : > { %p2663_p4 = por %p500_p13, %p90_p8  ;;  %s620_s30 = sand.u32 1, %s2439_s23  }
  0x2f   : > { %s2669_s3 = scalar_select %p81_p0, %s2439_s23, %s83_s0  }
  0x30   : > { %p2671_p7 = por %p506_p2, %p96_p10  ;;  %s3117_s14 = sld [smem:[#allocation21_spill]] }
  0x31   : > { %s623_s1 = scalar_lea.vmem [#allocation5], %s620_s30  ;;  %p2124_p8 = pnand %p2134_p5, %p2649_p11 }
  0x32   : > { %s630_s18 = sshll.u32 %s623_s1, 4  ;;  %s621_s4 = scalar_lea.sflag [#allocation6], %s620_s30  ;;  %s631_s18 = int_to_ptr.vmem [resolvable:$true] %s630_s18 }
  0x33   : > { %s2685_s0 = sand.u32 (!%p2614_p3), 1, %s2435_s22  }
  0x34   : > { %639 = sbr.rel (%p2614_p3) target bundleno = 2291 (0x8f3), region = 100  ;;  %s642_s27 = scalar_lea.sflag (!%p2614_p3), [#allocation6], %s2685_s0 }
  0x36   : > { %s626_s19 = scalar_lea.hbm %s3117_s14, %s2447_s2  ;;  %s644_s14 = scalar_lea.vmem (!%p2614_p3), [#allocation5], %s2685_s0 }
  0x37   : > { %s628_s10 = sshll.u32 %s626_s19, 4  ;;  %s629_s10 = int_to_ptr.hbm [resolvable:$true] %s628_s10 }
  0x38   : > { %2126 = dma.hbm_to_vmem [thread:$0]  (!%p2124_p8), %s629_s10, 16, %s631_s18, %s621_s4  }
  0x39   : > { %2414 = dma.done.wait (%p2655_p12), %s642_s27, 16  }
  0x3a   : > { %2416 = vsyncadd (%p2655_p12), %s642_s27, 4294967280 }
  0x3b   : > { %2418 = dma.done.wait (%p2606_p1), [#allocation9], 512  }
  0x3c   : > { %2420 = vsyncadd (%p2606_p1), [#allocation9], 4294966784 }
  0x3d   : > { %2422 = dma.done.wait (%p2606_p1), [#allocation12], 256  }
  0x3e   : > { %2424 = vsyncadd (%p2606_p1), [#allocation12], 4294967040  ;;  %p720_p3 = scmp.lt.s32.totalorder %s2443_s24, 1  ;;  %s3118_s8 = sld [smem:[#allocation20_spill]]  ;;  %vm732_vm0 = vcmask 261120   ;;  %v2458_v2 = vmov 32.0  }
  0x3f   : > { %2214 = vrcp.f32 %v2458_v2  ;;  %s3119_s6 = sld [smem:[#allocation26_spill]]  ;;  %v2086_v15 = vld [vmem:[#allocation8 + $0x8] sm:$0xff]  ;;  %v2085_v17 = vld [vmem:[#allocation8] sm:$0xff]  ;;  %vm771_vm5 = vcmask 257024   ;;  %v2203_v37 = vld [vmem:[%s3071_s7] ss:$0 sm:$0xff] }
  0x40   : > { %s721_s1 = scalar_select %p720_p3, %s2443_s24, 1  ;;  %835 = vmatpush.bf16.msra.mxu1 %v2086_v15  ;;  %v2462_v49 = vmov 1983009808   ;;  %vm853_vm6 = vcmask 1047556   ;;  %v2463_v57 = vmov 1934713408  }
  0x41   : > { %s3122_s28 = sld [smem:[#allocation22_spill]]  ;;  %s2459_s19 = smov 104   ;;  %v858_v50 = vunpack.c.l.s4 %v2462_v49  ;;  %v882_v58 = vunpack.c.l.s4 %v2463_v57  ;;  %vm967_vm7 = vcmask 60416   ;;  %vm1279_vm8 = vcmask 64512  }
  0x42   : > { %s2007_s29 = sshll.u32 %s721_s1, 3  ;;  %s3120_s1 = sld [smem:[#allocation24_spill]]  ;;  %vm1411_vm9 = vcmask 1043456   ;;  %vm1608_vm10 = vcmask 130048   ;;  %vm1610_vm11 = vcmask 195584  }
  0x43   : > { %s3123_s4 = sld [smem:[#allocation23_spill]]  ;;  %s2460_s17 = smov 120   ;;  %v2756_v55 = vunpack.c.0.s8 %v858_v50  ;;  %v2761_v63 = vunpack.c.0.s8 %v882_v58 }
  0x44   : > { %s2706_s30 = scalar_lea.vmem %s3118_s8, %s2007_s29  ;;  %836 = vmatpush.bf16.msra.mxu1 %v2085_v17  ;;  %s2461_s8 = smov 112  }
  0x45   : > { %v729_v0 = vld [vmem:[%s2706_s30] sm:$0xff]  ;;  %v2215_v3 = vpop.eup %2214  ;;  %v2084_v14 = vld [vmem:[%s3119_s6 + $0x8] sm:$0xff]  ;;  %s3124_s5 = sld [smem:[#allocation25_spill]]  ;;  %s2464_s10 = smov 24  }
  0x46   : > { %v733_v1 = vsel %vm732_vm0, %v729_v0, 0.0  ;;  %v737_v4 = vmul.f32 32.0, %v2215_v3  ;;  %vm741_vm1 = vweird.f32 %v2215_v3  ;;  %802 = vmatpush.bf16.msra.mxu0 %v2084_v14  ;;  %v2083_v16 = vld [vmem:[%s3119_s6] sm:$0xff]  ;;  %s2466_s27 = smov 8   ;;  %s2080_s18 = sshll.u32 %s2443_s24, 3 }
  0x47   : > { %734 = vadd.xlane.f32.xlu0 %v733_v1  ;;  %v2201_v29 = vld [vmem:[%s3122_s28] ss:$0 sm:$0xff]  ;;  %s3125_s28 = sld [smem:[#allocation30_spill]] }
  0x48   : > { %v738_v5 = vsub.f32 1.0, %v737_v4  ;;  %s3121_s29 = smov %s3120_s1  ;;  %v2088_v18 = vld [vmem:[%s3120_s1 + $0x8] sm:$0xff] }
  0x49   : > { %1138 = vmatpush.bf16.msra.mxu2 %v2088_v18  ;;  %v2087_v20 = vld [vmem:[%s3121_s29] sm:$0xff] }
  0x4a   : > { %v739_v6 = vmul.f32 %v2215_v3, %v738_v5  ;;  %803 = vmatpush.bf16.msra.mxu0 %v2083_v16  ;;  %v2202_v32 = vld [vmem:[%s3123_s4] ss:$0 sm:$0xff]  ;;  %s2465_s4 = smov 16  }
  0x4b   : > { %v2205_v43 = vld [vmem:[%s3124_s5] ss:$0 sm:$0xff] }
  0x4c   : > { %v740_v7 = vadd.f32 %v2215_v3, %v739_v6 }
  0x4d   : > { %1139 = vmatpush.bf16.msra.mxu2 %v2087_v20 }
  0x4e   : > { %v2710_v8 = vsel %vm741_vm1, %v2215_v3, %v740_v7 }
  0xba   : > { %v735_v9 = vpop.xlane.xlu0 %734 }
  0xbb   : > { %v743_v10 = vmul.f32 %v2710_v8, %v735_v9 }
  0xbd   : > { %v744_v11 = vsub.f32 %v729_v0, %v743_v10 }
  0xbf   : > { %v745_v12 = vmul.f32 %v744_v11, %v744_v11 }
  0xc1   : > { %v746_v13 = vsel %vm732_vm0, %v745_v12, 0.0 }
  0xc2   : > { %747 = vadd.xlane.f32.xlu0 %v746_v13 }
 0x135   : > { %v748_v19 = vpop.xlane.xlu0 %747 }
 0x136   : > { %v749_v21 = vmul.f32 %v748_v19, %v2710_v8 }
 0x138   : > { %v750_v22 = vadd.f32 1e-12, %v749_v21 }
 0x13a   : > { %2216 = vrsqrt.f32 %v750_v22  ;;  %vm757_vm3 = vweird.f32 %v750_v22 }
 0x140   : > { %v2217_v23 = vpop.eup %2216 }
 0x141   : > { %v752_v24 = vmul.f32 %v2217_v23, %v750_v22  ;;  %vm758_vm2 = vweird.f32 %v2217_v23 }
 0x142   : > { %vm759_vm4 = vmor %vm757_vm3, %vm758_vm2 }
 0x143   : > { %v753_v25 = vmul.f32 %v2217_v23, %v752_v24 }
 0x145   : > { %v754_v26 = vmul.f32 0.5, %v753_v25 }
 0x147   : > { %v755_v27 = vsub.f32 1.5, %v754_v26 }
 0x149   : > { %v756_v28 = vmul.f32 %v2217_v23, %v755_v27 }
 0x14b   : > { %v760_v30 = vsel %vm759_vm4, %v2217_v23, %v756_v28  ;;  %vm1807_vm4 = vcmask 523264  }
 0x14c   : > { %v761_v31 = vmul.f32 %v760_v30, %v744_v11 }
 0x14e   : > { %v765_v33 = vmul.f32 %v2201_v29, %v761_v31 }
 0x150   : > { %v769_v34 = vadd.f32 %v2202_v32, %v765_v33 }
 0x152   : > { %v770_v35 = vpack.c.bf16 %v769_v34, %v769_v34 }
 0x154   : > { %772 = vst.msk [vmem:[#allocation2] sm:$0xf] %vm771_vm5, %v770_v35  ;;  %2016 = vmatmul.msk.bf16.vlgmr.msra.gmra.mxu0 %vm732_vm0, %v770_v35  ;;  %2025 = vmatmul.msk.bf16.vlgmr.msra.gmra.mxu1 %vm732_vm0, %v770_v35 }
 0x15b   : > { %v1107_v36 = vld [vmem:[#allocation2] sm:$0xf] }
 0x15c   : > { %2034 = vmatmul.msk.bf16.vlgmr.msra.gmra.mxu2 %vm732_vm0, %v1107_v36 }
 0x1d1   : > { %v805_v38 = vpop.f32.mrf.mxu0  ;;  %v2739_v39 = vpop.f32.mrf.mxu1 }
 0x1d2   : > { %v806_v40 = vadd.f32 %v2203_v37, %v805_v38 }
 0x1d4   : > { %849 = vrot.lane.b32.xlu2 %v806_v40, %s2459_s19  ;;  %843 = vrot.lane.b32.xlu1 %v806_v40, %s2460_s17  ;;  %v855_v60 = vrot.slane %v806_v40, 4 }
 0x1d9   : > { %v807_v41 = vpop.f32.mrf.mxu0  ;;  %v840_v42 = vpop.f32.mrf.mxu1 }
 0x1dc   : > { %846 = vrot.lane.b32.xlu1 %v806_v40, %s2461_s8 }
 0x1df   : > { %v1141_v44 = vpop.f32.mrf.mxu2 }
 0x1e0   : > { %v1142_v45 = vadd.f32 %v2205_v43, %v1141_v44 }
 0x1e2   : > { %v2747_v46 = vmul.f32 0.35355338, %v1142_v45 }
 0x1e4   : > { %1153 = vrot.lane.b32.xlu1 %v2747_v46, %s2459_s19  ;;  %1150 = vrot.lane.b32.xlu0 %v2747_v46, %s2461_s8  ;;  %v1159_v22 = vrot.slane %v2747_v46, 4 }
 0x1e5   : > { %1147 = vrot.lane.b32.xlu2 %v2747_v46, %s2460_s17 }
 0x1e7   : > { %v1143_v47 = vpop.f32.mrf.mxu2 }
 0x22e   : > { %v850_v48 = vpop.permute.xlu2 %849 }
 0x22f   : > { %v865_v53 = vrot.slane %v850_v48, 4 }
 0x23f   : > { %v1148_v10 = vpop.permute.xlu2 %1147 }
 0x240   : > { %v1171_v18 = vrot.slane %v1148_v10, 4 }
 0x246   : > { %v844_v51 = vpop.permute.xlu1 %843 }
 0x247   : > { %v867_v52 = vrot.slane %v844_v51, 4  ;;  %v866_v56 = vsel %vm853_vm6, %v865_v53, %v844_v51 }
 0x248   : > { %v872_v61 = vperm.slane %v866_v56, %v2756_v55 }
 0x249   : > { %v868_v54 = vsel %vm853_vm6, %v850_v48, %v867_v52 }
 0x24a   : > { %v876_v59 = vperm.slane %v868_v54, %v2756_v55  ;;  %v877_v5 = vrot.slane %v872_v61, 4 }
 0x24c   : > { %v889_v2 = vrot.slane %v876_v59, 4 }
 0x24e   : > { %v847_v62 = vpop.permute.xlu1 %846 }
 0x24f   : > { %v852_v0 = vrot.slane %v847_v62, 4  ;;  %v856_v1 = vsel %vm853_vm6, %v847_v62, %v855_v60 }
 0x250   : > { %v864_v3 = vperm.slane %v856_v1, %v2756_v55 }
 0x251   : > { %v854_v4 = vsel %vm853_vm6, %v852_v0, %v806_v40 }
 0x252   : > { %v860_v6 = vperm.slane %v854_v4, %v2756_v55  ;;  %v890_v7 = vsel %vm853_vm6, %v889_v2, %v864_v3  ;;  %v891_v9 = vrot.slane %v864_v3, 4 }
 0x253   : > { %v896_v11 = vperm.slane %v890_v7, %v2761_v63 }
 0x254   : > { %v878_v12 = vsel %vm853_vm6, %v877_v5, %v860_v6  ;;  %v879_v13 = vrot.slane %v860_v6, 4  ;;  %v892_v14 = vsel %vm853_vm6, %v876_v59, %v891_v9 }
 0x255   : > { %v884_v15 = vperm.slane %v878_v12, %v2761_v63  ;;  %v900_v16 = vperm.slane %v892_v14, %v2761_v63  ;;  %v905_v17 = vrot.slane %v896_v11, 4 }
 0x256   : > { %v880_v19 = vsel %vm853_vm6, %v872_v61, %v879_v13  ;;  %v1154_v20 = vpop.permute.xlu1 %1153  ;;  %v1151_v21 = vpop.permute.xlu0 %1150 }
 0x257   : > { %v888_v23 = vperm.slane %v880_v19, %v2761_v63  ;;  %v901_v24 = vrot.slane %v884_v15, 4  ;;  %v906_v25 = vsel %vm853_vm6, 0.0, %v905_v17  ;;  %v907_v26 = vrot.slane %v900_v16, 4 }
 0x258   : > { %v1169_v27 = vrot.slane %v1154_v20, 4  ;;  %v1172_v28 = vsel %vm853_vm6, %v1154_v20, %v1171_v18  ;;  %v1156_v29 = vrot.slane %v1151_v21, 4  ;;  %v1160_v30 = vsel %vm853_vm6, %v1151_v21, %v1159_v22 }
 0x259   : > { %v902_v31 = vsel %vm853_vm6, 0.0, %v901_v24  ;;  %v903_v32 = vrot.slane %v888_v23, 4  ;;  %v908_v33 = vsel %vm853_vm6, 0.0, %v907_v26  ;;  %v920_v34 = vsel %vm853_vm6, %v907_v26, %v896_v11 }
 0x25a   : > { %v924_v35 = vperm.slane %v920_v34, %v2756_v55  ;;  %v925_v36 = vrot.slane %v908_v33, 4  ;;  %v1170_v37 = vsel %vm853_vm6, %v1169_v27, %v1148_v10  ;;  %v1180_v38 = vperm.slane %v1172_v28, %v2756_v55 }
 0x25b   : > { %v904_v40 = vsel %vm853_vm6, 0.0, %v903_v32  ;;  %v909_v41 = vsel %vm853_vm6, %v903_v32, %v884_v15  ;;  %v1176_v42 = vperm.slane %v1170_v37, %v2756_v55  ;;  %v1158_v43 = vsel %vm853_vm6, %v1156_v29, %v2747_v46 }
 0x25c   : > { %v913_v44 = vperm.slane %v909_v41, %v2756_v55  ;;  %v914_v45 = vrot.slane %v904_v40, 4  ;;  %v926_v47 = vsel %vm853_vm6, %v925_v36, %v906_v25  ;;  %v945_v48 = vrot.slane %v924_v35, 4 }
 0x25d   : > { %v930_v49 = vperm.slane %v926_v47, %v2756_v55  ;;  %v1181_v50 = vrot.slane %v1176_v42, 4  ;;  %v1193_v51 = vrot.slane %v1180_v38, 4  ;;  %v1164_v52 = vperm.slane %v1158_v43, %v2756_v55 }
 0x25e   : > { %v915_v53 = vsel %vm853_vm6, %v914_v45, %v902_v31  ;;  %v933_v54 = vrot.slane %v913_v44, 4  ;;  %v1168_v56 = vperm.slane %v1160_v30, %v2756_v55 }
 0x25f   : > { %v919_v46 = vperm.slane %v915_v53, %v2756_v55  ;;  %v943_v57 = vrot.slane %v930_v49, 4  ;;  %v946_v58 = vsel %vm853_vm6, %v930_v49, %v945_v48  ;;  %v1182_v59 = vsel %vm853_vm6, %v1181_v50, %v1164_v52 }
 0x260   : > { %v954_v60 = vperm.slane %v946_v58, %v2761_v63  ;;  %v1183_v61 = vrot.slane %v1164_v52, 4  ;;  %v1188_v62 = vperm.slane %v1182_v59, %v2761_v63  ;;  %v1194_v0 = vsel %vm853_vm6, %v1193_v51, %v1168_v56 }
 0x261   : > { %v931_v1 = vrot.slane %v919_v46, 4  ;;  %v934_v2 = vsel %vm853_vm6, %v919_v46, %v933_v54  ;;  %v944_v3 = vsel %vm853_vm6, %v943_v57, %v924_v35  ;;  %v1195_v4 = vrot.slane %v1168_v56, 4 }
 0x262   : > { %v942_v5 = vperm.slane %v934_v2, %v2761_v63  ;;  %v950_v6 = vperm.slane %v944_v3, %v2761_v63  ;;  %v959_v7 = vrot.slane %v954_v60, 4  ;;  %v1184_v9 = vsel %vm853_vm6, %v1176_v42, %v1183_v61 }
 0x263   : > { %v932_v10 = vsel %vm853_vm6, %v931_v1, %v913_v44  ;;  %v1192_v11 = vperm.slane %v1184_v9, %v2761_v63  ;;  %v1196_v12 = vsel %vm853_vm6, %v1180_v38, %v1195_v4  ;;  %v1200_v13 = vperm.slane %v1194_v0, %v2761_v63 }
 0x264   : > { %v938_v14 = vperm.slane %v932_v10, %v2761_v63  ;;  %v955_v15 = vrot.slane %v950_v6, 4  ;;  %v960_v16 = vsel %vm853_vm6, %v959_v7, %v942_v5  ;;  %v961_v17 = vrot.slane %v942_v5, 4 }
 0x265   : > { %v965_v18 = vpack.c.bf16 %v960_v16, %v960_v16  ;;  %v1204_v19 = vperm.slane %v1196_v12, %v2761_v63  ;;  %v1207_v20 = vrot.slane %v1192_v11, 4  ;;  %v1205_v24 = vrot.slane %v1188_v62, 4 }
 0x266   : > { %v956_v21 = vsel %vm853_vm6, %v955_v15, %v938_v14  ;;  %v957_v22 = vrot.slane %v938_v14, 4  ;;  %v962_v23 = vsel %vm853_vm6, %v954_v60, %v961_v17  ;;  %v1209_v29 = vrot.slane %v1200_v13, 4  ;;  %v2206_v17 = vld [vmem:[%s644_s14] ss:$0 sm:$0xff]  ;;  %s2006_s14 = sshll.u32 %s2685_s0, 3 }
 0x267   : > { %v963_v25 = vpack.c.bf16 %v956_v21, %v956_v21  ;;  %v966_v26 = vpack.c.bf16 %v962_v23, %v962_v23  ;;  %970 = vst.msk [vmem:[#allocation3 + $0x8] sm:$0xf] %vm967_vm7, %v965_v18  ;;  %v1208_v27 = vsel %vm853_vm6, 0.0, %v1207_v20  ;;  %v1211_v30 = vrot.slane %v1204_v19, 4  ;;  %s719_s24 = scalar_lea.vmem [#allocation13], %s2006_s14 }
 0x268   : > { %v958_v28 = vsel %vm853_vm6, %v950_v6, %v957_v22  ;;  %v1213_v31 = vsel %vm853_vm6, %v1207_v20, %v1188_v62  ;;  %v1218_v34 = vrot.slane %v1208_v27, 4  ;;  %v1206_v35 = vsel %vm853_vm6, 0.0, %v1205_v24  ;;  %s1872_s5 = sshll.u32 %s719_s24, 4  ;;  %s1873_s5 = int_to_ptr.vmem [resolvable:$true] %s1872_s5 }
 0x269   : > { %v964_v32 = vpack.c.bf16 %v958_v28, %v958_v28  ;;  %968 = vst.msk [vmem:[#allocation3] sm:$0xf] %vm967_vm7, %v963_v25  ;;  %v1217_v33 = vperm.slane %v1213_v31, %v2756_v55  ;;  %v1212_v36 = vsel %vm853_vm6, 0.0, %v1211_v30  ;;  %v1224_v37 = vsel %vm853_vm6, %v1211_v30, %v1200_v13 }
 0x26a   : > { %971 = vst.msk [vmem:[#allocation3 + $0xc] sm:$0xf] %vm967_vm7, %v966_v26  ;;  %v1228_v38 = vperm.slane %v1224_v37, %v2756_v55  ;;  %v1229_v40 = vrot.slane %v1212_v36, 4  ;;  %v1219_v41 = vsel %vm853_vm6, %v1218_v34, %v1206_v35  ;;  %v1210_v43 = vsel %vm853_vm6, 0.0, %v1209_v29  ;;  %v2204_v34 = vld [vmem:[%s3073_s9] ss:$0 sm:$0xff] }
 0x26b   : > { %969 = vst.msk [vmem:[#allocation3 + $0x4] sm:$0xf] %vm967_vm7, %v964_v32  ;;  %v1237_v42 = vrot.slane %v1217_v33, 4  ;;  %v1223_v44 = vperm.slane %v1219_v41, %v2756_v55  ;;  %v839_v35 = vadd.f32 %v2204_v34, %v2739_v39 }
 0x26c   : > { %v1230_v45 = vsel %vm853_vm6, %v1229_v40, %v1210_v43  ;;  %v1249_v47 = vrot.slane %v1228_v38, 4 }
 0x26d   : > { %v1234_v48 = vperm.slane %v1230_v45, %v2756_v55  ;;  %v1238_v50 = vsel %vm853_vm6, %v1223_v44, %v1237_v42  ;;  %v1235_v51 = vrot.slane %v1223_v44, 4 }
 0x26e   : > { %v1273_v49 = vld [vmem:[#allocation3 + $0x8] sm:$0xf]  ;;  %v1246_v53 = vperm.slane %v1238_v50, %v2761_v63 }
 0x26f   : > { %v1322_v52 = vsel %vm1279_vm8, %v1273_v49, 0  ;;  %v1250_v56 = vsel %vm853_vm6, %v1234_v48, %v1249_v47  ;;  %v1236_v46 = vsel %vm853_vm6, %v1235_v51, %v1217_v33  ;;  %v1247_v57 = vrot.slane %v1234_v48, 4 }
 0x270   : > { %1331 = vmatpush.bf16.xpose.msrb.mxu1 %v1322_v52  ;;  %v1271_v54 = vld [vmem:[#allocation3] sm:$0xf]  ;;  %v1258_v60 = vperm.slane %v1250_v56, %v2761_v63  ;;  %v1242_v61 = vperm.slane %v1236_v46, %v2761_v63  ;;  %v1265_v62 = vrot.slane %v1246_v53, 4 }
 0x271   : > { %v1284_v58 = vsel %vm1279_vm8, %v1271_v54, 0  ;;  %v1274_v59 = vld [vmem:[#allocation3 + $0xc] sm:$0xf]  ;;  %v1248_v2 = vsel %vm853_vm6, %v1247_v57, %v1228_v38 }
 0x272   : > { %1293 = vmatpush.bf16.xpose.msra.mxu3 %v1284_v58  ;;  %v1341_v0 = vsel %vm1279_vm8, %v1274_v59, 0  ;;  %v1272_v1 = vld [vmem:[#allocation3 + $0x4] sm:$0xf]  ;;  %v1263_v4 = vrot.slane %v1258_v60, 4  ;;  %v1254_v5 = vperm.slane %v1248_v2, %v2761_v63  ;;  %v1261_v6 = vrot.slane %v1242_v61, 4 }
 0x273   : > { %1350 = vmatpush.bf16.xpose.msrb.mxu2 %v1341_v0  ;;  %v1303_v3 = vsel %vm1279_vm8, %v1272_v1, 0  ;;  %v1266_v10 = vsel %vm853_vm6, %v1258_v60, %v1265_v62  ;;  %v984_v0 = vrot.slane %v839_v35, 4 }
 0x274   : > { %1312 = vmatpush.bf16.xpose.msrb.mxu0 %v1303_v3  ;;  %v1264_v7 = vsel %vm853_vm6, %v1263_v4, %v1246_v53  ;;  %v1259_v9 = vrot.slane %v1254_v5, 4  ;;  %v1262_v12 = vsel %vm853_vm6, %v1254_v5, %v1261_v6  ;;  %v1270_v15 = vpack.c.bf16 %v1266_v10, %v1266_v10 }
 0x275   : > { %v1269_v11 = vpack.c.bf16 %v1264_v7, %v1264_v7  ;;  %v1268_v16 = vpack.c.bf16 %v1262_v12, %v1262_v12 }
 0x276   : > { %v1260_v13 = vsel %vm853_vm6, %v1259_v9, %v1242_v61 }
 0x277   : > { %2037 = vmatmul.msk.bf16.vlgmr.msrb.gmra.mxu1 %vm1279_vm8, %v1269_v11  ;;  %v1267_v14 = vpack.c.bf16 %v1260_v13, %v1260_v13 }
 0x279   : > { %2035 = vmatmul.msk.bf16.vlgmr.msra.gmra.mxu3 %vm1279_vm8, %v1267_v14 }
 0x27a   : > { %2038 = vmatmul.msk.bf16.vlgmr.msrb.gmra.mxu2 %vm1279_vm8, %v1270_v15 }
 0x27b   : > { %2036 = vmatmul.msk.bf16.vlgmr.msrb.gmra.mxu0 %vm1279_vm8, %v1268_v16 }
 0x2f4   : > { %v1333_v18 = vpop.f32.mrf.mxu1 }
 0x2f5   : > { %v1334_v19 = vadd.f32 %v2206_v17, %v1333_v18 }
 0x2f7   : > { %v1362_v20 = vsel %vm1279_vm8, %v1334_v19, -inf }
 0x2f8   : > { %v1314_v21 = vpop.f32.mrf.mxu0  ;;  %1363 = vmax.xlane.f32.xlu0 %v1362_v20 }
 0x2f9   : > { %v1315_v22 = vadd.f32 %v2206_v17, %v1314_v21 }
 0x2fb   : > { %v1359_v23 = vsel %vm1279_vm8, %v1315_v22, -inf }
 0x2fc   : > { %1360 = vmax.xlane.f32.xlu2 %v1359_v23  ;;  %v1335_v24 = vpop.f32.mrf.mxu1  ;;  %v1295_v27 = vpop.f32.mrf.mxu3 }
 0x2fd   : > { %v1352_v25 = vpop.f32.mrf.mxu2  ;;  %v1296_v28 = vadd.f32 %v2206_v17, %v1295_v27 }
 0x2fe   : > { %v1353_v26 = vadd.f32 %v2206_v17, %v1352_v25 }
 0x2ff   : > { %v1356_v31 = vsel %vm1279_vm8, %v1296_v28, -inf }
 0x300   : > { %v1365_v29 = vsel %vm1279_vm8, %v1353_v26, -inf  ;;  %v1316_v30 = vpop.f32.mrf.mxu0 }
 0x301   : > { %1366 = vmax.xlane.f32.xlu1 %v1365_v29 }
 0x304   : > { %1357 = vmax.xlane.f32.xlu2 %v1356_v31  ;;  %v1297_v33 = vpop.f32.mrf.mxu3 }
 0x305   : > { %v1354_v32 = vpop.f32.mrf.mxu2 }
 0x30c   : > { %979 = vrot.lane.b32.xlu0 %v839_v35, %s2459_s19 }
 0x31a   : > { %976 = vrot.lane.b32.xlu1 %v839_v35, %s2461_s8 }
 0x31c   : > { %973 = vrot.lane.b32.xlu2 %v839_v35, %s2460_s17 }
 0x36b   : > { %v1364_v36 = vpop.xlane.xlu0 %1363 }
 0x36c   : > { %v1370_v37 = vsub.f32 %v1334_v19, %v1364_v36 }
 0x36e   : > { %v1376_v38 = vmul.f32 1.442695, %v1370_v37 }
 0x36f   : > { %v1361_v40 = vpop.xlane.xlu2 %1360 }
 0x370   : > { %2218 = vpow2.f32 %v1376_v38  ;;  %v1369_v48 = vsub.f32 %v1315_v22, %v1361_v40 }
 0x372   : > { %v1374_v50 = vmul.f32 1.442695, %v1369_v48 }
 0x374   : > { %v1367_v41 = vpop.xlane.xlu1 %1366 }
 0x375   : > { %v1371_v42 = vsub.f32 %v1353_v26, %v1367_v41 }
 0x376   : > { %v2866_v43 = vpop.eup %2218 }
 0x377   : > { %v1378_v44 = vmul.f32 1.442695, %v1371_v42  ;;  %v1358_v45 = vpop.xlane.xlu2 %1357  ;;  %v1386_v39 = vsel %vm1279_vm8, %v2866_v43, 0.0 }
 0x378   : > { %v1368_v47 = vsub.f32 %v1296_v28, %v1358_v45  ;;  %1387 = vadd.xlane.f32.xlu0 %v1386_v39 }
 0x379   : > { %2220 = vpow2.f32 %v1378_v44 }
 0x37a   : > { %v1372_v49 = vmul.f32 1.442695, %v1368_v47 }
 0x37c   : > { %2222 = vpow2.f32 %v1372_v49 }
 0x37d   : > { %2224 = vpow2.f32 %v1374_v50 }
 0x37e   : > { %v980_v56 = vpop.permute.xlu0 %979 }
 0x37f   : > { %v2870_v51 = vpop.eup %2220  ;;  %v974_v52 = vpop.permute.xlu2 %973  ;;  %v994_v58 = vrot.slane %v980_v56, 4 }
 0x380   : > { %v1389_v53 = vsel %vm1279_vm8, %v2870_v51, 0.0  ;;  %v996_v46 = vrot.slane %v974_v52, 4 }
 0x381   : > { %1390 = vadd.xlane.f32.xlu1 %v1389_v53  ;;  %v995_v61 = vsel %vm853_vm6, %v994_v58, %v974_v52 }
 0x382   : > { %v2874_v54 = vpop.eup %2222  ;;  %v997_v59 = vsel %vm853_vm6, %v980_v56, %v996_v46  ;;  %v1001_v2 = vperm.slane %v995_v61, %v2756_v55 }
 0x383   : > { %v1380_v57 = vsel %vm1279_vm8, %v2874_v54, 0.0  ;;  %v2879_v60 = vpop.eup %2224  ;;  %v1005_v62 = vperm.slane %v997_v59, %v2756_v55 }
 0x384   : > { %1381 = vadd.xlane.f32.xlu2 %v1380_v57  ;;  %v1383_v1 = vsel %vm1279_vm8, %v2879_v60, 0.0  ;;  %v1006_v10 = vrot.slane %v1001_v2, 4 }
 0x385   : > { %v1018_v6 = vrot.slane %v1005_v62, 4 }
 0x38c   : > { %v977_v3 = vpop.permute.xlu1 %976  ;;  %1384 = vadd.xlane.f32.xlu2 %v1383_v1 }
 0x38d   : > { %v982_v4 = vrot.slane %v977_v3, 4  ;;  %v985_v5 = vsel %vm853_vm6, %v977_v3, %v984_v0 }
 0x38e   : > { %v993_v7 = vperm.slane %v985_v5, %v2756_v55 }
 0x38f   : > { %v983_v9 = vsel %vm853_vm6, %v982_v4, %v839_v35 }
 0x390   : > { %v989_v11 = vperm.slane %v983_v9, %v2756_v55  ;;  %v1019_v12 = vsel %vm853_vm6, %v1018_v6, %v993_v7  ;;  %v1020_v13 = vrot.slane %v993_v7, 4 }
 0x391   : > { %v1025_v14 = vperm.slane %v1019_v12, %v2761_v63 }
 0x392   : > { %v1007_v15 = vsel %vm853_vm6, %v1006_v10, %v989_v11  ;;  %v1008_v16 = vrot.slane %v989_v11, 4  ;;  %v1021_v17 = vsel %vm853_vm6, %v1005_v62, %v1020_v13 }
 0x393   : > { %v1013_v18 = vperm.slane %v1007_v15, %v2761_v63  ;;  %v1029_v19 = vperm.slane %v1021_v17, %v2761_v63  ;;  %v1034_v22 = vrot.slane %v1025_v14, 4 }
 0x394   : > { %v1009_v20 = vsel %vm853_vm6, %v1001_v2, %v1008_v16 }
 0x395   : > { %v1017_v21 = vperm.slane %v1009_v20, %v2761_v63  ;;  %v1036_v23 = vrot.slane %v1029_v19, 4  ;;  %v1030_v24 = vrot.slane %v1013_v18, 4  ;;  %v1035_v31 = vsel %vm853_vm6, 0.0, %v1034_v22 }
 0x397   : > { %v1032_v25 = vrot.slane %v1017_v21, 4  ;;  %v1037_v26 = vsel %vm853_vm6, 0.0, %v1036_v23  ;;  %v1049_v27 = vsel %vm853_vm6, %v1036_v23, %v1025_v14  ;;  %v1031_v37 = vsel %vm853_vm6, 0.0, %v1030_v24 }
 0x398   : > { %v1053_v28 = vperm.slane %v1049_v27, %v2756_v55  ;;  %v1054_v29 = vrot.slane %v1037_v26, 4 }
 0x399   : > { %v1033_v30 = vsel %vm853_vm6, 0.0, %v1032_v25  ;;  %v1038_v32 = vsel %vm853_vm6, %v1032_v25, %v1013_v18 }
 0x39a   : > { %v1042_v33 = vperm.slane %v1038_v32, %v2756_v55  ;;  %v1043_v34 = vrot.slane %v1033_v30, 4  ;;  %v1055_v35 = vsel %vm853_vm6, %v1054_v29, %v1035_v31  ;;  %v1074_v36 = vrot.slane %v1053_v28, 4 }
 0x39b   : > { %v1059_v38 = vperm.slane %v1055_v35, %v2756_v55 }
 0x39c   : > { %v1044_v40 = vsel %vm853_vm6, %v1043_v34, %v1031_v37  ;;  %v1062_v41 = vrot.slane %v1042_v33, 4 }
 0x39d   : > { %v1048_v42 = vperm.slane %v1044_v40, %v2756_v55  ;;  %v1072_v44 = vrot.slane %v1059_v38, 4  ;;  %v1075_v45 = vsel %vm853_vm6, %v1059_v38, %v1074_v36 }
 0x39e   : > { %v1083_v47 = vperm.slane %v1075_v45, %v2761_v63 }
 0x39f   : > { %v1060_v39 = vrot.slane %v1048_v42, 4  ;;  %v1063_v48 = vsel %vm853_vm6, %v1048_v42, %v1062_v41  ;;  %v1073_v49 = vsel %vm853_vm6, %v1072_v44, %v1053_v28 }
 0x3a0   : > { %v1071_v50 = vperm.slane %v1063_v48, %v2761_v63  ;;  %v1079_v52 = vperm.slane %v1073_v49, %v2761_v63  ;;  %v1088_v53 = vrot.slane %v1083_v47, 4 }
 0x3a1   : > { %v1061_v56 = vsel %vm853_vm6, %v1060_v39, %v1042_v33 }
 0x3a2   : > { %v1067_v46 = vperm.slane %v1061_v56, %v2761_v63  ;;  %v1084_v57 = vrot.slane %v1079_v52, 4  ;;  %v1089_v58 = vsel %vm853_vm6, %v1088_v53, %v1071_v50  ;;  %v1090_v59 = vrot.slane %v1071_v50, 4 }
 0x3a3   : > { %v1094_v61 = vpack.c.bf16 %v1089_v58, %v1089_v58 }
 0x3a4   : > { %v1085_v62 = vsel %vm853_vm6, %v1084_v57, %v1067_v46  ;;  %v1086_v0 = vrot.slane %v1067_v46, 4  ;;  %v1091_v1 = vsel %vm853_vm6, %v1083_v47, %v1090_v59 }
 0x3a5   : > { %v1092_v2 = vpack.c.bf16 %v1085_v62, %v1085_v62  ;;  %v1095_v3 = vpack.c.bf16 %v1091_v1, %v1091_v1  ;;  %1098 = vst.msk [vmem:[#allocation4 + $0x8] sm:$0xf] %vm967_vm7, %v1094_v61 }
 0x3a6   : > { %v1087_v4 = vsel %vm853_vm6, %v1079_v52, %v1086_v0 }
 0x3a7   : > { %v1093_v5 = vpack.c.bf16 %v1087_v4, %v1087_v4  ;;  %1096 = vst.msk [vmem:[#allocation4] sm:$0xf] %vm967_vm7, %v1092_v2 }
 0x3a8   : > { %1099 = vst.msk [vmem:[#allocation4 + $0xc] sm:$0xf] %vm967_vm7, %v1095_v3 }
 0x3a9   : > { %1097 = vst.msk [vmem:[#allocation4 + $0x4] sm:$0xf] %vm967_vm7, %v1093_v5 }
 0x3ac   : > { %v1406_v6 = vld [vmem:[#allocation4 + $0x8] sm:$0xf] }
 0x3ad   : > { %v1451_v7 = vsel %vm1411_vm9, %v1406_v6, 0 }
 0x3ae   : > { %1460 = vmatpush.bf16.msra.mxu1 %v1451_v7  ;;  %v1404_v9 = vld [vmem:[#allocation4] sm:$0xf] }
 0x3af   : > { %v1413_v10 = vsel %vm1411_vm9, %v1404_v9, 0  ;;  %v1407_v11 = vld [vmem:[#allocation4 + $0xc] sm:$0xf] }
 0x3b0   : > { %1422 = vmatpush.bf16.msrb.mxu3 %v1413_v10  ;;  %v1470_v12 = vsel %vm1411_vm9, %v1407_v11, 0  ;;  %v1405_v13 = vld [vmem:[#allocation4 + $0x4] sm:$0xf] }
 0x3b1   : > { %1479 = vmatpush.bf16.msra.mxu2 %v1470_v12  ;;  %v1432_v14 = vsel %vm1411_vm9, %v1405_v13, 0 }
 0x3b2   : > { %1441 = vmatpush.bf16.msra.mxu0 %v1432_v14 }
 0x3eb   : > { %v1388_v15 = vpop.xlane.xlu0 %1387 }
 0x3ec   : > { %2226 = vrcp.f32 %v1388_v15 }
 0x3f2   : > { %v2227_v16 = vpop.eup %2226 }
 0x3f3   : > { %v1398_v17 = vmul.f32 %v2227_v16, %v2866_v43 }
 0x3f4   : > { %v1391_v18 = vpop.xlane.xlu1 %1390 }
 0x3f5   : > { %2228 = vrcp.f32 %v1391_v18  ;;  %v1402_v19 = vpack.c.bf16 %v1398_v17, %v1398_v17 }
 0x3f7   : > { %v1382_v20 = vpop.xlane.xlu2 %1381  ;;  %2041 = vmatmul.msk.bf16.vlgmr.msra.gmra.mxu1 %vm1279_vm8, %v1402_v19 }
 0x3f8   : > { %2230 = vrcp.f32 %v1382_v20 }
 0x3fb   : > { %v2229_v21 = vpop.eup %2228 }
 0x3fc   : > { %v1399_v22 = vmul.f32 %v2229_v21, %v2870_v51 }
 0x3fe   : > { %v2231_v23 = vpop.eup %2230  ;;  %v1403_v24 = vpack.c.bf16 %v1399_v22, %v1399_v22 }
 0x3ff   : > { %v1396_v25 = vmul.f32 %v2231_v23, %v2874_v54  ;;  %v1385_v26 = vpop.xlane.xlu2 %1384 }
 0x400   : > { %2042 = vmatmul.msk.bf16.vlgmr.msra.gmra.mxu2 %vm1279_vm8, %v1403_v24  ;;  %2232 = vrcp.f32 %v1385_v26 }
 0x401   : > { %v1400_v27 = vpack.c.bf16 %v1396_v25, %v1396_v25 }
 0x403   : > { %2039 = vmatmul.msk.bf16.vlgmr.msrb.gmra.mxu3 %vm1279_vm8, %v1400_v27 }
 0x406   : > { %v2233_v43 = vpop.eup %2232 }
 0x407   : > { %v1397_v28 = vmul.f32 %v2233_v43, %v2879_v60 }
 0x409   : > { %v1401_v29 = vpack.c.bf16 %v1397_v28, %v1397_v28 }
 0x40b   : > { %2040 = vmatmul.msk.bf16.vlgmr.msra.gmra.mxu0 %vm1279_vm8, %v1401_v29 }
 0x474   : > { %v1462_v30 = vpop.f32.mrf.mxu1 }
 0x475   : > { %v1485_v32 = vrot.slane %v1462_v30, 4 }
 0x47c   : > { %v1464_v31 = vpop.f32.mrf.mxu1 }
 0x483   : > { %v1481_v51 = vpop.f32.mrf.mxu2 }
 0x484   : > { %v1497_v34 = vrot.slane %v1481_v51, 4 }
 0x486   : > { %v1424_v33 = vpop.f32.mrf.mxu3 }
 0x487   : > { %v1486_v54 = vsel %vm853_vm6, %v1485_v32, %v1424_v33  ;;  %v1487_v35 = vrot.slane %v1424_v33, 4 }
 0x488   : > { %v1492_v36 = vperm.slane %v1486_v54, %v2756_v55  ;;  %v1443_v37 = vpop.f32.mrf.mxu0 }
 0x489   : > { %v1488_v38 = vsel %vm853_vm6, %v1462_v30, %v1487_v35  ;;  %v1498_v40 = vsel %vm853_vm6, %v1497_v34, %v1443_v37  ;;  %v1499_v60 = vrot.slane %v1443_v37, 4  ;;  %v2089_v37 = vld [vmem:[#allocation10] sm:$0xff] }
 0x48a   : > { %v1496_v41 = vperm.slane %v1488_v38, %v2756_v55  ;;  %v1511_v42 = vrot.slane %v1492_v36, 4  ;;  %v1504_v44 = vperm.slane %v1498_v40, %v2756_v55 }
 0x48b   : > { %v1500_v45 = vsel %vm853_vm6, %v1481_v51, %v1499_v60  ;;  %v1483_v47 = vpop.f32.mrf.mxu2 }
 0x48c   : > { %v1523_v39 = vrot.slane %v1496_v41, 4  ;;  %v1508_v48 = vperm.slane %v1500_v45, %v2756_v55  ;;  %v1509_v49 = vrot.slane %v1504_v44, 4  ;;  %v1512_v50 = vsel %vm853_vm6, %v1504_v44, %v1511_v42  ;;  %v2207_v45 = vld [vmem:[%s3075_s11] ss:$0 sm:$0xff] }
 0x48d   : > { %v1520_v52 = vperm.slane %v1512_v50, %v2761_v63 }
 0x48e   : > { %v1510_v53 = vsel %vm853_vm6, %v1509_v49, %v1492_v36  ;;  %v1521_v56 = vrot.slane %v1508_v48, 4  ;;  %v1524_v46 = vsel %vm853_vm6, %v1508_v48, %v1523_v39  ;;  %v1426_v57 = vpop.f32.mrf.mxu3  ;;  %v2090_v36 = vld [vmem:[#allocation10 + $0x8] sm:$0xff] }
 0x48f   : > { %v1516_v58 = vperm.slane %v1510_v53, %v2761_v63  ;;  %v1532_v59 = vperm.slane %v1524_v46, %v2761_v63  ;;  %v1535_v61 = vrot.slane %v1520_v52, 4  ;;  %1642 = vmatpush.bf16.msra.mxu3 %v2090_v36  ;;  %v2240_v48 = vld [vmem:[%s2706_s30] sm:$0xff]  ;;  %s3127_s30 = sld [smem:[#allocation33_spill]] }
 0x490   : > { %v1522_v62 = vsel %vm853_vm6, %v1521_v56, %v1496_v41  ;;  %v1445_v0 = vpop.f32.mrf.mxu0 }
 0x491   : > { %v1528_v1 = vperm.slane %v1522_v62, %v2761_v63  ;;  %v1533_v2 = vrot.slane %v1516_v58, 4  ;;  %v1536_v3 = vsel %vm853_vm6, 0.0, %v1535_v61  ;;  %v1539_v4 = vrot.slane %v1532_v59, 4  ;;  %v2092_v59 = vld [vmem:[#allocation11 + $0x8] sm:$0xff] }
 0x492   : > { %v1541_v5 = vsel %vm853_vm6, %v1535_v61, %v1516_v58  ;;  %v1546_v6 = vrot.slane %v1536_v3, 4  ;;  %1719 = vmatpush.bf16.msrb.mxu0 %v2092_v59  ;;  %v2091_v61 = vld [vmem:[#allocation11] sm:$0xff] }
 0x493   : > { %v1534_v7 = vsel %vm853_vm6, 0.0, %v1533_v2  ;;  %v1537_v9 = vrot.slane %v1528_v1, 4  ;;  %v1540_v10 = vsel %vm853_vm6, 0.0, %v1539_v4  ;;  %v1545_v11 = vperm.slane %v1541_v5, %v2756_v55  ;;  %1643 = vmatpush.bf16.msra.mxu3 %v2089_v37  ;;  %v2093_v37 = vld [vmem:[%s3080_s16] sm:$0xff] }
 0x494   : > { %v1557_v12 = vrot.slane %v1540_v10, 4  ;;  %v1547_v13 = vsel %vm853_vm6, %v1546_v6, %v1534_v7  ;;  %v1552_v14 = vsel %vm853_vm6, %v1539_v4, %v1528_v1 }
 0x495   : > { %v1538_v15 = vsel %vm853_vm6, 0.0, %v1537_v9  ;;  %v1551_v16 = vperm.slane %v1547_v13, %v2756_v55  ;;  %v1556_v17 = vperm.slane %v1552_v14, %v2756_v55  ;;  %v1565_v18 = vrot.slane %v1545_v11, 4  ;;  %v2208_v9 = vld [vmem:[%s3076_s12] ss:$0 sm:$0xff]  ;;  %s1870_s17 = scalar_lea.hbm %s3127_s30, %s2080_s18  ;;  %s2381_s14 = scalar_lea.hbm %s3127_s30, 16 }
 0x496   : > { %v1558_v19 = vsel %vm853_vm6, %v1557_v12, %v1538_v15  ;;  %1720 = vmatpush.bf16.msrb.mxu0 %v2091_v61  ;;  %s1874_s6 = sshll.u32 %s1870_s17, 4  ;;  %s1875_s6 = int_to_ptr.hbm [resolvable:$true] %s1874_s6 }
 0x497   : > { %v1562_v20 = vperm.slane %v1558_v19, %v2756_v55  ;;  %v1566_v21 = vsel %vm853_vm6, %v1551_v16, %v1565_v18  ;;  %v1577_v22 = vrot.slane %v1556_v17, 4  ;;  %v1563_v23 = vrot.slane %v1551_v16, 4  ;;  %v2210_v16 = vld [vmem:[%s3079_s15] ss:$0 sm:$0xff] }
 0x498   : > { %v1574_v24 = vperm.slane %v1566_v21, %v2761_v63 }
 0x499   : > { %v1578_v25 = vsel %vm853_vm6, %v1562_v20, %v1577_v22  ;;  %v1564_v26 = vsel %vm853_vm6, %v1563_v23, %v1545_v11  ;;  %v1575_v27 = vrot.slane %v1562_v20, 4  ;;  %v2209_v11 = vld [vmem:[%s3077_s13] ss:$0 sm:$0xff] }
 0x49a   : > { %v1586_v43 = vperm.slane %v1578_v25, %v2761_v63  ;;  %v1593_v28 = vrot.slane %v1574_v24, 4  ;;  %v1570_v29 = vperm.slane %v1564_v26, %v2761_v63 }
 0x49b   : > { %v1576_v30 = vsel %vm853_vm6, %v1575_v27, %v1556_v17 }
 0x49c   : > { %v1594_v55 = vsel %vm853_vm6, %v1586_v43, %v1593_v28  ;;  %v1591_v31 = vrot.slane %v1586_v43, 4  ;;  %v1582_v51 = vperm.slane %v1576_v30, %v2761_v63  ;;  %v1589_v32 = vrot.slane %v1570_v29, 4  ;;  %v2096_v30 = vld [vmem:[%s3080_s16 + $0x18] sm:$0xff] }
 0x49d   : > { %1604 = vrot.lane.b32.xlu0 %v1594_v55, %s2464_s10  ;;  %1815 = vmatpush.bf16.msrb.mxu1 %v2096_v30  ;;  %s1859_s10 = scalar_lea.sflag [#allocation7], %s2685_s0 }
 0x49e   : > { %v1592_v33 = vsel %vm853_vm6, %v1591_v31, %v1574_v24  ;;  %v1587_v34 = vrot.slane %v1582_v51, 4  ;;  %v1590_v54 = vsel %vm853_vm6, %v1582_v51, %v1589_v32  ;;  %v2095_v32 = vld [vmem:[%s3080_s16 + $0x10] sm:$0xff] }
 0x49f   : > { %1600 = vrot.lane.b32.xlu2 %v1592_v33, %s2465_s4  ;;  %1596 = vrot.lane.b32.xlu1 %v1590_v54, %s2466_s27  ;;  %s3126_s27 = sld [smem:[#allocation31_spill]]  ;;  %s2375_s4 = sshra.s32 %s1875_s6, 4  ;;  %s2376_s4 = int_to_ptr.hbm [resolvable:$true] %s2375_s4 }
 0x4a0   : > { %v1588_v35 = vsel %vm853_vm6, %v1587_v34, %v1570_v29  ;;  %v2094_v34 = vld [vmem:[%s3080_s16 + $0x8] sm:$0xff]  ;;  %s2377_s18 = scalar_lea.hbm %s2376_s4, 8  ;;  %p2382_p11 = scmp.lt.s32.totalorder %s2376_s4, %s3127_s30 }
 0x4a1   : > { %1816 = vmatpush.bf16.msrb.mxu1 %v2095_v32  ;;  %p2378_p1 = scmp.ne.s32.totalorder %s2376_s4, %s2377_s18  ;;  %p2383_p12 = scmp.lt.s32.totalorder %s2381_s14, %s2377_s18 }
 0x4a3   : > { %p2379_p9 = pnand %p2378_p1, %p2663_p4  ;;  %p2384_p13 = por %p2383_p12, %p2382_p11 }
 0x4a5   : > { %1817 = vmatpush.bf16.msrb.mxu1 %v2094_v34  ;;  %p2380_p10 = pneg %p2379_p9 }
 0x4a7   : > { %p2385_p0 = pnand %p2384_p13, %p2380_p10 }
 0x4a9   : > { %1818 = vmatpush.bf16.msrb.mxu1 %v2093_v37 }
 0x4f9   : > { %v1601_v38 = vpop.permute.xlu2 %1600 }
 0x50f   : > { %v1605_v60 = vpop.permute.xlu0 %1604 }
 0x511   : > { %v1597_v63 = vpop.permute.xlu1 %1596 }
 0x512   : > { %v1607_v40 = vsel %vm1279_vm8, %v1588_v35, %v1597_v63 }
 0x513   : > { %v1609_v41 = vsel %vm1608_vm10, %v1607_v40, %v1601_v38 }
 0x514   : > { %v1611_v42 = vsel %vm1610_vm11, %v1609_v41, %v1605_v60 }
 0x515   : > { %v1612_v44 = vpack.c.bf16 %v1611_v42, %v1611_v42 }
 0x517   : > { %2051 = vmatmul.msk.bf16.vlgmr.msra.gmra.mxu3 %vm732_vm0, %v1612_v44 }
 0x59a   : > { %v1645_v47 = vpop.f32.mrf.mxu3 }
 0x59b   : > { %v1646_v39 = vadd.f32 %v2207_v45, %v1645_v47 }
 0x59d   : > { %v1649_v49 = vadd.f32 %v2240_v48, %v1646_v39 }
 0x59f   : > { %v1652_v50 = vsel %vm732_vm0, %v1649_v49, 0.0 }
 0x5a0   : > { %1653 = vadd.xlane.f32.xlu1 %v1652_v50 }
 0x5a2   : > { %v1647_v52 = vpop.f32.mrf.mxu3 }
 0x613   : > { %v1654_v53 = vpop.xlane.xlu1 %1653 }
 0x614   : > { %v1662_v56 = vmul.f32 %v1654_v53, %v2710_v8 }
 0x616   : > { %v1663_v46 = vsub.f32 %v1649_v49, %v1662_v56 }
 0x618   : > { %v1664_v57 = vmul.f32 %v1663_v46, %v1663_v46 }
 0x61a   : > { %v1665_v58 = vsel %vm732_vm0, %v1664_v57, 0.0 }
 0x61b   : > { %1666 = vadd.xlane.f32.xlu0 %v1665_v58 }
 0x68e   : > { %v1667_v62 = vpop.xlane.xlu0 %1666 }
 0x68f   : > { %v1668_v0 = vmul.f32 %v1667_v62, %v2710_v8 }
 0x691   : > { %v1669_v1 = vadd.f32 1e-12, %v1668_v0  ;;  %v2211_v0 = vld [vmem:[%s3125_s28] ss:$0 sm:$0xff]  ;;  %s3128_s28 = sld [smem:[#allocation32_spill]] }
 0x693   : > { %2234 = vrsqrt.f32 %v1669_v1  ;;  %vm1676_vm13 = vweird.f32 %v1669_v1 }
 0x699   : > { %v2235_v2 = vpop.eup %2234 }
 0x69a   : > { %v1671_v3 = vmul.f32 %v2235_v2, %v1669_v1  ;;  %vm1677_vm12 = vweird.f32 %v2235_v2 }
 0x69b   : > { %vm1678_vm14 = vmor %vm1676_vm13, %vm1677_vm12 }
 0x69c   : > { %v1672_v4 = vmul.f32 %v2235_v2, %v1671_v3 }
 0x69e   : > { %v1673_v5 = vmul.f32 0.5, %v1672_v4 }
 0x6a0   : > { %v1674_v6 = vsub.f32 1.5, %v1673_v5 }
 0x6a2   : > { %v1675_v7 = vmul.f32 %v2235_v2, %v1674_v6 }
 0x6a4   : > { %v1679_v10 = vsel %vm1678_vm14, %v2235_v2, %v1675_v7 }
 0x6a5   : > { %v1680_v12 = vmul.f32 %v1679_v10, %v1663_v46 }
 0x6a7   : > { %v1684_v13 = vmul.f32 %v2208_v9, %v1680_v12 }
 0x6a9   : > { %v2990_v14 = vadd.f32 %v2209_v11, %v1684_v13 }
 0x6ab   : > { %v1689_v15 = vpack.c.bf16 %v2990_v14, %v2990_v14 }
 0x6ad   : > { %2060 = vmatmul.msk.bf16.vlgmr.msrb.gmra.mxu0 %vm732_vm0, %v1689_v15 }
 0x72a   : > { %v1722_v17 = vpop.f32.mrf.mxu0 }
 0x72b   : > { %v1723_v18 = vadd.f32 %v2210_v16, %v1722_v17 }
 0x72d   : > { %v1727_v19 = vmul.f32 0.70710677, %v1723_v18  ;;  %v1726_v58 = vmul.f32 0.5, %v1723_v18 }
 0x72f   : > { %v1728_v20 = vmul.f32 %v1727_v19, %v1727_v19 }
 0x731   : > { %v1729_v21 = vmin.f32 %v1728_v20, 16.0 }
 0x732   : > { %v1724_v22 = vpop.f32.mrf.mxu0 }
 0x733   : > { %v1730_v23 = vmul.f32 2.1237322e-06, %v1729_v21  ;;  %v1741_v24 = vmul.f32 3.8918573e-05, %v1729_v21 }
 0x735   : > { %v1731_v25 = vadd.f32 0.00028619796, %v1730_v23  ;;  %v1742_v26 = vadd.f32 0.001143296, %v1741_v24  ;;  %v2213_v23 = vld [vmem:[%s3128_s28] ss:$0 sm:$0xff] }
 0x737   : > { %v1732_v27 = vmul.f32 %v1731_v25, %v1729_v21  ;;  %v1743_v43 = vmul.f32 %v1742_v26, %v1729_v21 }
 0x739   : > { %v1744_v28 = vadd.f32 0.014752088, %v1743_v43  ;;  %v1733_v29 = vadd.f32 0.0036580483, %v1732_v27 }
 0x73b   : > { %v1745_v55 = vmul.f32 %v1744_v28, %v1729_v21  ;;  %v1734_v51 = vmul.f32 %v1733_v29, %v1729_v21 }
 0x73d   : > { %v1746_v31 = vadd.f32 0.112945676, %v1745_v55  ;;  %v1735_v35 = vadd.f32 0.05243302, %v1734_v51 }
 0x73f   : > { %v1747_v33 = vmul.f32 %v1746_v31, %v1729_v21  ;;  %v1736_v38 = vmul.f32 %v1735_v35, %v1729_v21 }
 0x741   : > { %v1748_v54 = vadd.f32 0.4994258, %v1747_v33  ;;  %v1737_v40 = vadd.f32 0.18741608, %v1736_v38 }
 0x743   : > { %v1749_v36 = vmul.f32 %v1748_v54, %v1729_v21  ;;  %v1738_v41 = vmul.f32 %v1737_v40, %v1729_v21  ;;  %v2212_v21 = vld [vmem:[%s3126_s27] ss:$0 sm:$0xff] }
 0x745   : > { %v1750_v63 = vadd.f32 1.0, %v1749_v36  ;;  %v1739_v47 = vadd.f32 1.1283791, %v1738_v41 }
 0x747   : > { %2236 = vrcp.f32 %v1750_v63  ;;  %v1762_v45 = vand.u32 2147483648, %v1750_v63  ;;  %v1760_v48 = vand.u32 2147483647, %v1750_v63  ;;  %vm1756_vm1 = vweird.f32 %v1750_v63 }
 0x748   : > { %v1740_v52 = vmul.f32 %v1739_v47, %v1727_v19 }
 0x749   : > { %v1763_v50 = vor.u32 1.1754944e-38, %v1762_v45  ;;  %vm1761_vm3 = vcmp.eq.f32.partialorder %v1760_v48, 8.507059e+37 }
 0x74d   : > { %v2237_v60 = vpop.eup %2236 }
 0x74e   : > { %v1752_v42 = vmul.f32 %v2237_v60, %v1750_v63  ;;  %vm1757_vm15 = vweird.f32 %v2237_v60 }
 0x74f   : > { %vm1758_vm2 = vmor %vm1756_vm1, %vm1757_vm15 }
 0x750   : > { %v1753_v44 = vsub.f32 1.0, %v1752_v42 }
 0x752   : > { %v1754_v39 = vmul.f32 %v2237_v60, %v1753_v44 }
 0x754   : > { %v1755_v49 = vadd.f32 %v2237_v60, %v1754_v39 }
 0x756   : > { %v1759_v53 = vsel %vm1758_vm2, %v2237_v60, %v1755_v49 }
 0x757   : > { %v1764_v56 = vsel %vm1761_vm3, %v1763_v50, %v1759_v53 }
 0x758   : > { %v1765_v46 = vmul.f32 %v1764_v56, %v1740_v52 }
 0x75a   : > { %v2061_v57 = vclamps-f32 %v1765_v46, 1.0 }
 0x75c   : > { %v1768_v59 = vadd.f32 1.0, %v2061_v57 }
 0x75e   : > { %v1769_v61 = vmul.f32 %v1768_v59, %v1726_v58 }
 0x760   : > { %v1770_v62 = vpack.c.bf16 %v1769_v61, %v1769_v61 }
 0x762   : > { %2078 = vmatmul.msk.bf16.vlgmr.msrb.gmra.mxu1 %vm1807_vm4, %v1770_v62 }
 0x7df   : > { %v1820_v1 = vpop.f32.mrf.mxu1 }
 0x7e0   : > { %v1821_v2 = vadd.f32 %v2211_v0, %v1820_v1 }
 0x7e2   : > { %v1824_v3 = vadd.f32 %v1821_v2, %v2990_v14 }
 0x7e4   : > { %v1827_v4 = vsel %vm732_vm0, %v1824_v3, 0.0 }
 0x7e5   : > { %1828 = vadd.xlane.f32.xlu2 %v1827_v4 }
 0x7e7   : > { %v1822_v5 = vpop.f32.mrf.mxu1 }
 0x858   : > { %v1829_v6 = vpop.xlane.xlu2 %1828 }
 0x859   : > { %v1830_v7 = vmul.f32 %v1829_v6, %v2710_v8 }
 0x85b   : > { %v1831_v9 = vsub.f32 %v1824_v3, %v1830_v7 }
 0x85d   : > { %v1832_v10 = vmul.f32 %v1831_v9, %v1831_v9 }
 0x85f   : > { %v1833_v11 = vsel %vm732_vm0, %v1832_v10, 0.0 }
 0x860   : > { %1834 = vadd.xlane.f32.xlu1 %v1833_v11 }
 0x8d3   : > { %v1835_v12 = vpop.xlane.xlu1 %1834 }
 0x8d4   : > { %v1836_v13 = vmul.f32 %v1835_v12, %v2710_v8 }
 0x8d6   : > { %v1837_v15 = vadd.f32 1e-12, %v1836_v13 }
 0x8d8   : > { %2238 = vrsqrt.f32 %v1837_v15  ;;  %vm1844_vm6 = vweird.f32 %v1837_v15 }
 0x8de   : > { %v2239_v14 = vpop.eup %2238 }
 0x8df   : > { %v1839_v16 = vmul.f32 %v2239_v14, %v1837_v15  ;;  %vm1845_vm5 = vweird.f32 %v2239_v14 }
 0x8e0   : > { %vm1846_vm7 = vmor %vm1844_vm6, %vm1845_vm5 }
 0x8e1   : > { %v1840_v17 = vmul.f32 %v2239_v14, %v1839_v16 }
 0x8e3   : > { %v1841_v18 = vmul.f32 0.5, %v1840_v17 }
 0x8e5   : > { %v1842_v19 = vsub.f32 1.5, %v1841_v18 }
 0x8e7   : > { %v1843_v20 = vmul.f32 %v2239_v14, %v1842_v19 }
 0x8e9   : > { %v1847_v8 = vsel %vm1846_vm7, %v2239_v14, %v1843_v20 }
 0x8ea   : > { %v1848_v22 = vmul.f32 %v1847_v8, %v1831_v9 }
 0x8ec   : > { %v1852_v24 = vmul.f32 %v2212_v21, %v1848_v22 }
 0x8ee   : > { %v1856_v25 = vadd.f32 %v2213_v23, %v1852_v24 }
 0x8f0   : > { %1857 = vst.msk [vmem:[%s719_s24] sm:$0xff] %vm732_vm0, %v1856_v25 }
 0x8f1   : > { %2388 = shalt.err (!%p2385_p0)
}
 0x8f2   : > { %2111 = dma.vmem_to_hbm [thread:$0]  (%p2663_p4), %s1873_s5, 128, %s1875_s6, %s1859_s10  }
 0x8f3 PF: > { %s3129_s0 = sld [smem:[#allocation18_spill]]  ;;  %p2128_p2 = pnand %p2001_p6, %p2671_p7 }
 0x8f5   : > { %p2129_p5 = pneg %p2128_p2 }
 0x8f9   : > { %s1886_s8 = sand.u32 1, %s3129_s0  }
 0x8fa   : > { %s1887_s26 = scalar_lea.sflag [#allocation7], %s1886_s8 }
 0x8fb   : > { %2426 = dma.done.wait (%p2129_p5), %s1887_s26, 128  }
 0x8fc   : > { %2428 = vsyncadd (%p2129_p5), %s1887_s26, 4294967168  ;;  %s38_s25 = sadd.s32 1, %s2451_s25   ;;  %s3130_s5 = sld [smem:[#allocation19_spill]] }
 0x8fd   : > { %p35_p8 = scmp.ge.s32.totalorder %s38_s25, 4   ;;  %s3131_s1 = smov %s2435_s22 }
 0x8fe   : > { %s3132_s22 = smov %s2439_s23  ;;  %s3133_s23 = smov %s2669_s3 }
 0x8ff   : > { %s3134_s24 = smov %s2447_s2  ;;  %37 = sbr.rel (!%p35_p8) target bundleno = 23 (0x17), region = 166 }
 0x902   : > { %s3135_s2 = smov %s3130_s5 }
 0x904   :  { %1893 = vsyncpa [#allocation6], 1 }
 0x905   :  { %1895 = vsyncpa [#allocation6 + $0x1], 1 }
 0x906   :  { %1896 = vsyncpa [#allocation9], 1 }
 0x907   :  { %1897 = vsyncpa [#allocation12], 1 }
 0x908   :  { %1898 = vsyncpa [#allocation7], 1 }
 0x909   :  { %1900 = vsyncpa [#allocation7 + $0x1], 1 }

</bundles_post_ra>
